<compile_context>
chip_gen: v7x
topology: tpu7x:2x2x1
jax: 0.10.0
libtpu: 0.0.40
codegen_flags: <defaults>
</compile_context>

<pallas_src>
import functools

import jax
import jax.numpy as jnp
from jax.experimental import pallas as pl
from jax.experimental.pallas import tpu as pltpu


# Flip to True on v5e/v6e for bf16 MXU inputs (f32 accumulation kept); default
# False to preserve the f32 numerics of the reference module.
USE_BF16 = False


def _round_up(x, m):
    return (x + m - 1) // m * m


# ----------------------------- fused layer kernel ----------------------------


def _fused_layer_kernel(y_ref, w_ref, rf_ref, scale_ref, shift_ref,
                        fh_ref, sc2_ref, *,
                        thickness, sw, kq, rrp, special_id, do_relu, use_bf16):
    """One GPSAttentionLayer (single head) entirely in VMEM.

    y_ref     [N, Fin_pad]      node features (lane-padded with zeros)
    w_ref     [Fin_pad, Dtot]   merged projection weights (W_0..W_{T-1}|Wk|Wq), padded
    rf_ref    [T, N, R]         receptive-field slices (int32); rf[0] == adj
    scale_ref, shift_ref [1, SW]  BN(eval) affine, lane-padded
    fh_ref    [N, SW]           output features (first Fout lanes valid, rest zero)
    sc2_ref   [N, RRp]          masked expansion scores (first R*R lanes valid)
    """
    n = y_ref.shape[0]
    r = rf_ref.shape[-1]
    mm_dtype = jnp.bfloat16 if use_bf16 else jnp.float32

    def mm(a):
        return a.astype(mm_dtype) if use_bf16 else a

    # ---- merged projection: one wide MXU matmul -------------------------------
    proj = jnp.dot(mm(y_ref[...]), mm(w_ref[...]),
                   preferred_element_type=jnp.float32)            # [N, Dtot]
    proj_mm = mm(proj)
    key_col = proj[:, kq:kq + 1]                                  # [N, 1]
    kq_block = proj[:, kq:kq + 128]                               # aligned, lane1 = q

    node_iota = jax.lax.broadcasted_iota(jnp.int32, (1, n), 1)    # [1, N]
    lane_r = jax.lax.broadcasted_iota(jnp.int32, (1, r), 1)       # [1, R]

    def onehot(col):                                              # col: [N,1] int32
        return (col == node_iota).astype(mm_dtype)                # [N, N]

    # ---- thickness loop: gather -> masked softmax -> weighted sum -------------
    final_h = proj[:, 0:sw]                                       # [N, SW]
    for ii in range(thickness):
        rf_ii = rf_ref[ii]                                        # [N, R] int32
        q_gather = jnp.zeros((n, r), jnp.float32)
        h_gathered = []
        for c in range(r):
            g = jnp.dot(onehot(rf_ii[:, c:c + 1]), proj_mm,
                        preferred_element_type=jnp.float32)       # [N, Dtot] = proj[rf]
            q_gather = q_gather + g[:, kq + 1:kq + 2] * (lane_r == c).astype(jnp.float32)
            h_gathered.append(g[:, ii * sw:(ii + 1) * sw])        # [N, SW]
        score = key_col * q_gather                                # [N, R]
        # global (pre-mask) min, exactly as in the torch reference
        min_val = jnp.min(score) - 1000.0
        masked = jnp.where(rf_ii != special_id, score, min_val)
        # k == R: sort/top-k is a permutation no-op; softmax over all R neighbors
        m = jnp.max(masked, axis=1, keepdims=True)
        e = jnp.exp(masked - m)
        attn = e / jnp.sum(e, axis=1, keepdims=True)              # exact division
        upd = attn[:, 0:1] * h_gathered[0]
        for c in range(1, r):
            upd = upd + attn[:, c:c + 1] * h_gathered[c]
        final_h = final_h + upd

    # fused BatchNorm(eval) affine + optional ReLU epilogue (dropout: identity)
    final_h = final_h * scale_ref[...] + shift_ref[...]
    if do_relu:
        final_h = jnp.maximum(final_h, 0.0)
    fh_ref[...] = final_h

    # ---- receptive-field expansion scores (selection done in glue) ------------
    # sc2[n, j1*R + j2] = key[n] * q[adj[rf_last[n, j1], j2]]
    adj_k = rf_ref[0]                                             # [N, R] == adj
    rf_last = rf_ref[thickness - 1]                               # [N, R]
    spec_adj = (adj_k == special_id).astype(jnp.float32)          # [N, R] 0/1

    # q_adj[m, j2] = q[adj[m, j2]]  (R gathers of the aligned key/query block)
    kq_mm = mm(kq_block)
    q_adj = jnp.zeros((n, r), jnp.float32)
    for c in range(r):
        gq = jnp.dot(onehot(adj_k[:, c:c + 1]), kq_mm,
                     preferred_element_type=jnp.float32)          # [N, 128]
        q_adj = q_adj + gq[:, 1:2] * (lane_r == c).astype(jnp.float32)
    q_adj_mm = mm(q_adj)
    spec_mm = mm(spec_adj)

    raw_blocks, spec_blocks = [], []
    for j1 in range(r):
        oh = onehot(rf_last[:, j1:j1 + 1])
        raw_blocks.append(key_col * jnp.dot(oh, q_adj_mm,
                                            preferred_element_type=jnp.float32))
        spec_blocks.append(jnp.dot(oh, spec_mm,
                                   preferred_element_type=jnp.float32))

    raw_min = raw_blocks[0]
    for j1 in range(1, r):
        raw_min = jnp.minimum(raw_min, raw_blocks[j1])
    min2 = jnp.min(raw_min) - 1.0                                 # pre-mask global min

    lane_rr = jax.lax.broadcasted_iota(jnp.int32, (n, rrp), 1)
    sc2 = jnp.where(lane_rr < r * r, 0.0, -1e30).astype(jnp.float32)  # [N, RRp]
    rowi = jax.lax.broadcasted_iota(jnp.int32, (r, rrp), 0)
    coli = jax.lax.broadcasted_iota(jnp.int32, (r, rrp), 1)
    for j1 in range(r):
        masked_blk = jnp.where(spec_blocks[j1] > 0.5, min2, raw_blocks[j1])  # [N, R]
        place = ((coli - j1 * r) == rowi).astype(jnp.float32)     # static [R, RRp]
        sc2 = sc2 + jnp.dot(masked_blk, place, preferred_element_type=jnp.float32)
    sc2_ref[...] = sc2


def _fused_layer_vmem_bytes(n, fin_pad, dtot, t, r, sw, rrp):
    f32 = 4
    in_elems = n * fin_pad + fin_pad * dtot + t * n * r + 2 * sw
    out_elems = n * sw + n * rrp
    io = 2 * (in_elems + out_elems) * f32            # double-buffered pipeline copies
    scratch = (2 * n * dtot + 2 * n * n + (r + 3) * n * sw
               + 2 * n * rrp + 10 * n * r) * f32     # proj/one-hot/gathers/accum
    est = io + scratch + (8 << 20)                   # headroom for spills/relayouts
    return int(min(max(est, 32 << 20), 64 << 20))


def _fused_layer_call(y, w_cat, rf, scale, shift, *,
                      thickness, sw, kq, rrp, special_id, do_relu, use_bf16):
    H = w_cat.shape[0]
    Hy, N, Fin_pad = y.shape
    R = rf.shape[-1]
    Dtot = w_cat.shape[-1]
    if Hy == 1:                                      # layer-0: features shared by heads
        y_map = lambda h: (0, 0, 0)
    else:
        y_map = lambda h: (h, 0, 0)
    kern = functools.partial(
        _fused_layer_kernel, thickness=thickness, sw=sw, kq=kq, rrp=rrp,
        special_id=special_id, do_relu=do_relu, use_bf16=use_bf16)
    return pl.pallas_call(
        kern,
        out_shape=(jax.ShapeDtypeStruct((H, N, sw), jnp.float32),
                   jax.ShapeDtypeStruct((H, N, rrp), jnp.float32)),
        grid=(H,),
        in_specs=[
            pl.BlockSpec((None, N, Fin_pad), y_map),
            pl.BlockSpec((None, Fin_pad, Dtot), lambda h: (h, 0, 0)),
            pl.BlockSpec((None, thickness, N, R), lambda h: (h, 0, 0, 0)),
            pl.BlockSpec((None, 1, sw), lambda h: (h, 0, 0)),
            pl.BlockSpec((None, 1, sw), lambda h: (h, 0, 0)),
        ],
        out_specs=(
            pl.BlockSpec((None, N, sw), lambda h: (h, 0, 0)),
            pl.BlockSpec((None, N, rrp), lambda h: (h, 0, 0)),
        ),
        compiler_params=pltpu.CompilerParams(
            dimension_semantics=("parallel",),
            vmem_limit_bytes=_fused_layer_vmem_bytes(N, Fin_pad, Dtot, thickness,
                                                     R, sw, rrp)),
    )(y, w_cat, rf, scale, shift)


# ------------------------- head-sum + log-softmax kernel ----------------------


def _headsum_logsoftmax_kernel(y_ref, o_ref, *, nclass):
    x = jnp.sum(y_ref[...], axis=0)                               # [N, Cpad]
    lane = jax.lax.broadcasted_iota(jnp.int32, x.shape, 1)
    valid = lane < nclass
    xm = jnp.where(valid, x, -1e30)
    m = jnp.max(xm, axis=-1, keepdims=True)
    s = xm - m
    lse = jnp.log(jnp.sum(jnp.where(valid, jnp.exp(s), 0.0), axis=-1, keepdims=True))
    o_ref[...] = s - lse


def pallas_headsum_log_softmax(y, nclass):
    H, N, C = y.shape
    return pl.pallas_call(
        functools.partial(_headsum_logsoftmax_kernel, nclass=nclass),
        out_shape=jax.ShapeDtypeStruct((N, C), jnp.float32),
        grid=(1,),
        in_specs=[pl.BlockSpec((H, N, C), lambda i: (0, 0, 0))],
        out_specs=pl.BlockSpec((N, C), lambda i: (0, 0)),
    )(y)


# --------------------------- GPS attention layer (glue) -----------------------


def gps_attention_layer_batched(p, y, rf, adj, *, k_param=100, use_bf16=False):
    """All heads of one GPSAttentionLayer (inference mode).

    y: [Hy, N, Fin_pad] f32 (Hy==1 means shared across heads);
    rf: [H, T, N, R] int32; adj: [N, R] int32.
    Returns (final_h [H, N, SW], rf [H, T+1, N, R]).
    """
    H = p["W"].shape[0]
    T = p["thickness"]
    Fin = p["W"].shape[-2]
    Fout = p["W"].shape[-1]
    Hy, N, Fin_pad = y.shape
    R = rf.shape[-1]
    k = min(k_param, R)
    if k != R:
        # TODO(synk): k < num_recep (top-k truncation before softmax) path is not
        # fused; the reference config uses k=100 >= max_degree so k == R always.
        raise NotImplementedError("fused GPS layer requires k == num_recep")
    special_id = N - 1

    SW = _round_up(Fout, 128)          # 128-aligned stride per thickness slice
    KQ = T * SW                        # aligned offset of the key/query block
    Dtot = KQ + 128                    # total (lane-dense) projection width
    RRp = _round_up(R * R, 128)

    # merged, lane-padded projection weights: [H, Fin_pad, Dtot]
    w_cat = jnp.zeros((H, Fin_pad, Dtot), jnp.float32)
    for ii in range(T):
        w_cat = w_cat.at[:, :Fin, ii * SW: ii * SW + Fout].set(p["W"][:, ii])
    w_cat = w_cat.at[:, :Fin, KQ:KQ + 1].set(p["Wk"])
    w_cat = w_cat.at[:, :Fin, KQ + 1:KQ + 2].set(p["Wq"])

    # BatchNorm1d eval -> affine (identity if no norm); lane-padded with zeros
    scale = jnp.zeros((H, 1, SW), jnp.float32)
    shift = jnp.zeros((H, 1, SW), jnp.float32)
    if p["need_norm"]:
        inv = p["bn_gamma"] / jnp.sqrt(p["bn_var"] + 1e-5)        # [H, Fout]
        scale = scale.at[:, 0, :Fout].set(inv)
        shift = shift.at[:, 0, :Fout].set(p["bn_beta"] - p["bn_mean"] * inv)
    else:
        scale = scale.at[:, 0, :Fout].set(1.0)

    do_relu = (T != 2)

    final_h, scores2 = _fused_layer_call(
        y, w_cat, rf, scale, shift,
        thickness=T, sw=SW, kq=KQ, rrp=RRp, special_id=special_id,
        do_relu=do_relu, use_bf16=use_bf16)

    # receptive-field expansion selection: descending sort / top-R in glue.
    # Padded lanes are -1e30 so they are never selected (R*R >= R real lanes).
    # TODO(synk): lax.top_k tie-breaking can differ from torch.sort(descending)
    # when masked entries share the same (min-offset) score value.
    rf_last = rf[:, T - 1]                                        # [H, N, R]
    neighbor = jnp.take(adj, rf_last.reshape(H, N * R), axis=0)   # [H, N*R, R]
    neighbor = neighbor.reshape(H, N, R * R).astype(jnp.int32)
    _, idx2 = jax.lax.top_k(scores2, R)                           # [H, N, R]
    expand = jnp.take_along_axis(neighbor, idx2, axis=2)          # [H, N, R]
    rf = jnp.concatenate([rf, expand[:, None]], axis=1)           # [H, T+1, N, R]
    return final_h, rf


# --------------------------------- GPS model ----------------------------------


def _xavier_normal(key, shape, gain=1.414):
    if len(shape) == 2:
        fan_in, fan_out = shape
    else:  # (thickness, in, out) — matches torch's fan computation for >2D
        fan_in = shape[1] * shape[2]
        fan_out = shape[0] * shape[2]
    std = gain * (2.0 / (fan_in + fan_out)) ** 0.5
    return std * jax.random.normal(key, shape, jnp.float32)


def init_gps_params(key, nfeat, nhid, nclass, nheads, layers=2):
    params = []  # one dict per layer, parameters stacked over heads
    for layer in range(layers):
        if layer == 0:
            fin, fout, thickness, need_norm = nfeat, nhid, 1, True
        elif layer == layers - 1:
            fin, fout, thickness, need_norm = nhid, nclass, layers, False
        else:
            fin, fout, thickness, need_norm = nhid, nhid, layer + 1, True
        Ws, Wks, Wqs = [], [], []
        for _ in range(nheads):
            key, k1, k2, k3 = jax.random.split(key, 4)
            Ws.append(_xavier_normal(k1, (thickness, fin, fout)))
            Wks.append(_xavier_normal(k2, (fin, 1)))
            Wqs.append(_xavier_normal(k3, (fin, 1)))
        p = {
            "W": jnp.stack(Ws),        # [H, T, Fin, Fout]
            "Wk": jnp.stack(Wks),      # [H, Fin, 1]
            "Wq": jnp.stack(Wqs),      # [H, Fin, 1]
            "thickness": thickness,
            "need_norm": need_norm,
        }
        if need_norm:
            p["bn_gamma"] = jnp.ones((nheads, fout), jnp.float32)
            p["bn_beta"] = jnp.zeros((nheads, fout), jnp.float32)
            p["bn_mean"] = jnp.zeros((nheads, fout), jnp.float32)
            p["bn_var"] = jnp.ones((nheads, fout), jnp.float32)
        params.append(p)
    return params


def gps_forward(params, x, adj, max_degree, *, k_param=100, use_bf16=USE_BF16):
    """GPS.forward (inference).  x: [N0, nfeat] f32, adj: [N0, max_degree] int."""
    n0, fin = x.shape
    special_id = n0
    # append special node (zero features; its adjacency row points to itself)
    x = jnp.concatenate([x, jnp.zeros((1, fin), x.dtype)], axis=0)               # [N, F]
    adj = jnp.concatenate(
        [adj.astype(jnp.int32), jnp.full((1, max_degree), special_id, jnp.int32)],
        axis=0)                                                                  # [N, R]
    N = n0 + 1
    R = max_degree
    H = params[0]["W"].shape[0]
    nclass = params[-1]["W"].shape[-1]

    y = x[None]                                                  # [1, N, Fin] shared
    rf = jnp.broadcast_to(adj[None, None], (H, 1, N, R)).astype(jnp.int32)

    for p in params:
        y, rf = gps_attention_layer_batched(p, y, rf, adj,
                                            k_param=k_param, use_bf16=use_bf16)

    out = pallas_headsum_log_softmax(y, nclass)                  # [N, Cpad]
    return out[:n0, :nclass]


# ----------------------------------- main --------------------------------------


if __name__ == "__main__":
    N0, nfeat, nhid, nclass, nheads, max_degree = 15, 16, 32, 8, 2, 6

    root = jax.random.PRNGKey(0)
    kx, ka, kp = jax.random.split(root, 3)
    x = jax.random.normal(kx, (N0, nfeat), jnp.float32)
    adj = jax.random.randint(ka, (N0, max_degree), 0, N0).astype(jnp.int32)
    params = init_gps_params(kp, nfeat, nhid, nclass, nheads, layers=2)

    fwd = jax.jit(lambda xx, aa: gps_forward(params, xx, aa, max_degree))
    out = fwd(x, adj)
    out = jax.block_until_ready(out)
    assert out.shape == (N0, nclass)
    assert bool(jnp.all(jnp.isfinite(out)))
    print("KERNEL_OK")
</pallas_src>

<mosaic_0001>
module attributes {stable_mosaic.version = 11 : i64} {
  func.func @_fused_layer_kernel(%arg0: i32, %arg1: memref<1x16x16xf32, #tpu.memory_space<vmem>>, %arg2: memref<1x16x256xf32, #tpu.memory_space<vmem>>, %arg3: memref<1x1x16x6xi32, #tpu.memory_space<vmem>>, %arg4: memref<1x1x128xf32, #tpu.memory_space<vmem>>, %arg5: memref<1x1x128xf32, #tpu.memory_space<vmem>>, %arg6: memref<1x16x128xf32, #tpu.memory_space<vmem>>, %arg7: memref<1x16x128xf32, #tpu.memory_space<vmem>>) attributes {dimension_semantics = [#tpu.dimension_semantics<parallel>], iteration_bounds = array<i64: 2>, scalar_prefetch = 0 : i64, scratch_operands = 0 : i64, tpu.core_type = #tpu.core_type<tc>, window_params = [{pipeline_mode = #tpu.pipeline_mode<synchronous>, transform_indices = @transform_0, window_bounds = array<i64: 1, 16, 16>}, {transform_indices = @transform_1, window_bounds = array<i64: 1, 16, 256>}, {transform_indices = @transform_2, window_bounds = array<i64: 1, 1, 16, 6>}, {transform_indices = @transform_3, window_bounds = array<i64: 1, 1, 128>}, {transform_indices = @transform_4, window_bounds = array<i64: 1, 1, 128>}, {transform_indices = @transform_5, window_bounds = array<i64: 1, 16, 128>}, {transform_indices = @transform_6, window_bounds = array<i64: 1, 16, 128>}]} {
    %c0 = arith.constant 0 : index
    %c0_0 = arith.constant 0 : index
    %c0_1 = arith.constant 0 : index
    %0 = vector.load %arg1[%c0, %c0_0, %c0_1] : memref<1x16x16xf32, #tpu.memory_space<vmem>>, vector<1x16x16xf32>
    %1 = vector.shape_cast %0 : vector<1x16x16xf32> to vector<16x16xf32>
    %c0_2 = arith.constant 0 : index
    %c0_3 = arith.constant 0 : index
    %c0_4 = arith.constant 0 : index
    %2 = vector.load %arg2[%c0_2, %c0_3, %c0_4] : memref<1x16x256xf32, #tpu.memory_space<vmem>>, vector<1x16x256xf32>
    %3 = vector.shape_cast %2 : vector<1x16x256xf32> to vector<16x256xf32>
    %cst = arith.constant dense<0.000000e+00> : vector<16x256xf32>
    %4 = tpu.matmul %1, %3, %cst {dimension_numbers = #tpu.dot_dimension_numbers<[1], [0], [0], [1], [0, 0, 1, 1], [], []>} : vector<16x16xf32>, vector<16x256xf32>, vector<16x256xf32> -> vector<16x256xf32>
    %5 = vector.extract_strided_slice %4 {offsets = [0, 128], sizes = [16, 1], strides = [1, 1]} : vector<16x256xf32> to vector<16x1xf32>
    %6 = vector.extract_strided_slice %4 {offsets = [0, 128], sizes = [16, 128], strides = [1, 1]} : vector<16x256xf32> to vector<16x128xf32>
    %7 = tpu.iota {dimensions = array<i32: 1>} : vector<1x16xi32>
    %8 = tpu.iota {dimensions = array<i32: 1>} : vector<1x6xi32>
    %9 = vector.extract_strided_slice %4 {offsets = [0, 0], sizes = [16, 128], strides = [1, 1]} : vector<16x256xf32> to vector<16x128xf32>
    %c0_5 = arith.constant 0 : index
    %c0_6 = arith.constant 0 : index
    %c0_7 = arith.constant 0 : index
    %c0_8 = arith.constant 0 : index
    %10 = vector.load %arg3[%c0_5, %c0_6, %c0_7, %c0_8] : memref<1x1x16x6xi32, #tpu.memory_space<vmem>>, vector<1x1x16x6xi32>
    %11 = vector.shape_cast %10 : vector<1x1x16x6xi32> to vector<16x6xi32>
    %cst_9 = arith.constant 0.000000e+00 : f32
    %12 = vector.broadcast %cst_9 : f32 to vector<16x6xf32>
    %13 = vector.extract_strided_slice %11 {offsets = [0, 0], sizes = [16, 1], strides = [1, 1]} : vector<16x6xi32> to vector<16x1xi32>
    %14 = vector.broadcast %13 : vector<16x1xi32> to vector<16x16xi32>
    %15 = vector.broadcast %7 : vector<1x16xi32> to vector<16x16xi32>
    %16 = arith.cmpi eq, %14, %15 : vector<16x16xi32>
    %17 = arith.extui %16 : vector<16x16xi1> to vector<16x16xi32>
    %18 = arith.sitofp %17 : vector<16x16xi32> to vector<16x16xf32>
    %cst_10 = arith.constant dense<0.000000e+00> : vector<16x256xf32>
    %19 = tpu.matmul %18, %4, %cst_10 {dimension_numbers = #tpu.dot_dimension_numbers<[1], [0], [0], [1], [0, 0, 1, 1], [], []>} : vector<16x16xf32>, vector<16x256xf32>, vector<16x256xf32> -> vector<16x256xf32>
    %20 = vector.extract_strided_slice %19 {offsets = [0, 129], sizes = [16, 1], strides = [1, 1]} : vector<16x256xf32> to vector<16x1xf32>
    %c0_i32 = arith.constant 0 : i32
    %21 = vector.broadcast %c0_i32 : i32 to vector<1x6xi32>
    %22 = arith.cmpi eq, %8, %21 : vector<1x6xi32>
    %23 = arith.extui %22 : vector<1x6xi1> to vector<1x6xi32>
    %24 = arith.sitofp %23 : vector<1x6xi32> to vector<1x6xf32>
    %25 = vector.broadcast %20 : vector<16x1xf32> to vector<16x6xf32>
    %26 = vector.broadcast %24 : vector<1x6xf32> to vector<16x6xf32>
    %27 = arith.mulf %25, %26 : vector<16x6xf32>
    %28 = arith.addf %12, %27 : vector<16x6xf32>
    %29 = vector.extract_strided_slice %19 {offsets = [0, 0], sizes = [16, 128], strides = [1, 1]} : vector<16x256xf32> to vector<16x128xf32>
    %30 = vector.extract_strided_slice %11 {offsets = [0, 1], sizes = [16, 1], strides = [1, 1]} : vector<16x6xi32> to vector<16x1xi32>
    %31 = vector.broadcast %30 : vector<16x1xi32> to vector<16x16xi32>
    %32 = vector.broadcast %7 : vector<1x16xi32> to vector<16x16xi32>
    %33 = arith.cmpi eq, %31, %32 : vector<16x16xi32>
    %34 = arith.extui %33 : vector<16x16xi1> to vector<16x16xi32>
    %35 = arith.sitofp %34 : vector<16x16xi32> to vector<16x16xf32>
    %cst_11 = arith.constant dense<0.000000e+00> : vector<16x256xf32>
    %36 = tpu.matmul %35, %4, %cst_11 {dimension_numbers = #tpu.dot_dimension_numbers<[1], [0], [0], [1], [0, 0, 1, 1], [], []>} : vector<16x16xf32>, vector<16x256xf32>, vector<16x256xf32> -> vector<16x256xf32>
    %37 = vector.extract_strided_slice %36 {offsets = [0, 129], sizes = [16, 1], strides = [1, 1]} : vector<16x256xf32> to vector<16x1xf32>
    %c1_i32 = arith.constant 1 : i32
    %38 = vector.broadcast %c1_i32 : i32 to vector<1x6xi32>
    %39 = arith.cmpi eq, %8, %38 : vector<1x6xi32>
    %40 = arith.extui %39 : vector<1x6xi1> to vector<1x6xi32>
    %41 = arith.sitofp %40 : vector<1x6xi32> to vector<1x6xf32>
    %42 = vector.broadcast %37 : vector<16x1xf32> to vector<16x6xf32>
    %43 = vector.broadcast %41 : vector<1x6xf32> to vector<16x6xf32>
    %44 = arith.mulf %42, %43 : vector<16x6xf32>
    %45 = arith.addf %28, %44 : vector<16x6xf32>
    %46 = vector.extract_strided_slice %36 {offsets = [0, 0], sizes = [16, 128], strides = [1, 1]} : vector<16x256xf32> to vector<16x128xf32>
    %47 = vector.extract_strided_slice %11 {offsets = [0, 2], sizes = [16, 1], strides = [1, 1]} : vector<16x6xi32> to vector<16x1xi32>
    %48 = vector.broadcast %47 : vector<16x1xi32> to vector<16x16xi32>
    %49 = vector.broadcast %7 : vector<1x16xi32> to vector<16x16xi32>
    %50 = arith.cmpi eq, %48, %49 : vector<16x16xi32>
    %51 = arith.extui %50 : vector<16x16xi1> to vector<16x16xi32>
    %52 = arith.sitofp %51 : vector<16x16xi32> to vector<16x16xf32>
    %cst_12 = arith.constant dense<0.000000e+00> : vector<16x256xf32>
    %53 = tpu.matmul %52, %4, %cst_12 {dimension_numbers = #tpu.dot_dimension_numbers<[1], [0], [0], [1], [0, 0, 1, 1], [], []>} : vector<16x16xf32>, vector<16x256xf32>, vector<16x256xf32> -> vector<16x256xf32>
    %54 = vector.extract_strided_slice %53 {offsets = [0, 129], sizes = [16, 1], strides = [1, 1]} : vector<16x256xf32> to vector<16x1xf32>
    %c2_i32 = arith.constant 2 : i32
    %55 = vector.broadcast %c2_i32 : i32 to vector<1x6xi32>
    %56 = arith.cmpi eq, %8, %55 : vector<1x6xi32>
    %57 = arith.extui %56 : vector<1x6xi1> to vector<1x6xi32>
    %58 = arith.sitofp %57 : vector<1x6xi32> to vector<1x6xf32>
    %59 = vector.broadcast %54 : vector<16x1xf32> to vector<16x6xf32>
    %60 = vector.broadcast %58 : vector<1x6xf32> to vector<16x6xf32>
    %61 = arith.mulf %59, %60 : vector<16x6xf32>
    %62 = arith.addf %45, %61 : vector<16x6xf32>
    %63 = vector.extract_strided_slice %53 {offsets = [0, 0], sizes = [16, 128], strides = [1, 1]} : vector<16x256xf32> to vector<16x128xf32>
    %64 = vector.extract_strided_slice %11 {offsets = [0, 3], sizes = [16, 1], strides = [1, 1]} : vector<16x6xi32> to vector<16x1xi32>
    %65 = vector.broadcast %64 : vector<16x1xi32> to vector<16x16xi32>
    %66 = vector.broadcast %7 : vector<1x16xi32> to vector<16x16xi32>
    %67 = arith.cmpi eq, %65, %66 : vector<16x16xi32>
    %68 = arith.extui %67 : vector<16x16xi1> to vector<16x16xi32>
    %69 = arith.sitofp %68 : vector<16x16xi32> to vector<16x16xf32>
    %cst_13 = arith.constant dense<0.000000e+00> : vector<16x256xf32>
    %70 = tpu.matmul %69, %4, %cst_13 {dimension_numbers = #tpu.dot_dimension_numbers<[1], [0], [0], [1], [0, 0, 1, 1], [], []>} : vector<16x16xf32>, vector<16x256xf32>, vector<16x256xf32> -> vector<16x256xf32>
    %71 = vector.extract_strided_slice %70 {offsets = [0, 129], sizes = [16, 1], strides = [1, 1]} : vector<16x256xf32> to vector<16x1xf32>
    %c3_i32 = arith.constant 3 : i32
    %72 = vector.broadcast %c3_i32 : i32 to vector<1x6xi32>
    %73 = arith.cmpi eq, %8, %72 : vector<1x6xi32>
    %74 = arith.extui %73 : vector<1x6xi1> to vector<1x6xi32>
    %75 = arith.sitofp %74 : vector<1x6xi32> to vector<1x6xf32>
    %76 = vector.broadcast %71 : vector<16x1xf32> to vector<16x6xf32>
    %77 = vector.broadcast %75 : vector<1x6xf32> to vector<16x6xf32>
    %78 = arith.mulf %76, %77 : vector<16x6xf32>
    %79 = arith.addf %62, %78 : vector<16x6xf32>
    %80 = vector.extract_strided_slice %70 {offsets = [0, 0], sizes = [16, 128], strides = [1, 1]} : vector<16x256xf32> to vector<16x128xf32>
    %81 = vector.extract_strided_slice %11 {offsets = [0, 4], sizes = [16, 1], strides = [1, 1]} : vector<16x6xi32> to vector<16x1xi32>
    %82 = vector.broadcast %81 : vector<16x1xi32> to vector<16x16xi32>
    %83 = vector.broadcast %7 : vector<1x16xi32> to vector<16x16xi32>
    %84 = arith.cmpi eq, %82, %83 : vector<16x16xi32>
    %85 = arith.extui %84 : vector<16x16xi1> to vector<16x16xi32>
    %86 = arith.sitofp %85 : vector<16x16xi32> to vector<16x16xf32>
    %cst_14 = arith.constant dense<0.000000e+00> : vector<16x256xf32>
    %87 = tpu.matmul %86, %4, %cst_14 {dimension_numbers = #tpu.dot_dimension_numbers<[1], [0], [0], [1], [0, 0, 1, 1], [], []>} : vector<16x16xf32>, vector<16x256xf32>, vector<16x256xf32> -> vector<16x256xf32>
    %88 = vector.extract_strided_slice %87 {offsets = [0, 129], sizes = [16, 1], strides = [1, 1]} : vector<16x256xf32> to vector<16x1xf32>
    %c4_i32 = arith.constant 4 : i32
    %89 = vector.broadcast %c4_i32 : i32 to vector<1x6xi32>
    %90 = arith.cmpi eq, %8, %89 : vector<1x6xi32>
    %91 = arith.extui %90 : vector<1x6xi1> to vector<1x6xi32>
    %92 = arith.sitofp %91 : vector<1x6xi32> to vector<1x6xf32>
    %93 = vector.broadcast %88 : vector<16x1xf32> to vector<16x6xf32>
    %94 = vector.broadcast %92 : vector<1x6xf32> to vector<16x6xf32>
    %95 = arith.mulf %93, %94 : vector<16x6xf32>
    %96 = arith.addf %79, %95 : vector<16x6xf32>
    %97 = vector.extract_strided_slice %87 {offsets = [0, 0], sizes = [16, 128], strides = [1, 1]} : vector<16x256xf32> to vector<16x128xf32>
    %98 = vector.extract_strided_slice %11 {offsets = [0, 5], sizes = [16, 1], strides = [1, 1]} : vector<16x6xi32> to vector<16x1xi32>
    %99 = vector.broadcast %98 : vector<16x1xi32> to vector<16x16xi32>
    %100 = vector.broadcast %7 : vector<1x16xi32> to vector<16x16xi32>
    %101 = arith.cmpi eq, %99, %100 : vector<16x16xi32>
    %102 = arith.extui %101 : vector<16x16xi1> to vector<16x16xi32>
    %103 = arith.sitofp %102 : vector<16x16xi32> to vector<16x16xf32>
    %cst_15 = arith.constant dense<0.000000e+00> : vector<16x256xf32>
    %104 = tpu.matmul %103, %4, %cst_15 {dimension_numbers = #tpu.dot_dimension_numbers<[1], [0], [0], [1], [0, 0, 1, 1], [], []>} : vector<16x16xf32>, vector<16x256xf32>, vector<16x256xf32> -> vector<16x256xf32>
    %105 = vector.extract_strided_slice %104 {offsets = [0, 129], sizes = [16, 1], strides = [1, 1]} : vector<16x256xf32> to vector<16x1xf32>
    %c5_i32 = arith.constant 5 : i32
    %106 = vector.broadcast %c5_i32 : i32 to vector<1x6xi32>
    %107 = arith.cmpi eq, %8, %106 : vector<1x6xi32>
    %108 = arith.extui %107 : vector<1x6xi1> to vector<1x6xi32>
    %109 = arith.sitofp %108 : vector<1x6xi32> to vector<1x6xf32>
    %110 = vector.broadcast %105 : vector<16x1xf32> to vector<16x6xf32>
    %111 = vector.broadcast %109 : vector<1x6xf32> to vector<16x6xf32>
    %112 = arith.mulf %110, %111 : vector<16x6xf32>
    %113 = arith.addf %96, %112 : vector<16x6xf32>
    %114 = vector.extract_strided_slice %104 {offsets = [0, 0], sizes = [16, 128], strides = [1, 1]} : vector<16x256xf32> to vector<16x128xf32>
    %115 = vector.broadcast %5 : vector<16x1xf32> to vector<16x6xf32>
    %116 = arith.mulf %115, %113 : vector<16x6xf32>
    %117 = vector.shape_cast %116 : vector<16x6xf32> to vector<1x16x6xf32>
    %cst_16 = arith.constant dense<0x7F800000> : vector<1xf32>
    %118 = vector.multi_reduction <minimumf>, %117, %cst_16 [1, 2] : vector<1x16x6xf32> to vector<1xf32>
    %119 = vector.shape_cast %118 : vector<1xf32> to vector<1x1x1xf32>
    %120 = vector.extract %119[0, 0, 0] : f32 from vector<1x1x1xf32>
    %cst_17 = arith.constant 1.000000e+03 : f32
    %121 = arith.subf %120, %cst_17 : f32
    %c15_i32 = arith.constant 15 : i32
    %122 = vector.broadcast %c15_i32 : i32 to vector<16x6xi32>
    %123 = arith.cmpi ne, %11, %122 : vector<16x6xi32>
    %124 = vector.broadcast %121 : f32 to vector<16x6xf32>
    %125 = arith.select %123, %116, %124 : vector<16x6xi1>, vector<16x6xf32>
    %cst_18 = arith.constant dense<0xFF800000> : vector<16xf32>
    %126 = vector.multi_reduction <maximumf>, %125, %cst_18 [1] : vector<16x6xf32> to vector<16xf32>
    %127 = vector.shape_cast %126 : vector<16xf32> to vector<16x1xf32>
    %128 = vector.broadcast %127 : vector<16x1xf32> to vector<16x6xf32>
    %129 = arith.subf %125, %128 : vector<16x6xf32>
    %130 = math.exp %129 : vector<16x6xf32>
    %cst_19 = arith.constant dense<0.000000e+00> : vector<16xf32>
    %131 = vector.multi_reduction <add>, %130, %cst_19 [1] : vector<16x6xf32> to vector<16xf32>
    %132 = vector.shape_cast %131 : vector<16xf32> to vector<16x1xf32>
    %133 = vector.broadcast %132 : vector<16x1xf32> to vector<16x6xf32>
    %134 = arith.divf %130, %133 : vector<16x6xf32>
    %135 = vector.extract_strided_slice %134 {offsets = [0, 0], sizes = [16, 1], strides = [1, 1]} : vector<16x6xf32> to vector<16x1xf32>
    %136 = vector.broadcast %135 : vector<16x1xf32> to vector<16x128xf32>
    %137 = arith.mulf %136, %29 : vector<16x128xf32>
    %138 = vector.extract_strided_slice %134 {offsets = [0, 1], sizes = [16, 1], strides = [1, 1]} : vector<16x6xf32> to vector<16x1xf32>
    %139 = vector.broadcast %138 : vector<16x1xf32> to vector<16x128xf32>
    %140 = arith.mulf %139, %46 : vector<16x128xf32>
    %141 = arith.addf %137, %140 : vector<16x128xf32>
    %142 = vector.extract_strided_slice %134 {offsets = [0, 2], sizes = [16, 1], strides = [1, 1]} : vector<16x6xf32> to vector<16x1xf32>
    %143 = vector.broadcast %142 : vector<16x1xf32> to vector<16x128xf32>
    %144 = arith.mulf %143, %63 : vector<16x128xf32>
    %145 = arith.addf %141, %144 : vector<16x128xf32>
    %146 = vector.extract_strided_slice %134 {offsets = [0, 3], sizes = [16, 1], strides = [1, 1]} : vector<16x6xf32> to vector<16x1xf32>
    %147 = vector.broadcast %146 : vector<16x1xf32> to vector<16x128xf32>
    %148 = arith.mulf %147, %80 : vector<16x128xf32>
    %149 = arith.addf %145, %148 : vector<16x128xf32>
    %150 = vector.extract_strided_slice %134 {offsets = [0, 4], sizes = [16, 1], strides = [1, 1]} : vector<16x6xf32> to vector<16x1xf32>
    %151 = vector.broadcast %150 : vector<16x1xf32> to vector<16x128xf32>
    %152 = arith.mulf %151, %97 : vector<16x128xf32>
    %153 = arith.addf %149, %152 : vector<16x128xf32>
    %154 = vector.extract_strided_slice %134 {offsets = [0, 5], sizes = [16, 1], strides = [1, 1]} : vector<16x6xf32> to vector<16x1xf32>
    %155 = vector.broadcast %154 : vector<16x1xf32> to vector<16x128xf32>
    %156 = arith.mulf %155, %114 : vector<16x128xf32>
    %157 = arith.addf %153, %156 : vector<16x128xf32>
    %158 = arith.addf %9, %157 : vector<16x128xf32>
    %c0_20 = arith.constant 0 : index
    %c0_21 = arith.constant 0 : index
    %c0_22 = arith.constant 0 : index
    %159 = vector.load %arg4[%c0_20, %c0_21, %c0_22] : memref<1x1x128xf32, #tpu.memory_space<vmem>>, vector<1x1x128xf32>
    %160 = vector.shape_cast %159 : vector<1x1x128xf32> to vector<1x128xf32>
    %161 = vector.broadcast %160 : vector<1x128xf32> to vector<16x128xf32>
    %162 = arith.mulf %158, %161 : vector<16x128xf32>
    %c0_23 = arith.constant 0 : index
    %c0_24 = arith.constant 0 : index
    %c0_25 = arith.constant 0 : index
    %163 = vector.load %arg5[%c0_23, %c0_24, %c0_25] : memref<1x1x128xf32, #tpu.memory_space<vmem>>, vector<1x1x128xf32>
    %164 = vector.shape_cast %163 : vector<1x1x128xf32> to vector<1x128xf32>
    %165 = vector.broadcast %164 : vector<1x128xf32> to vector<16x128xf32>
    %166 = arith.addf %162, %165 : vector<16x128xf32>
    %cst_26 = arith.constant 0.000000e+00 : f32
    %167 = vector.broadcast %cst_26 : f32 to vector<16x128xf32>
    %168 = arith.maximumf %166, %167 : vector<16x128xf32>
    %c0_27 = arith.constant 0 : index
    %c0_28 = arith.constant 0 : index
    %c0_29 = arith.constant 0 : index
    %169 = vector.load %arg6[%c0_27, %c0_28, %c0_29] : memref<1x16x128xf32, #tpu.memory_space<vmem>>, vector<1x16x128xf32>
    %170 = vector.shape_cast %169 : vector<1x16x128xf32> to vector<16x128xf32>
    %171 = vector.shape_cast %168 : vector<16x128xf32> to vector<1x16x128xf32>
    tpu.vector_store %arg6[%c0_27, %c0_28, %c0_29], %171 {strides = array<i32>} : memref<1x16x128xf32, #tpu.memory_space<vmem>>, vector<1x16x128xf32>,
    %c0_30 = arith.constant 0 : index
    %c0_31 = arith.constant 0 : index
    %c0_32 = arith.constant 0 : index
    %c0_33 = arith.constant 0 : index
    %172 = vector.load %arg3[%c0_30, %c0_31, %c0_32, %c0_33] : memref<1x1x16x6xi32, #tpu.memory_space<vmem>>, vector<1x1x16x6xi32>
    %173 = vector.shape_cast %172 : vector<1x1x16x6xi32> to vector<16x6xi32>
    %c0_34 = arith.constant 0 : index
    %c0_35 = arith.constant 0 : index
    %c0_36 = arith.constant 0 : index
    %c0_37 = arith.constant 0 : index
    %174 = vector.load %arg3[%c0_34, %c0_35, %c0_36, %c0_37] : memref<1x1x16x6xi32, #tpu.memory_space<vmem>>, vector<1x1x16x6xi32>
    %175 = vector.shape_cast %174 : vector<1x1x16x6xi32> to vector<16x6xi32>
    %c15_i32_38 = arith.constant 15 : i32
    %176 = vector.broadcast %c15_i32_38 : i32 to vector<16x6xi32>
    %177 = arith.cmpi eq, %173, %176 : vector<16x6xi32>
    %178 = arith.extui %177 : vector<16x6xi1> to vector<16x6xi32>
    %179 = arith.sitofp %178 : vector<16x6xi32> to vector<16x6xf32>
    %cst_39 = arith.constant 0.000000e+00 : f32
    %180 = vector.broadcast %cst_39 : f32 to vector<16x6xf32>
    %181 = vector.extract_strided_slice %173 {offsets = [0, 0], sizes = [16, 1], strides = [1, 1]} : vector<16x6xi32> to vector<16x1xi32>
    %182 = vector.broadcast %181 : vector<16x1xi32> to vector<16x16xi32>
    %183 = vector.broadcast %7 : vector<1x16xi32> to vector<16x16xi32>
    %184 = arith.cmpi eq, %182, %183 : vector<16x16xi32>
    %185 = arith.extui %184 : vector<16x16xi1> to vector<16x16xi32>
    %186 = arith.sitofp %185 : vector<16x16xi32> to vector<16x16xf32>
    %cst_40 = arith.constant dense<0.000000e+00> : vector<16x128xf32>
    %187 = tpu.matmul %186, %6, %cst_40 {dimension_numbers = #tpu.dot_dimension_numbers<[1], [0], [0], [1], [0, 0, 1, 1], [], []>} : vector<16x16xf32>, vector<16x128xf32>, vector<16x128xf32> -> vector<16x128xf32>
    %188 = vector.extract_strided_slice %187 {offsets = [0, 1], sizes = [16, 1], strides = [1, 1]} : vector<16x128xf32> to vector<16x1xf32>
    %c0_i32_41 = arith.constant 0 : i32
    %189 = vector.broadcast %c0_i32_41 : i32 to vector<1x6xi32>
    %190 = arith.cmpi eq, %8, %189 : vector<1x6xi32>
    %191 = arith.extui %190 : vector<1x6xi1> to vector<1x6xi32>
    %192 = arith.sitofp %191 : vector<1x6xi32> to vector<1x6xf32>
    %193 = vector.broadcast %188 : vector<16x1xf32> to vector<16x6xf32>
    %194 = vector.broadcast %192 : vector<1x6xf32> to vector<16x6xf32>
    %195 = arith.mulf %193, %194 : vector<16x6xf32>
    %196 = arith.addf %180, %195 : vector<16x6xf32>
    %197 = vector.extract_strided_slice %173 {offsets = [0, 1], sizes = [16, 1], strides = [1, 1]} : vector<16x6xi32> to vector<16x1xi32>
    %198 = vector.broadcast %197 : vector<16x1xi32> to vector<16x16xi32>
    %199 = vector.broadcast %7 : vector<1x16xi32> to vector<16x16xi32>
    %200 = arith.cmpi eq, %198, %199 : vector<16x16xi32>
    %201 = arith.extui %200 : vector<16x16xi1> to vector<16x16xi32>
    %202 = arith.sitofp %201 : vector<16x16xi32> to vector<16x16xf32>
    %cst_42 = arith.constant dense<0.000000e+00> : vector<16x128xf32>
    %203 = tpu.matmul %202, %6, %cst_42 {dimension_numbers = #tpu.dot_dimension_numbers<[1], [0], [0], [1], [0, 0, 1, 1], [], []>} : vector<16x16xf32>, vector<16x128xf32>, vector<16x128xf32> -> vector<16x128xf32>
    %204 = vector.extract_strided_slice %203 {offsets = [0, 1], sizes = [16, 1], strides = [1, 1]} : vector<16x128xf32> to vector<16x1xf32>
    %c1_i32_43 = arith.constant 1 : i32
    %205 = vector.broadcast %c1_i32_43 : i32 to vector<1x6xi32>
    %206 = arith.cmpi eq, %8, %205 : vector<1x6xi32>
    %207 = arith.extui %206 : vector<1x6xi1> to vector<1x6xi32>
    %208 = arith.sitofp %207 : vector<1x6xi32> to vector<1x6xf32>
    %209 = vector.broadcast %204 : vector<16x1xf32> to vector<16x6xf32>
    %210 = vector.broadcast %208 : vector<1x6xf32> to vector<16x6xf32>
    %211 = arith.mulf %209, %210 : vector<16x6xf32>
    %212 = arith.addf %196, %211 : vector<16x6xf32>
    %213 = vector.extract_strided_slice %173 {offsets = [0, 2], sizes = [16, 1], strides = [1, 1]} : vector<16x6xi32> to vector<16x1xi32>
    %214 = vector.broadcast %213 : vector<16x1xi32> to vector<16x16xi32>
    %215 = vector.broadcast %7 : vector<1x16xi32> to vector<16x16xi32>
    %216 = arith.cmpi eq, %214, %215 : vector<16x16xi32>
    %217 = arith.extui %216 : vector<16x16xi1> to vector<16x16xi32>
    %218 = arith.sitofp %217 : vector<16x16xi32> to vector<16x16xf32>
    %cst_44 = arith.constant dense<0.000000e+00> : vector<16x128xf32>
    %219 = tpu.matmul %218, %6, %cst_44 {dimension_numbers = #tpu.dot_dimension_numbers<[1], [0], [0], [1], [0, 0, 1, 1], [], []>} : vector<16x16xf32>, vector<16x128xf32>, vector<16x128xf32> -> vector<16x128xf32>
    %220 = vector.extract_strided_slice %219 {offsets = [0, 1], sizes = [16, 1], strides = [1, 1]} : vector<16x128xf32> to vector<16x1xf32>
    %c2_i32_45 = arith.constant 2 : i32
    %221 = vector.broadcast %c2_i32_45 : i32 to vector<1x6xi32>
    %222 = arith.cmpi eq, %8, %221 : vector<1x6xi32>
    %223 = arith.extui %222 : vector<1x6xi1> to vector<1x6xi32>
    %224 = arith.sitofp %223 : vector<1x6xi32> to vector<1x6xf32>
    %225 = vector.broadcast %220 : vector<16x1xf32> to vector<16x6xf32>
    %226 = vector.broadcast %224 : vector<1x6xf32> to vector<16x6xf32>
    %227 = arith.mulf %225, %226 : vector<16x6xf32>
    %228 = arith.addf %212, %227 : vector<16x6xf32>
    %229 = vector.extract_strided_slice %173 {offsets = [0, 3], sizes = [16, 1], strides = [1, 1]} : vector<16x6xi32> to vector<16x1xi32>
    %230 = vector.broadcast %229 : vector<16x1xi32> to vector<16x16xi32>
    %231 = vector.broadcast %7 : vector<1x16xi32> to vector<16x16xi32>
    %232 = arith.cmpi eq, %230, %231 : vector<16x16xi32>
    %233 = arith.extui %232 : vector<16x16xi1> to vector<16x16xi32>
    %234 = arith.sitofp %233 : vector<16x16xi32> to vector<16x16xf32>
    %cst_46 = arith.constant dense<0.000000e+00> : vector<16x128xf32>
    %235 = tpu.matmul %234, %6, %cst_46 {dimension_numbers = #tpu.dot_dimension_numbers<[1], [0], [0], [1], [0, 0, 1, 1], [], []>} : vector<16x16xf32>, vector<16x128xf32>, vector<16x128xf32> -> vector<16x128xf32>
    %236 = vector.extract_strided_slice %235 {offsets = [0, 1], sizes = [16, 1], strides = [1, 1]} : vector<16x128xf32> to vector<16x1xf32>
    %c3_i32_47 = arith.constant 3 : i32
    %237 = vector.broadcast %c3_i32_47 : i32 to vector<1x6xi32>
    %238 = arith.cmpi eq, %8, %237 : vector<1x6xi32>
    %239 = arith.extui %238 : vector<1x6xi1> to vector<1x6xi32>
    %240 = arith.sitofp %239 : vector<1x6xi32> to vector<1x6xf32>
    %241 = vector.broadcast %236 : vector<16x1xf32> to vector<16x6xf32>
    %242 = vector.broadcast %240 : vector<1x6xf32> to vector<16x6xf32>
    %243 = arith.mulf %241, %242 : vector<16x6xf32>
    %244 = arith.addf %228, %243 : vector<16x6xf32>
    %245 = vector.extract_strided_slice %173 {offsets = [0, 4], sizes = [16, 1], strides = [1, 1]} : vector<16x6xi32> to vector<16x1xi32>
    %246 = vector.broadcast %245 : vector<16x1xi32> to vector<16x16xi32>
    %247 = vector.broadcast %7 : vector<1x16xi32> to vector<16x16xi32>
    %248 = arith.cmpi eq, %246, %247 : vector<16x16xi32>
    %249 = arith.extui %248 : vector<16x16xi1> to vector<16x16xi32>
    %250 = arith.sitofp %249 : vector<16x16xi32> to vector<16x16xf32>
    %cst_48 = arith.constant dense<0.000000e+00> : vector<16x128xf32>
    %251 = tpu.matmul %250, %6, %cst_48 {dimension_numbers = #tpu.dot_dimension_numbers<[1], [0], [0], [1], [0, 0, 1, 1], [], []>} : vector<16x16xf32>, vector<16x128xf32>, vector<16x128xf32> -> vector<16x128xf32>
    %252 = vector.extract_strided_slice %251 {offsets = [0, 1], sizes = [16, 1], strides = [1, 1]} : vector<16x128xf32> to vector<16x1xf32>
    %c4_i32_49 = arith.constant 4 : i32
    %253 = vector.broadcast %c4_i32_49 : i32 to vector<1x6xi32>
    %254 = arith.cmpi eq, %8, %253 : vector<1x6xi32>
    %255 = arith.extui %254 : vector<1x6xi1> to vector<1x6xi32>
    %256 = arith.sitofp %255 : vector<1x6xi32> to vector<1x6xf32>
    %257 = vector.broadcast %252 : vector<16x1xf32> to vector<16x6xf32>
    %258 = vector.broadcast %256 : vector<1x6xf32> to vector<16x6xf32>
    %259 = arith.mulf %257, %258 : vector<16x6xf32>
    %260 = arith.addf %244, %259 : vector<16x6xf32>
    %261 = vector.extract_strided_slice %173 {offsets = [0, 5], sizes = [16, 1], strides = [1, 1]} : vector<16x6xi32> to vector<16x1xi32>
    %262 = vector.broadcast %261 : vector<16x1xi32> to vector<16x16xi32>
    %263 = vector.broadcast %7 : vector<1x16xi32> to vector<16x16xi32>
    %264 = arith.cmpi eq, %262, %263 : vector<16x16xi32>
    %265 = arith.extui %264 : vector<16x16xi1> to vector<16x16xi32>
    %266 = arith.sitofp %265 : vector<16x16xi32> to vector<16x16xf32>
    %cst_50 = arith.constant dense<0.000000e+00> : vector<16x128xf32>
    %267 = tpu.matmul %266, %6, %cst_50 {dimension_numbers = #tpu.dot_dimension_numbers<[1], [0], [0], [1], [0, 0, 1, 1], [], []>} : vector<16x16xf32>, vector<16x128xf32>, vector<16x128xf32> -> vector<16x128xf32>
    %268 = vector.extract_strided_slice %267 {offsets = [0, 1], sizes = [16, 1], strides = [1, 1]} : vector<16x128xf32> to vector<16x1xf32>
    %c5_i32_51 = arith.constant 5 : i32
    %269 = vector.broadcast %c5_i32_51 : i32 to vector<1x6xi32>
    %270 = arith.cmpi eq, %8, %269 : vector<1x6xi32>
    %271 = arith.extui %270 : vector<1x6xi1> to vector<1x6xi32>
    %272 = arith.sitofp %271 : vector<1x6xi32> to vector<1x6xf32>
    %273 = vector.broadcast %268 : vector<16x1xf32> to vector<16x6xf32>
    %274 = vector.broadcast %272 : vector<1x6xf32> to vector<16x6xf32>
    %275 = arith.mulf %273, %274 : vector<16x6xf32>
    %276 = arith.addf %260, %275 : vector<16x6xf32>
    %277 = vector.extract_strided_slice %175 {offsets = [0, 0], sizes = [16, 1], strides = [1, 1]} : vector<16x6xi32> to vector<16x1xi32>
    %278 = vector.broadcast %277 : vector<16x1xi32> to vector<16x16xi32>
    %279 = vector.broadcast %7 : vector<1x16xi32> to vector<16x16xi32>
    %280 = arith.cmpi eq, %278, %279 : vector<16x16xi32>
    %281 = arith.extui %280 : vector<16x16xi1> to vector<16x16xi32>
    %282 = arith.sitofp %281 : vector<16x16xi32> to vector<16x16xf32>
    %cst_52 = arith.constant dense<0.000000e+00> : vector<16x6xf32>
    %283 = tpu.matmul %282, %276, %cst_52 {dimension_numbers = #tpu.dot_dimension_numbers<[1], [0], [0], [1], [0, 0, 1, 1], [], []>} : vector<16x16xf32>, vector<16x6xf32>, vector<16x6xf32> -> vector<16x6xf32>
    %284 = vector.broadcast %5 : vector<16x1xf32> to vector<16x6xf32>
    %285 = arith.mulf %284, %283 : vector<16x6xf32>
    %cst_53 = arith.constant dense<0.000000e+00> : vector<16x6xf32>
    %286 = tpu.matmul %282, %179, %cst_53 {dimension_numbers = #tpu.dot_dimension_numbers<[1], [0], [0], [1], [0, 0, 1, 1], [], []>} : vector<16x16xf32>, vector<16x6xf32>, vector<16x6xf32> -> vector<16x6xf32>
    %287 = vector.extract_strided_slice %175 {offsets = [0, 1], sizes = [16, 1], strides = [1, 1]} : vector<16x6xi32> to vector<16x1xi32>
    %288 = vector.broadcast %287 : vector<16x1xi32> to vector<16x16xi32>
    %289 = vector.broadcast %7 : vector<1x16xi32> to vector<16x16xi32>
    %290 = arith.cmpi eq, %288, %289 : vector<16x16xi32>
    %291 = arith.extui %290 : vector<16x16xi1> to vector<16x16xi32>
    %292 = arith.sitofp %291 : vector<16x16xi32> to vector<16x16xf32>
    %cst_54 = arith.constant dense<0.000000e+00> : vector<16x6xf32>
    %293 = tpu.matmul %292, %276, %cst_54 {dimension_numbers = #tpu.dot_dimension_numbers<[1], [0], [0], [1], [0, 0, 1, 1], [], []>} : vector<16x16xf32>, vector<16x6xf32>, vector<16x6xf32> -> vector<16x6xf32>
    %294 = vector.broadcast %5 : vector<16x1xf32> to vector<16x6xf32>
    %295 = arith.mulf %294, %293 : vector<16x6xf32>
    %cst_55 = arith.constant dense<0.000000e+00> : vector<16x6xf32>
    %296 = tpu.matmul %292, %179, %cst_55 {dimension_numbers = #tpu.dot_dimension_numbers<[1], [0], [0], [1], [0, 0, 1, 1], [], []>} : vector<16x16xf32>, vector<16x6xf32>, vector<16x6xf32> -> vector<16x6xf32>
    %297 = vector.extract_strided_slice %175 {offsets = [0, 2], sizes = [16, 1], strides = [1, 1]} : vector<16x6xi32> to vector<16x1xi32>
    %298 = vector.broadcast %297 : vector<16x1xi32> to vector<16x16xi32>
    %299 = vector.broadcast %7 : vector<1x16xi32> to vector<16x16xi32>
    %300 = arith.cmpi eq, %298, %299 : vector<16x16xi32>
    %301 = arith.extui %300 : vector<16x16xi1> to vector<16x16xi32>
    %302 = arith.sitofp %301 : vector<16x16xi32> to vector<16x16xf32>
    %cst_56 = arith.constant dense<0.000000e+00> : vector<16x6xf32>
    %303 = tpu.matmul %302, %276, %cst_56 {dimension_numbers = #tpu.dot_dimension_numbers<[1], [0], [0], [1], [0, 0, 1, 1], [], []>} : vector<16x16xf32>, vector<16x6xf32>, vector<16x6xf32> -> vector<16x6xf32>
    %304 = vector.broadcast %5 : vector<16x1xf32> to vector<16x6xf32>
    %305 = arith.mulf %304, %303 : vector<16x6xf32>
    %cst_57 = arith.constant dense<0.000000e+00> : vector<16x6xf32>
    %306 = tpu.matmul %302, %179, %cst_57 {dimension_numbers = #tpu.dot_dimension_numbers<[1], [0], [0], [1], [0, 0, 1, 1], [], []>} : vector<16x16xf32>, vector<16x6xf32>, vector<16x6xf32> -> vector<16x6xf32>
    %307 = vector.extract_strided_slice %175 {offsets = [0, 3], sizes = [16, 1], strides = [1, 1]} : vector<16x6xi32> to vector<16x1xi32>
    %308 = vector.broadcast %307 : vector<16x1xi32> to vector<16x16xi32>
    %309 = vector.broadcast %7 : vector<1x16xi32> to vector<16x16xi32>
    %310 = arith.cmpi eq, %308, %309 : vector<16x16xi32>
    %311 = arith.extui %310 : vector<16x16xi1> to vector<16x16xi32>
    %312 = arith.sitofp %311 : vector<16x16xi32> to vector<16x16xf32>
    %cst_58 = arith.constant dense<0.000000e+00> : vector<16x6xf32>
    %313 = tpu.matmul %312, %276, %cst_58 {dimension_numbers = #tpu.dot_dimension_numbers<[1], [0], [0], [1], [0, 0, 1, 1], [], []>} : vector<16x16xf32>, vector<16x6xf32>, vector<16x6xf32> -> vector<16x6xf32>
    %314 = vector.broadcast %5 : vector<16x1xf32> to vector<16x6xf32>
    %315 = arith.mulf %314, %313 : vector<16x6xf32>
    %cst_59 = arith.constant dense<0.000000e+00> : vector<16x6xf32>
    %316 = tpu.matmul %312, %179, %cst_59 {dimension_numbers = #tpu.dot_dimension_numbers<[1], [0], [0], [1], [0, 0, 1, 1], [], []>} : vector<16x16xf32>, vector<16x6xf32>, vector<16x6xf32> -> vector<16x6xf32>
    %317 = vector.extract_strided_slice %175 {offsets = [0, 4], sizes = [16, 1], strides = [1, 1]} : vector<16x6xi32> to vector<16x1xi32>
    %318 = vector.broadcast %317 : vector<16x1xi32> to vector<16x16xi32>
    %319 = vector.broadcast %7 : vector<1x16xi32> to vector<16x16xi32>
    %320 = arith.cmpi eq, %318, %319 : vector<16x16xi32>
    %321 = arith.extui %320 : vector<16x16xi1> to vector<16x16xi32>
    %322 = arith.sitofp %321 : vector<16x16xi32> to vector<16x16xf32>
    %cst_60 = arith.constant dense<0.000000e+00> : vector<16x6xf32>
    %323 = tpu.matmul %322, %276, %cst_60 {dimension_numbers = #tpu.dot_dimension_numbers<[1], [0], [0], [1], [0, 0, 1, 1], [], []>} : vector<16x16xf32>, vector<16x6xf32>, vector<16x6xf32> -> vector<16x6xf32>
    %324 = vector.broadcast %5 : vector<16x1xf32> to vector<16x6xf32>
    %325 = arith.mulf %324, %323 : vector<16x6xf32>
    %cst_61 = arith.constant dense<0.000000e+00> : vector<16x6xf32>
    %326 = tpu.matmul %322, %179, %cst_61 {dimension_numbers = #tpu.dot_dimension_numbers<[1], [0], [0], [1], [0, 0, 1, 1], [], []>} : vector<16x16xf32>, vector<16x6xf32>, vector<16x6xf32> -> vector<16x6xf32>
    %327 = vector.extract_strided_slice %175 {offsets = [0, 5], sizes = [16, 1], strides = [1, 1]} : vector<16x6xi32> to vector<16x1xi32>
    %328 = vector.broadcast %327 : vector<16x1xi32> to vector<16x16xi32>
    %329 = vector.broadcast %7 : vector<1x16xi32> to vector<16x16xi32>
    %330 = arith.cmpi eq, %328, %329 : vector<16x16xi32>
    %331 = arith.extui %330 : vector<16x16xi1> to vector<16x16xi32>
    %332 = arith.sitofp %331 : vector<16x16xi32> to vector<16x16xf32>
    %cst_62 = arith.constant dense<0.000000e+00> : vector<16x6xf32>
    %333 = tpu.matmul %332, %276, %cst_62 {dimension_numbers = #tpu.dot_dimension_numbers<[1], [0], [0], [1], [0, 0, 1, 1], [], []>} : vector<16x16xf32>, vector<16x6xf32>, vector<16x6xf32> -> vector<16x6xf32>
    %334 = vector.broadcast %5 : vector<16x1xf32> to vector<16x6xf32>
    %335 = arith.mulf %334, %333 : vector<16x6xf32>
    %cst_63 = arith.constant dense<0.000000e+00> : vector<16x6xf32>
    %336 = tpu.matmul %332, %179, %cst_63 {dimension_numbers = #tpu.dot_dimension_numbers<[1], [0], [0], [1], [0, 0, 1, 1], [], []>} : vector<16x16xf32>, vector<16x6xf32>, vector<16x6xf32> -> vector<16x6xf32>
    %337 = arith.minimumf %285, %295 : vector<16x6xf32>
    %338 = arith.minimumf %337, %305 : vector<16x6xf32>
    %339 = arith.minimumf %338, %315 : vector<16x6xf32>
    %340 = arith.minimumf %339, %325 : vector<16x6xf32>
    %341 = arith.minimumf %340, %335 : vector<16x6xf32>
    %342 = vector.shape_cast %341 : vector<16x6xf32> to vector<1x16x6xf32>
    %cst_64 = arith.constant dense<0x7F800000> : vector<1xf32>
    %343 = vector.multi_reduction <minimumf>, %342, %cst_64 [1, 2] : vector<1x16x6xf32> to vector<1xf32>
    %344 = vector.shape_cast %343 : vector<1xf32> to vector<1x1x1xf32>
    %345 = vector.extract %344[0, 0, 0] : f32 from vector<1x1x1xf32>
    %cst_65 = arith.constant 1.000000e+00 : f32
    %346 = arith.subf %345, %cst_65 : f32
    %347 = tpu.iota {dimensions = array<i32: 1>} : vector<16x128xi32>
    %c36_i32 = arith.constant 36 : i32
    %348 = vector.broadcast %c36_i32 : i32 to vector<16x128xi32>
    %349 = arith.cmpi slt, %347, %348 : vector<16x128xi32>
    %cst_66 = arith.constant 0.000000e+00 : f32
    %cst_67 = arith.constant -1.000000e+30 : f32
    %350 = vector.broadcast %cst_66 : f32 to vector<16x128xf32>
    %351 = vector.broadcast %cst_67 : f32 to vector<16x128xf32>
    %352 = arith.select %349, %350, %351 : vector<16x128xi1>, vector<16x128xf32>
    %353 = tpu.iota {dimensions = array<i32: 0>} : vector<6x128xi32>
    %354 = tpu.iota {dimensions = array<i32: 1>} : vector<6x128xi32>
    %cst_68 = arith.constant 5.000000e-01 : f32
    %355 = vector.broadcast %cst_68 : f32 to vector<16x6xf32>
    %356 = arith.cmpf ogt, %286, %355 : vector<16x6xf32>
    %357 = vector.broadcast %346 : f32 to vector<16x6xf32>
    %358 = arith.select %356, %357, %285 : vector<16x6xi1>, vector<16x6xf32>
    %c0_i32_69 = arith.constant 0 : i32
    %359 = vector.broadcast %c0_i32_69 : i32 to vector<6x128xi32>
    %360 = arith.subi %354, %359 : vector<6x128xi32>
    %361 = arith.cmpi eq, %360, %353 : vector<6x128xi32>
    %362 = arith.extui %361 : vector<6x128xi1> to vector<6x128xi32>
    %363 = arith.sitofp %362 : vector<6x128xi32> to vector<6x128xf32>
    %cst_70 = arith.constant dense<0.000000e+00> : vector<16x128xf32>
    %364 = tpu.matmul %358, %363, %cst_70 {dimension_numbers = #tpu.dot_dimension_numbers<[1], [0], [0], [1], [0, 0, 1, 1], [], []>} : vector<16x6xf32>, vector<6x128xf32>, vector<16x128xf32> -> vector<16x128xf32>
    %365 = arith.addf %352, %364 : vector<16x128xf32>
    %cst_71 = arith.constant 5.000000e-01 : f32
    %366 = vector.broadcast %cst_71 : f32 to vector<16x6xf32>
    %367 = arith.cmpf ogt, %296, %366 : vector<16x6xf32>
    %368 = vector.broadcast %346 : f32 to vector<16x6xf32>
    %369 = arith.select %367, %368, %295 : vector<16x6xi1>, vector<16x6xf32>
    %c6_i32 = arith.constant 6 : i32
    %370 = vector.broadcast %c6_i32 : i32 to vector<6x128xi32>
    %371 = arith.subi %354, %370 : vector<6x128xi32>
    %372 = arith.cmpi eq, %371, %353 : vector<6x128xi32>
    %373 = arith.extui %372 : vector<6x128xi1> to vector<6x128xi32>
    %374 = arith.sitofp %373 : vector<6x128xi32> to vector<6x128xf32>
    %cst_72 = arith.constant dense<0.000000e+00> : vector<16x128xf32>
    %375 = tpu.matmul %369, %374, %cst_72 {dimension_numbers = #tpu.dot_dimension_numbers<[1], [0], [0], [1], [0, 0, 1, 1], [], []>} : vector<16x6xf32>, vector<6x128xf32>, vector<16x128xf32> -> vector<16x128xf32>
    %376 = arith.addf %365, %375 : vector<16x128xf32>
    %cst_73 = arith.constant 5.000000e-01 : f32
    %377 = vector.broadcast %cst_73 : f32 to vector<16x6xf32>
    %378 = arith.cmpf ogt, %306, %377 : vector<16x6xf32>
    %379 = vector.broadcast %346 : f32 to vector<16x6xf32>
    %380 = arith.select %378, %379, %305 : vector<16x6xi1>, vector<16x6xf32>
    %c12_i32 = arith.constant 12 : i32
    %381 = vector.broadcast %c12_i32 : i32 to vector<6x128xi32>
    %382 = arith.subi %354, %381 : vector<6x128xi32>
    %383 = arith.cmpi eq, %382, %353 : vector<6x128xi32>
    %384 = arith.extui %383 : vector<6x128xi1> to vector<6x128xi32>
    %385 = arith.sitofp %384 : vector<6x128xi32> to vector<6x128xf32>
    %cst_74 = arith.constant dense<0.000000e+00> : vector<16x128xf32>
    %386 = tpu.matmul %380, %385, %cst_74 {dimension_numbers = #tpu.dot_dimension_numbers<[1], [0], [0], [1], [0, 0, 1, 1], [], []>} : vector<16x6xf32>, vector<6x128xf32>, vector<16x128xf32> -> vector<16x128xf32>
    %387 = arith.addf %376, %386 : vector<16x128xf32>
    %cst_75 = arith.constant 5.000000e-01 : f32
    %388 = vector.broadcast %cst_75 : f32 to vector<16x6xf32>
    %389 = arith.cmpf ogt, %316, %388 : vector<16x6xf32>
    %390 = vector.broadcast %346 : f32 to vector<16x6xf32>
    %391 = arith.select %389, %390, %315 : vector<16x6xi1>, vector<16x6xf32>
    %c18_i32 = arith.constant 18 : i32
    %392 = vector.broadcast %c18_i32 : i32 to vector<6x128xi32>
    %393 = arith.subi %354, %392 : vector<6x128xi32>
    %394 = arith.cmpi eq, %393, %353 : vector<6x128xi32>
    %395 = arith.extui %394 : vector<6x128xi1> to vector<6x128xi32>
    %396 = arith.sitofp %395 : vector<6x128xi32> to vector<6x128xf32>
    %cst_76 = arith.constant dense<0.000000e+00> : vector<16x128xf32>
    %397 = tpu.matmul %391, %396, %cst_76 {dimension_numbers = #tpu.dot_dimension_numbers<[1], [0], [0], [1], [0, 0, 1, 1], [], []>} : vector<16x6xf32>, vector<6x128xf32>, vector<16x128xf32> -> vector<16x128xf32>
    %398 = arith.addf %387, %397 : vector<16x128xf32>
    %cst_77 = arith.constant 5.000000e-01 : f32
    %399 = vector.broadcast %cst_77 : f32 to vector<16x6xf32>
    %400 = arith.cmpf ogt, %326, %399 : vector<16x6xf32>
    %401 = vector.broadcast %346 : f32 to vector<16x6xf32>
    %402 = arith.select %400, %401, %325 : vector<16x6xi1>, vector<16x6xf32>
    %c24_i32 = arith.constant 24 : i32
    %403 = vector.broadcast %c24_i32 : i32 to vector<6x128xi32>
    %404 = arith.subi %354, %403 : vector<6x128xi32>
    %405 = arith.cmpi eq, %404, %353 : vector<6x128xi32>
    %406 = arith.extui %405 : vector<6x128xi1> to vector<6x128xi32>
    %407 = arith.sitofp %406 : vector<6x128xi32> to vector<6x128xf32>
    %cst_78 = arith.constant dense<0.000000e+00> : vector<16x128xf32>
    %408 = tpu.matmul %402, %407, %cst_78 {dimension_numbers = #tpu.dot_dimension_numbers<[1], [0], [0], [1], [0, 0, 1, 1], [], []>} : vector<16x6xf32>, vector<6x128xf32>, vector<16x128xf32> -> vector<16x128xf32>
    %409 = arith.addf %398, %408 : vector<16x128xf32>
    %cst_79 = arith.constant 5.000000e-01 : f32
    %410 = vector.broadcast %cst_79 : f32 to vector<16x6xf32>
    %411 = arith.cmpf ogt, %336, %410 : vector<16x6xf32>
    %412 = vector.broadcast %346 : f32 to vector<16x6xf32>
    %413 = arith.select %411, %412, %335 : vector<16x6xi1>, vector<16x6xf32>
    %c30_i32 = arith.constant 30 : i32
    %414 = vector.broadcast %c30_i32 : i32 to vector<6x128xi32>
    %415 = arith.subi %354, %414 : vector<6x128xi32>
    %416 = arith.cmpi eq, %415, %353 : vector<6x128xi32>
    %417 = arith.extui %416 : vector<6x128xi1> to vector<6x128xi32>
    %418 = arith.sitofp %417 : vector<6x128xi32> to vector<6x128xf32>
    %cst_80 = arith.constant dense<0.000000e+00> : vector<16x128xf32>
    %419 = tpu.matmul %413, %418, %cst_80 {dimension_numbers = #tpu.dot_dimension_numbers<[1], [0], [0], [1], [0, 0, 1, 1], [], []>} : vector<16x6xf32>, vector<6x128xf32>, vector<16x128xf32> -> vector<16x128xf32>
    %420 = arith.addf %409, %419 : vector<16x128xf32>
    %c0_81 = arith.constant 0 : index
    %c0_82 = arith.constant 0 : index
    %c0_83 = arith.constant 0 : index
    %421 = vector.load %arg7[%c0_81, %c0_82, %c0_83] : memref<1x16x128xf32, #tpu.memory_space<vmem>>, vector<1x16x128xf32>
    %422 = vector.shape_cast %421 : vector<1x16x128xf32> to vector<16x128xf32>
    %423 = vector.shape_cast %420 : vector<16x128xf32> to vector<1x16x128xf32>
    tpu.vector_store %arg7[%c0_81, %c0_82, %c0_83], %423 {strides = array<i32>} : memref<1x16x128xf32, #tpu.memory_space<vmem>>, vector<1x16x128xf32>,
    return
  }
  func.func @transform_0(%arg0: i32) -> (i32, i32, i32) {
    %c0_i32 = arith.constant 0 : i32
    %c0_i32_0 = arith.constant 0 : i32
    %c0_i32_1 = arith.constant 0 : i32
    %c0_i32_2 = arith.constant 0 : i32
    return %c0_i32, %c0_i32_0, %c0_i32_1 : i32, i32, i32
  }
  func.func @transform_1(%arg0: i32) -> (i32, i32, i32) {
    %c0_i32 = arith.constant 0 : i32
    %c0_i32_0 = arith.constant 0 : i32
    %c0_i32_1 = arith.constant 0 : i32
    return %arg0, %c0_i32, %c0_i32_0 : i32, i32, i32
  }
  func.func @transform_2(%arg0: i32) -> (i32, i32, i32, i32) {
    %c0_i32 = arith.constant 0 : i32
    %c0_i32_0 = arith.constant 0 : i32
    %c0_i32_1 = arith.constant 0 : i32
    %c0_i32_2 = arith.constant 0 : i32
    return %arg0, %c0_i32, %c0_i32_0, %c0_i32_1 : i32, i32, i32, i32
  }
  func.func @transform_3(%arg0: i32) -> (i32, i32, i32) {
    %c0_i32 = arith.constant 0 : i32
    %c0_i32_0 = arith.constant 0 : i32
    %c0_i32_1 = arith.constant 0 : i32
    return %arg0, %c0_i32, %c0_i32_0 : i32, i32, i32
  }
  func.func @transform_4(%arg0: i32) -> (i32, i32, i32) {
    %c0_i32 = arith.constant 0 : i32
    %c0_i32_0 = arith.constant 0 : i32
    %c0_i32_1 = arith.constant 0 : i32
    return %arg0, %c0_i32, %c0_i32_0 : i32, i32, i32
  }
  func.func @transform_5(%arg0: i32) -> (i32, i32, i32) {
    %c0_i32 = arith.constant 0 : i32
    %c0_i32_0 = arith.constant 0 : i32
    %c0_i32_1 = arith.constant 0 : i32
    return %arg0, %c0_i32, %c0_i32_0 : i32, i32, i32
  }
  func.func @transform_6(%arg0: i32) -> (i32, i32, i32) {
    %c0_i32 = arith.constant 0 : i32
    %c0_i32_0 = arith.constant 0 : i32
    %c0_i32_1 = arith.constant 0 : i32
    return %arg0, %c0_i32, %c0_i32_0 : i32, i32, i32
  }
}

module attributes {stable_mosaic.version = 11 : i64} {
  func.func @_fused_layer_kernel(%arg0: i32, %arg1: memref<1x16x128xf32, #tpu.memory_space<vmem>>, %arg2: memref<1x128x384xf32, #tpu.memory_space<vmem>>, %arg3: memref<1x2x16x6xi32, #tpu.memory_space<vmem>>, %arg4: memref<1x1x128xf32, #tpu.memory_space<vmem>>, %arg5: memref<1x1x128xf32, #tpu.memory_space<vmem>>, %arg6: memref<1x16x128xf32, #tpu.memory_space<vmem>>, %arg7: memref<1x16x128xf32, #tpu.memory_space<vmem>>) attributes {dimension_semantics = [#tpu.dimension_semantics<parallel>], iteration_bounds = array<i64: 2>, scalar_prefetch = 0 : i64, scratch_operands = 0 : i64, tpu.core_type = #tpu.core_type<tc>, window_params = [{transform_indices = @transform_0, window_bounds = array<i64: 1, 16, 128>}, {transform_indices = @transform_1, window_bounds = array<i64: 1, 128, 384>}, {transform_indices = @transform_2, window_bounds = array<i64: 1, 2, 16, 6>}, {transform_indices = @transform_3, window_bounds = array<i64: 1, 1, 128>}, {transform_indices = @transform_4, window_bounds = array<i64: 1, 1, 128>}, {transform_indices = @transform_5, window_bounds = array<i64: 1, 16, 128>}, {transform_indices = @transform_6, window_bounds = array<i64: 1, 16, 128>}]} {
    %c0 = arith.constant 0 : index
    %c0_0 = arith.constant 0 : index
    %c0_1 = arith.constant 0 : index
    %0 = vector.load %arg1[%c0, %c0_0, %c0_1] : memref<1x16x128xf32, #tpu.memory_space<vmem>>, vector<1x16x128xf32>
    %1 = vector.shape_cast %0 : vector<1x16x128xf32> to vector<16x128xf32>
    %c0_2 = arith.constant 0 : index
    %c0_3 = arith.constant 0 : index
    %c0_4 = arith.constant 0 : index
    %2 = vector.load %arg2[%c0_2, %c0_3, %c0_4] : memref<1x128x384xf32, #tpu.memory_space<vmem>>, vector<1x128x384xf32>
    %3 = vector.shape_cast %2 : vector<1x128x384xf32> to vector<128x384xf32>
    %cst = arith.constant dense<0.000000e+00> : vector<16x384xf32>
    %4 = tpu.matmul %1, %3, %cst {dimension_numbers = #tpu.dot_dimension_numbers<[1], [0], [0], [1], [0, 0, 1, 1], [], []>} : vector<16x128xf32>, vector<128x384xf32>, vector<16x384xf32> -> vector<16x384xf32>
    %5 = vector.extract_strided_slice %4 {offsets = [0, 256], sizes = [16, 1], strides = [1, 1]} : vector<16x384xf32> to vector<16x1xf32>
    %6 = vector.extract_strided_slice %4 {offsets = [0, 256], sizes = [16, 128], strides = [1, 1]} : vector<16x384xf32> to vector<16x128xf32>
    %7 = tpu.iota {dimensions = array<i32: 1>} : vector<1x16xi32>
    %8 = tpu.iota {dimensions = array<i32: 1>} : vector<1x6xi32>
    %9 = vector.extract_strided_slice %4 {offsets = [0, 0], sizes = [16, 128], strides = [1, 1]} : vector<16x384xf32> to vector<16x128xf32>
    %c0_5 = arith.constant 0 : index
    %c0_6 = arith.constant 0 : index
    %c0_7 = arith.constant 0 : index
    %c0_8 = arith.constant 0 : index
    %10 = vector.load %arg3[%c0_5, %c0_6, %c0_7, %c0_8] : memref<1x2x16x6xi32, #tpu.memory_space<vmem>>, vector<1x1x16x6xi32>
    %11 = vector.shape_cast %10 : vector<1x1x16x6xi32> to vector<16x6xi32>
    %cst_9 = arith.constant 0.000000e+00 : f32
    %12 = vector.broadcast %cst_9 : f32 to vector<16x6xf32>
    %13 = vector.extract_strided_slice %11 {offsets = [0, 0], sizes = [16, 1], strides = [1, 1]} : vector<16x6xi32> to vector<16x1xi32>
    %14 = vector.broadcast %13 : vector<16x1xi32> to vector<16x16xi32>
    %15 = vector.broadcast %7 : vector<1x16xi32> to vector<16x16xi32>
    %16 = arith.cmpi eq, %14, %15 : vector<16x16xi32>
    %17 = arith.extui %16 : vector<16x16xi1> to vector<16x16xi32>
    %18 = arith.sitofp %17 : vector<16x16xi32> to vector<16x16xf32>
    %cst_10 = arith.constant dense<0.000000e+00> : vector<16x384xf32>
    %19 = tpu.matmul %18, %4, %cst_10 {dimension_numbers = #tpu.dot_dimension_numbers<[1], [0], [0], [1], [0, 0, 1, 1], [], []>} : vector<16x16xf32>, vector<16x384xf32>, vector<16x384xf32> -> vector<16x384xf32>
    %20 = vector.extract_strided_slice %19 {offsets = [0, 257], sizes = [16, 1], strides = [1, 1]} : vector<16x384xf32> to vector<16x1xf32>
    %c0_i32 = arith.constant 0 : i32
    %21 = vector.broadcast %c0_i32 : i32 to vector<1x6xi32>
    %22 = arith.cmpi eq, %8, %21 : vector<1x6xi32>
    %23 = arith.extui %22 : vector<1x6xi1> to vector<1x6xi32>
    %24 = arith.sitofp %23 : vector<1x6xi32> to vector<1x6xf32>
    %25 = vector.broadcast %20 : vector<16x1xf32> to vector<16x6xf32>
    %26 = vector.broadcast %24 : vector<1x6xf32> to vector<16x6xf32>
    %27 = arith.mulf %25, %26 : vector<16x6xf32>
    %28 = arith.addf %12, %27 : vector<16x6xf32>
    %29 = vector.extract_strided_slice %19 {offsets = [0, 0], sizes = [16, 128], strides = [1, 1]} : vector<16x384xf32> to vector<16x128xf32>
    %30 = vector.extract_strided_slice %11 {offsets = [0, 1], sizes = [16, 1], strides = [1, 1]} : vector<16x6xi32> to vector<16x1xi32>
    %31 = vector.broadcast %30 : vector<16x1xi32> to vector<16x16xi32>
    %32 = vector.broadcast %7 : vector<1x16xi32> to vector<16x16xi32>
    %33 = arith.cmpi eq, %31, %32 : vector<16x16xi32>
    %34 = arith.extui %33 : vector<16x16xi1> to vector<16x16xi32>
    %35 = arith.sitofp %34 : vector<16x16xi32> to vector<16x16xf32>
    %cst_11 = arith.constant dense<0.000000e+00> : vector<16x384xf32>
    %36 = tpu.matmul %35, %4, %cst_11 {dimension_numbers = #tpu.dot_dimension_numbers<[1], [0], [0], [1], [0, 0, 1, 1], [], []>} : vector<16x16xf32>, vector<16x384xf32>, vector<16x384xf32> -> vector<16x384xf32>
    %37 = vector.extract_strided_slice %36 {offsets = [0, 257], sizes = [16, 1], strides = [1, 1]} : vector<16x384xf32> to vector<16x1xf32>
    %c1_i32 = arith.constant 1 : i32
    %38 = vector.broadcast %c1_i32 : i32 to vector<1x6xi32>
    %39 = arith.cmpi eq, %8, %38 : vector<1x6xi32>
    %40 = arith.extui %39 : vector<1x6xi1> to vector<1x6xi32>
    %41 = arith.sitofp %40 : vector<1x6xi32> to vector<1x6xf32>
    %42 = vector.broadcast %37 : vector<16x1xf32> to vector<16x6xf32>
    %43 = vector.broadcast %41 : vector<1x6xf32> to vector<16x6xf32>
    %44 = arith.mulf %42, %43 : vector<16x6xf32>
    %45 = arith.addf %28, %44 : vector<16x6xf32>
    %46 = vector.extract_strided_slice %36 {offsets = [0, 0], sizes = [16, 128], strides = [1, 1]} : vector<16x384xf32> to vector<16x128xf32>
    %47 = vector.extract_strided_slice %11 {offsets = [0, 2], sizes = [16, 1], strides = [1, 1]} : vector<16x6xi32> to vector<16x1xi32>
    %48 = vector.broadcast %47 : vector<16x1xi32> to vector<16x16xi32>
    %49 = vector.broadcast %7 : vector<1x16xi32> to vector<16x16xi32>
    %50 = arith.cmpi eq, %48, %49 : vector<16x16xi32>
    %51 = arith.extui %50 : vector<16x16xi1> to vector<16x16xi32>
    %52 = arith.sitofp %51 : vector<16x16xi32> to vector<16x16xf32>
    %cst_12 = arith.constant dense<0.000000e+00> : vector<16x384xf32>
    %53 = tpu.matmul %52, %4, %cst_12 {dimension_numbers = #tpu.dot_dimension_numbers<[1], [0], [0], [1], [0, 0, 1, 1], [], []>} : vector<16x16xf32>, vector<16x384xf32>, vector<16x384xf32> -> vector<16x384xf32>
    %54 = vector.extract_strided_slice %53 {offsets = [0, 257], sizes = [16, 1], strides = [1, 1]} : vector<16x384xf32> to vector<16x1xf32>
    %c2_i32 = arith.constant 2 : i32
    %55 = vector.broadcast %c2_i32 : i32 to vector<1x6xi32>
    %56 = arith.cmpi eq, %8, %55 : vector<1x6xi32>
    %57 = arith.extui %56 : vector<1x6xi1> to vector<1x6xi32>
    %58 = arith.sitofp %57 : vector<1x6xi32> to vector<1x6xf32>
    %59 = vector.broadcast %54 : vector<16x1xf32> to vector<16x6xf32>
    %60 = vector.broadcast %58 : vector<1x6xf32> to vector<16x6xf32>
    %61 = arith.mulf %59, %60 : vector<16x6xf32>
    %62 = arith.addf %45, %61 : vector<16x6xf32>
    %63 = vector.extract_strided_slice %53 {offsets = [0, 0], sizes = [16, 128], strides = [1, 1]} : vector<16x384xf32> to vector<16x128xf32>
    %64 = vector.extract_strided_slice %11 {offsets = [0, 3], sizes = [16, 1], strides = [1, 1]} : vector<16x6xi32> to vector<16x1xi32>
    %65 = vector.broadcast %64 : vector<16x1xi32> to vector<16x16xi32>
    %66 = vector.broadcast %7 : vector<1x16xi32> to vector<16x16xi32>
    %67 = arith.cmpi eq, %65, %66 : vector<16x16xi32>
    %68 = arith.extui %67 : vector<16x16xi1> to vector<16x16xi32>
    %69 = arith.sitofp %68 : vector<16x16xi32> to vector<16x16xf32>
    %cst_13 = arith.constant dense<0.000000e+00> : vector<16x384xf32>
    %70 = tpu.matmul %69, %4, %cst_13 {dimension_numbers = #tpu.dot_dimension_numbers<[1], [0], [0], [1], [0, 0, 1, 1], [], []>} : vector<16x16xf32>, vector<16x384xf32>, vector<16x384xf32> -> vector<16x384xf32>
    %71 = vector.extract_strided_slice %70 {offsets = [0, 257], sizes = [16, 1], strides = [1, 1]} : vector<16x384xf32> to vector<16x1xf32>
    %c3_i32 = arith.constant 3 : i32
    %72 = vector.broadcast %c3_i32 : i32 to vector<1x6xi32>
    %73 = arith.cmpi eq, %8, %72 : vector<1x6xi32>
    %74 = arith.extui %73 : vector<1x6xi1> to vector<1x6xi32>
    %75 = arith.sitofp %74 : vector<1x6xi32> to vector<1x6xf32>
    %76 = vector.broadcast %71 : vector<16x1xf32> to vector<16x6xf32>
    %77 = vector.broadcast %75 : vector<1x6xf32> to vector<16x6xf32>
    %78 = arith.mulf %76, %77 : vector<16x6xf32>
    %79 = arith.addf %62, %78 : vector<16x6xf32>
    %80 = vector.extract_strided_slice %70 {offsets = [0, 0], sizes = [16, 128], strides = [1, 1]} : vector<16x384xf32> to vector<16x128xf32>
    %81 = vector.extract_strided_slice %11 {offsets = [0, 4], sizes = [16, 1], strides = [1, 1]} : vector<16x6xi32> to vector<16x1xi32>
    %82 = vector.broadcast %81 : vector<16x1xi32> to vector<16x16xi32>
    %83 = vector.broadcast %7 : vector<1x16xi32> to vector<16x16xi32>
    %84 = arith.cmpi eq, %82, %83 : vector<16x16xi32>
    %85 = arith.extui %84 : vector<16x16xi1> to vector<16x16xi32>
    %86 = arith.sitofp %85 : vector<16x16xi32> to vector<16x16xf32>
    %cst_14 = arith.constant dense<0.000000e+00> : vector<16x384xf32>
    %87 = tpu.matmul %86, %4, %cst_14 {dimension_numbers = #tpu.dot_dimension_numbers<[1], [0], [0], [1], [0, 0, 1, 1], [], []>} : vector<16x16xf32>, vector<16x384xf32>, vector<16x384xf32> -> vector<16x384xf32>
    %88 = vector.extract_strided_slice %87 {offsets = [0, 257], sizes = [16, 1], strides = [1, 1]} : vector<16x384xf32> to vector<16x1xf32>
    %c4_i32 = arith.constant 4 : i32
    %89 = vector.broadcast %c4_i32 : i32 to vector<1x6xi32>
    %90 = arith.cmpi eq, %8, %89 : vector<1x6xi32>
    %91 = arith.extui %90 : vector<1x6xi1> to vector<1x6xi32>
    %92 = arith.sitofp %91 : vector<1x6xi32> to vector<1x6xf32>
    %93 = vector.broadcast %88 : vector<16x1xf32> to vector<16x6xf32>
    %94 = vector.broadcast %92 : vector<1x6xf32> to vector<16x6xf32>
    %95 = arith.mulf %93, %94 : vector<16x6xf32>
    %96 = arith.addf %79, %95 : vector<16x6xf32>
    %97 = vector.extract_strided_slice %87 {offsets = [0, 0], sizes = [16, 128], strides = [1, 1]} : vector<16x384xf32> to vector<16x128xf32>
    %98 = vector.extract_strided_slice %11 {offsets = [0, 5], sizes = [16, 1], strides = [1, 1]} : vector<16x6xi32> to vector<16x1xi32>
    %99 = vector.broadcast %98 : vector<16x1xi32> to vector<16x16xi32>
    %100 = vector.broadcast %7 : vector<1x16xi32> to vector<16x16xi32>
    %101 = arith.cmpi eq, %99, %100 : vector<16x16xi32>
    %102 = arith.extui %101 : vector<16x16xi1> to vector<16x16xi32>
    %103 = arith.sitofp %102 : vector<16x16xi32> to vector<16x16xf32>
    %cst_15 = arith.constant dense<0.000000e+00> : vector<16x384xf32>
    %104 = tpu.matmul %103, %4, %cst_15 {dimension_numbers = #tpu.dot_dimension_numbers<[1], [0], [0], [1], [0, 0, 1, 1], [], []>} : vector<16x16xf32>, vector<16x384xf32>, vector<16x384xf32> -> vector<16x384xf32>
    %105 = vector.extract_strided_slice %104 {offsets = [0, 257], sizes = [16, 1], strides = [1, 1]} : vector<16x384xf32> to vector<16x1xf32>
    %c5_i32 = arith.constant 5 : i32
    %106 = vector.broadcast %c5_i32 : i32 to vector<1x6xi32>
    %107 = arith.cmpi eq, %8, %106 : vector<1x6xi32>
    %108 = arith.extui %107 : vector<1x6xi1> to vector<1x6xi32>
    %109 = arith.sitofp %108 : vector<1x6xi32> to vector<1x6xf32>
    %110 = vector.broadcast %105 : vector<16x1xf32> to vector<16x6xf32>
    %111 = vector.broadcast %109 : vector<1x6xf32> to vector<16x6xf32>
    %112 = arith.mulf %110, %111 : vector<16x6xf32>
    %113 = arith.addf %96, %112 : vector<16x6xf32>
    %114 = vector.extract_strided_slice %104 {offsets = [0, 0], sizes = [16, 128], strides = [1, 1]} : vector<16x384xf32> to vector<16x128xf32>
    %115 = vector.broadcast %5 : vector<16x1xf32> to vector<16x6xf32>
    %116 = arith.mulf %115, %113 : vector<16x6xf32>
    %117 = vector.shape_cast %116 : vector<16x6xf32> to vector<1x16x6xf32>
    %cst_16 = arith.constant dense<0x7F800000> : vector<1xf32>
    %118 = vector.multi_reduction <minimumf>, %117, %cst_16 [1, 2] : vector<1x16x6xf32> to vector<1xf32>
    %119 = vector.shape_cast %118 : vector<1xf32> to vector<1x1x1xf32>
    %120 = vector.extract %119[0, 0, 0] : f32 from vector<1x1x1xf32>
    %cst_17 = arith.constant 1.000000e+03 : f32
    %121 = arith.subf %120, %cst_17 : f32
    %c15_i32 = arith.constant 15 : i32
    %122 = vector.broadcast %c15_i32 : i32 to vector<16x6xi32>
    %123 = arith.cmpi ne, %11, %122 : vector<16x6xi32>
    %124 = vector.broadcast %121 : f32 to vector<16x6xf32>
    %125 = arith.select %123, %116, %124 : vector<16x6xi1>, vector<16x6xf32>
    %cst_18 = arith.constant dense<0xFF800000> : vector<16xf32>
    %126 = vector.multi_reduction <maximumf>, %125, %cst_18 [1] : vector<16x6xf32> to vector<16xf32>
    %127 = vector.shape_cast %126 : vector<16xf32> to vector<16x1xf32>
    %128 = vector.broadcast %127 : vector<16x1xf32> to vector<16x6xf32>
    %129 = arith.subf %125, %128 : vector<16x6xf32>
    %130 = math.exp %129 : vector<16x6xf32>
    %cst_19 = arith.constant dense<0.000000e+00> : vector<16xf32>
    %131 = vector.multi_reduction <add>, %130, %cst_19 [1] : vector<16x6xf32> to vector<16xf32>
    %132 = vector.shape_cast %131 : vector<16xf32> to vector<16x1xf32>
    %133 = vector.broadcast %132 : vector<16x1xf32> to vector<16x6xf32>
    %134 = arith.divf %130, %133 : vector<16x6xf32>
    %135 = vector.extract_strided_slice %134 {offsets = [0, 0], sizes = [16, 1], strides = [1, 1]} : vector<16x6xf32> to vector<16x1xf32>
    %136 = vector.broadcast %135 : vector<16x1xf32> to vector<16x128xf32>
    %137 = arith.mulf %136, %29 : vector<16x128xf32>
    %138 = vector.extract_strided_slice %134 {offsets = [0, 1], sizes = [16, 1], strides = [1, 1]} : vector<16x6xf32> to vector<16x1xf32>
    %139 = vector.broadcast %138 : vector<16x1xf32> to vector<16x128xf32>
    %140 = arith.mulf %139, %46 : vector<16x128xf32>
    %141 = arith.addf %137, %140 : vector<16x128xf32>
    %142 = vector.extract_strided_slice %134 {offsets = [0, 2], sizes = [16, 1], strides = [1, 1]} : vector<16x6xf32> to vector<16x1xf32>
    %143 = vector.broadcast %142 : vector<16x1xf32> to vector<16x128xf32>
    %144 = arith.mulf %143, %63 : vector<16x128xf32>
    %145 = arith.addf %141, %144 : vector<16x128xf32>
    %146 = vector.extract_strided_slice %134 {offsets = [0, 3], sizes = [16, 1], strides = [1, 1]} : vector<16x6xf32> to vector<16x1xf32>
    %147 = vector.broadcast %146 : vector<16x1xf32> to vector<16x128xf32>
    %148 = arith.mulf %147, %80 : vector<16x128xf32>
    %149 = arith.addf %145, %148 : vector<16x128xf32>
    %150 = vector.extract_strided_slice %134 {offsets = [0, 4], sizes = [16, 1], strides = [1, 1]} : vector<16x6xf32> to vector<16x1xf32>
    %151 = vector.broadcast %150 : vector<16x1xf32> to vector<16x128xf32>
    %152 = arith.mulf %151, %97 : vector<16x128xf32>
    %153 = arith.addf %149, %152 : vector<16x128xf32>
    %154 = vector.extract_strided_slice %134 {offsets = [0, 5], sizes = [16, 1], strides = [1, 1]} : vector<16x6xf32> to vector<16x1xf32>
    %155 = vector.broadcast %154 : vector<16x1xf32> to vector<16x128xf32>
    %156 = arith.mulf %155, %114 : vector<16x128xf32>
    %157 = arith.addf %153, %156 : vector<16x128xf32>
    %158 = arith.addf %9, %157 : vector<16x128xf32>
    %c0_20 = arith.constant 0 : index
    %c1 = arith.constant 1 : index
    %c0_21 = arith.constant 0 : index
    %c0_22 = arith.constant 0 : index
    %159 = vector.load %arg3[%c0_20, %c1, %c0_21, %c0_22] : memref<1x2x16x6xi32, #tpu.memory_space<vmem>>, vector<1x1x16x6xi32>
    %160 = vector.shape_cast %159 : vector<1x1x16x6xi32> to vector<16x6xi32>
    %cst_23 = arith.constant 0.000000e+00 : f32
    %161 = vector.broadcast %cst_23 : f32 to vector<16x6xf32>
    %162 = vector.extract_strided_slice %160 {offsets = [0, 0], sizes = [16, 1], strides = [1, 1]} : vector<16x6xi32> to vector<16x1xi32>
    %163 = vector.broadcast %162 : vector<16x1xi32> to vector<16x16xi32>
    %164 = vector.broadcast %7 : vector<1x16xi32> to vector<16x16xi32>
    %165 = arith.cmpi eq, %163, %164 : vector<16x16xi32>
    %166 = arith.extui %165 : vector<16x16xi1> to vector<16x16xi32>
    %167 = arith.sitofp %166 : vector<16x16xi32> to vector<16x16xf32>
    %cst_24 = arith.constant dense<0.000000e+00> : vector<16x384xf32>
    %168 = tpu.matmul %167, %4, %cst_24 {dimension_numbers = #tpu.dot_dimension_numbers<[1], [0], [0], [1], [0, 0, 1, 1], [], []>} : vector<16x16xf32>, vector<16x384xf32>, vector<16x384xf32> -> vector<16x384xf32>
    %169 = vector.extract_strided_slice %168 {offsets = [0, 257], sizes = [16, 1], strides = [1, 1]} : vector<16x384xf32> to vector<16x1xf32>
    %c0_i32_25 = arith.constant 0 : i32
    %170 = vector.broadcast %c0_i32_25 : i32 to vector<1x6xi32>
    %171 = arith.cmpi eq, %8, %170 : vector<1x6xi32>
    %172 = arith.extui %171 : vector<1x6xi1> to vector<1x6xi32>
    %173 = arith.sitofp %172 : vector<1x6xi32> to vector<1x6xf32>
    %174 = vector.broadcast %169 : vector<16x1xf32> to vector<16x6xf32>
    %175 = vector.broadcast %173 : vector<1x6xf32> to vector<16x6xf32>
    %176 = arith.mulf %174, %175 : vector<16x6xf32>
    %177 = arith.addf %161, %176 : vector<16x6xf32>
    %178 = vector.extract_strided_slice %168 {offsets = [0, 128], sizes = [16, 128], strides = [1, 1]} : vector<16x384xf32> to vector<16x128xf32>
    %179 = vector.extract_strided_slice %160 {offsets = [0, 1], sizes = [16, 1], strides = [1, 1]} : vector<16x6xi32> to vector<16x1xi32>
    %180 = vector.broadcast %179 : vector<16x1xi32> to vector<16x16xi32>
    %181 = vector.broadcast %7 : vector<1x16xi32> to vector<16x16xi32>
    %182 = arith.cmpi eq, %180, %181 : vector<16x16xi32>
    %183 = arith.extui %182 : vector<16x16xi1> to vector<16x16xi32>
    %184 = arith.sitofp %183 : vector<16x16xi32> to vector<16x16xf32>
    %cst_26 = arith.constant dense<0.000000e+00> : vector<16x384xf32>
    %185 = tpu.matmul %184, %4, %cst_26 {dimension_numbers = #tpu.dot_dimension_numbers<[1], [0], [0], [1], [0, 0, 1, 1], [], []>} : vector<16x16xf32>, vector<16x384xf32>, vector<16x384xf32> -> vector<16x384xf32>
    %186 = vector.extract_strided_slice %185 {offsets = [0, 257], sizes = [16, 1], strides = [1, 1]} : vector<16x384xf32> to vector<16x1xf32>
    %c1_i32_27 = arith.constant 1 : i32
    %187 = vector.broadcast %c1_i32_27 : i32 to vector<1x6xi32>
    %188 = arith.cmpi eq, %8, %187 : vector<1x6xi32>
    %189 = arith.extui %188 : vector<1x6xi1> to vector<1x6xi32>
    %190 = arith.sitofp %189 : vector<1x6xi32> to vector<1x6xf32>
    %191 = vector.broadcast %186 : vector<16x1xf32> to vector<16x6xf32>
    %192 = vector.broadcast %190 : vector<1x6xf32> to vector<16x6xf32>
    %193 = arith.mulf %191, %192 : vector<16x6xf32>
    %194 = arith.addf %177, %193 : vector<16x6xf32>
    %195 = vector.extract_strided_slice %185 {offsets = [0, 128], sizes = [16, 128], strides = [1, 1]} : vector<16x384xf32> to vector<16x128xf32>
    %196 = vector.extract_strided_slice %160 {offsets = [0, 2], sizes = [16, 1], strides = [1, 1]} : vector<16x6xi32> to vector<16x1xi32>
    %197 = vector.broadcast %196 : vector<16x1xi32> to vector<16x16xi32>
    %198 = vector.broadcast %7 : vector<1x16xi32> to vector<16x16xi32>
    %199 = arith.cmpi eq, %197, %198 : vector<16x16xi32>
    %200 = arith.extui %199 : vector<16x16xi1> to vector<16x16xi32>
    %201 = arith.sitofp %200 : vector<16x16xi32> to vector<16x16xf32>
    %cst_28 = arith.constant dense<0.000000e+00> : vector<16x384xf32>
    %202 = tpu.matmul %201, %4, %cst_28 {dimension_numbers = #tpu.dot_dimension_numbers<[1], [0], [0], [1], [0, 0, 1, 1], [], []>} : vector<16x16xf32>, vector<16x384xf32>, vector<16x384xf32> -> vector<16x384xf32>
    %203 = vector.extract_strided_slice %202 {offsets = [0, 257], sizes = [16, 1], strides = [1, 1]} : vector<16x384xf32> to vector<16x1xf32>
    %c2_i32_29 = arith.constant 2 : i32
    %204 = vector.broadcast %c2_i32_29 : i32 to vector<1x6xi32>
    %205 = arith.cmpi eq, %8, %204 : vector<1x6xi32>
    %206 = arith.extui %205 : vector<1x6xi1> to vector<1x6xi32>
    %207 = arith.sitofp %206 : vector<1x6xi32> to vector<1x6xf32>
    %208 = vector.broadcast %203 : vector<16x1xf32> to vector<16x6xf32>
    %209 = vector.broadcast %207 : vector<1x6xf32> to vector<16x6xf32>
    %210 = arith.mulf %208, %209 : vector<16x6xf32>
    %211 = arith.addf %194, %210 : vector<16x6xf32>
    %212 = vector.extract_strided_slice %202 {offsets = [0, 128], sizes = [16, 128], strides = [1, 1]} : vector<16x384xf32> to vector<16x128xf32>
    %213 = vector.extract_strided_slice %160 {offsets = [0, 3], sizes = [16, 1], strides = [1, 1]} : vector<16x6xi32> to vector<16x1xi32>
    %214 = vector.broadcast %213 : vector<16x1xi32> to vector<16x16xi32>
    %215 = vector.broadcast %7 : vector<1x16xi32> to vector<16x16xi32>
    %216 = arith.cmpi eq, %214, %215 : vector<16x16xi32>
    %217 = arith.extui %216 : vector<16x16xi1> to vector<16x16xi32>
    %218 = arith.sitofp %217 : vector<16x16xi32> to vector<16x16xf32>
    %cst_30 = arith.constant dense<0.000000e+00> : vector<16x384xf32>
    %219 = tpu.matmul %218, %4, %cst_30 {dimension_numbers = #tpu.dot_dimension_numbers<[1], [0], [0], [1], [0, 0, 1, 1], [], []>} : vector<16x16xf32>, vector<16x384xf32>, vector<16x384xf32> -> vector<16x384xf32>
    %220 = vector.extract_strided_slice %219 {offsets = [0, 257], sizes = [16, 1], strides = [1, 1]} : vector<16x384xf32> to vector<16x1xf32>
    %c3_i32_31 = arith.constant 3 : i32
    %221 = vector.broadcast %c3_i32_31 : i32 to vector<1x6xi32>
    %222 = arith.cmpi eq, %8, %221 : vector<1x6xi32>
    %223 = arith.extui %222 : vector<1x6xi1> to vector<1x6xi32>
    %224 = arith.sitofp %223 : vector<1x6xi32> to vector<1x6xf32>
    %225 = vector.broadcast %220 : vector<16x1xf32> to vector<16x6xf32>
    %226 = vector.broadcast %224 : vector<1x6xf32> to vector<16x6xf32>
    %227 = arith.mulf %225, %226 : vector<16x6xf32>
    %228 = arith.addf %211, %227 : vector<16x6xf32>
    %229 = vector.extract_strided_slice %219 {offsets = [0, 128], sizes = [16, 128], strides = [1, 1]} : vector<16x384xf32> to vector<16x128xf32>
    %230 = vector.extract_strided_slice %160 {offsets = [0, 4], sizes = [16, 1], strides = [1, 1]} : vector<16x6xi32> to vector<16x1xi32>
    %231 = vector.broadcast %230 : vector<16x1xi32> to vector<16x16xi32>
    %232 = vector.broadcast %7 : vector<1x16xi32> to vector<16x16xi32>
    %233 = arith.cmpi eq, %231, %232 : vector<16x16xi32>
    %234 = arith.extui %233 : vector<16x16xi1> to vector<16x16xi32>
    %235 = arith.sitofp %234 : vector<16x16xi32> to vector<16x16xf32>
    %cst_32 = arith.constant dense<0.000000e+00> : vector<16x384xf32>
    %236 = tpu.matmul %235, %4, %cst_32 {dimension_numbers = #tpu.dot_dimension_numbers<[1], [0], [0], [1], [0, 0, 1, 1], [], []>} : vector<16x16xf32>, vector<16x384xf32>, vector<16x384xf32> -> vector<16x384xf32>
    %237 = vector.extract_strided_slice %236 {offsets = [0, 257], sizes = [16, 1], strides = [1, 1]} : vector<16x384xf32> to vector<16x1xf32>
    %c4_i32_33 = arith.constant 4 : i32
    %238 = vector.broadcast %c4_i32_33 : i32 to vector<1x6xi32>
    %239 = arith.cmpi eq, %8, %238 : vector<1x6xi32>
    %240 = arith.extui %239 : vector<1x6xi1> to vector<1x6xi32>
    %241 = arith.sitofp %240 : vector<1x6xi32> to vector<1x6xf32>
    %242 = vector.broadcast %237 : vector<16x1xf32> to vector<16x6xf32>
    %243 = vector.broadcast %241 : vector<1x6xf32> to vector<16x6xf32>
    %244 = arith.mulf %242, %243 : vector<16x6xf32>
    %245 = arith.addf %228, %244 : vector<16x6xf32>
    %246 = vector.extract_strided_slice %236 {offsets = [0, 128], sizes = [16, 128], strides = [1, 1]} : vector<16x384xf32> to vector<16x128xf32>
    %247 = vector.extract_strided_slice %160 {offsets = [0, 5], sizes = [16, 1], strides = [1, 1]} : vector<16x6xi32> to vector<16x1xi32>
    %248 = vector.broadcast %247 : vector<16x1xi32> to vector<16x16xi32>
    %249 = vector.broadcast %7 : vector<1x16xi32> to vector<16x16xi32>
    %250 = arith.cmpi eq, %248, %249 : vector<16x16xi32>
    %251 = arith.extui %250 : vector<16x16xi1> to vector<16x16xi32>
    %252 = arith.sitofp %251 : vector<16x16xi32> to vector<16x16xf32>
    %cst_34 = arith.constant dense<0.000000e+00> : vector<16x384xf32>
    %253 = tpu.matmul %252, %4, %cst_34 {dimension_numbers = #tpu.dot_dimension_numbers<[1], [0], [0], [1], [0, 0, 1, 1], [], []>} : vector<16x16xf32>, vector<16x384xf32>, vector<16x384xf32> -> vector<16x384xf32>
    %254 = vector.extract_strided_slice %253 {offsets = [0, 257], sizes = [16, 1], strides = [1, 1]} : vector<16x384xf32> to vector<16x1xf32>
    %c5_i32_35 = arith.constant 5 : i32
    %255 = vector.broadcast %c5_i32_35 : i32 to vector<1x6xi32>
    %256 = arith.cmpi eq, %8, %255 : vector<1x6xi32>
    %257 = arith.extui %256 : vector<1x6xi1> to vector<1x6xi32>
    %258 = arith.sitofp %257 : vector<1x6xi32> to vector<1x6xf32>
    %259 = vector.broadcast %254 : vector<16x1xf32> to vector<16x6xf32>
    %260 = vector.broadcast %258 : vector<1x6xf32> to vector<16x6xf32>
    %261 = arith.mulf %259, %260 : vector<16x6xf32>
    %262 = arith.addf %245, %261 : vector<16x6xf32>
    %263 = vector.extract_strided_slice %253 {offsets = [0, 128], sizes = [16, 128], strides = [1, 1]} : vector<16x384xf32> to vector<16x128xf32>
    %264 = vector.broadcast %5 : vector<16x1xf32> to vector<16x6xf32>
    %265 = arith.mulf %264, %262 : vector<16x6xf32>
    %266 = vector.shape_cast %265 : vector<16x6xf32> to vector<1x16x6xf32>
    %cst_36 = arith.constant dense<0x7F800000> : vector<1xf32>
    %267 = vector.multi_reduction <minimumf>, %266, %cst_36 [1, 2] : vector<1x16x6xf32> to vector<1xf32>
    %268 = vector.shape_cast %267 : vector<1xf32> to vector<1x1x1xf32>
    %269 = vector.extract %268[0, 0, 0] : f32 from vector<1x1x1xf32>
    %cst_37 = arith.constant 1.000000e+03 : f32
    %270 = arith.subf %269, %cst_37 : f32
    %c15_i32_38 = arith.constant 15 : i32
    %271 = vector.broadcast %c15_i32_38 : i32 to vector<16x6xi32>
    %272 = arith.cmpi ne, %160, %271 : vector<16x6xi32>
    %273 = vector.broadcast %270 : f32 to vector<16x6xf32>
    %274 = arith.select %272, %265, %273 : vector<16x6xi1>, vector<16x6xf32>
    %cst_39 = arith.constant dense<0xFF800000> : vector<16xf32>
    %275 = vector.multi_reduction <maximumf>, %274, %cst_39 [1] : vector<16x6xf32> to vector<16xf32>
    %276 = vector.shape_cast %275 : vector<16xf32> to vector<16x1xf32>
    %277 = vector.broadcast %276 : vector<16x1xf32> to vector<16x6xf32>
    %278 = arith.subf %274, %277 : vector<16x6xf32>
    %279 = math.exp %278 : vector<16x6xf32>
    %cst_40 = arith.constant dense<0.000000e+00> : vector<16xf32>
    %280 = vector.multi_reduction <add>, %279, %cst_40 [1] : vector<16x6xf32> to vector<16xf32>
    %281 = vector.shape_cast %280 : vector<16xf32> to vector<16x1xf32>
    %282 = vector.broadcast %281 : vector<16x1xf32> to vector<16x6xf32>
    %283 = arith.divf %279, %282 : vector<16x6xf32>
    %284 = vector.extract_strided_slice %283 {offsets = [0, 0], sizes = [16, 1], strides = [1, 1]} : vector<16x6xf32> to vector<16x1xf32>
    %285 = vector.broadcast %284 : vector<16x1xf32> to vector<16x128xf32>
    %286 = arith.mulf %285, %178 : vector<16x128xf32>
    %287 = vector.extract_strided_slice %283 {offsets = [0, 1], sizes = [16, 1], strides = [1, 1]} : vector<16x6xf32> to vector<16x1xf32>
    %288 = vector.broadcast %287 : vector<16x1xf32> to vector<16x128xf32>
    %289 = arith.mulf %288, %195 : vector<16x128xf32>
    %290 = arith.addf %286, %289 : vector<16x128xf32>
    %291 = vector.extract_strided_slice %283 {offsets = [0, 2], sizes = [16, 1], strides = [1, 1]} : vector<16x6xf32> to vector<16x1xf32>
    %292 = vector.broadcast %291 : vector<16x1xf32> to vector<16x128xf32>
    %293 = arith.mulf %292, %212 : vector<16x128xf32>
    %294 = arith.addf %290, %293 : vector<16x128xf32>
    %295 = vector.extract_strided_slice %283 {offsets = [0, 3], sizes = [16, 1], strides = [1, 1]} : vector<16x6xf32> to vector<16x1xf32>
    %296 = vector.broadcast %295 : vector<16x1xf32> to vector<16x128xf32>
    %297 = arith.mulf %296, %229 : vector<16x128xf32>
    %298 = arith.addf %294, %297 : vector<16x128xf32>
    %299 = vector.extract_strided_slice %283 {offsets = [0, 4], sizes = [16, 1], strides = [1, 1]} : vector<16x6xf32> to vector<16x1xf32>
    %300 = vector.broadcast %299 : vector<16x1xf32> to vector<16x128xf32>
    %301 = arith.mulf %300, %246 : vector<16x128xf32>
    %302 = arith.addf %298, %301 : vector<16x128xf32>
    %303 = vector.extract_strided_slice %283 {offsets = [0, 5], sizes = [16, 1], strides = [1, 1]} : vector<16x6xf32> to vector<16x1xf32>
    %304 = vector.broadcast %303 : vector<16x1xf32> to vector<16x128xf32>
    %305 = arith.mulf %304, %263 : vector<16x128xf32>
    %306 = arith.addf %302, %305 : vector<16x128xf32>
    %307 = arith.addf %158, %306 : vector<16x128xf32>
    %c0_41 = arith.constant 0 : index
    %c0_42 = arith.constant 0 : index
    %c0_43 = arith.constant 0 : index
    %308 = vector.load %arg4[%c0_41, %c0_42, %c0_43] : memref<1x1x128xf32, #tpu.memory_space<vmem>>, vector<1x1x128xf32>
    %309 = vector.shape_cast %308 : vector<1x1x128xf32> to vector<1x128xf32>
    %310 = vector.broadcast %309 : vector<1x128xf32> to vector<16x128xf32>
    %311 = arith.mulf %307, %310 : vector<16x128xf32>
    %c0_44 = arith.constant 0 : index
    %c0_45 = arith.constant 0 : index
    %c0_46 = arith.constant 0 : index
    %312 = vector.load %arg5[%c0_44, %c0_45, %c0_46] : memref<1x1x128xf32, #tpu.memory_space<vmem>>, vector<1x1x128xf32>
    %313 = vector.shape_cast %312 : vector<1x1x128xf32> to vector<1x128xf32>
    %314 = vector.broadcast %313 : vector<1x128xf32> to vector<16x128xf32>
    %315 = arith.addf %311, %314 : vector<16x128xf32>
    %c0_47 = arith.constant 0 : index
    %c0_48 = arith.constant 0 : index
    %c0_49 = arith.constant 0 : index
    %316 = vector.load %arg6[%c0_47, %c0_48, %c0_49] : memref<1x16x128xf32, #tpu.memory_space<vmem>>, vector<1x16x128xf32>
    %317 = vector.shape_cast %316 : vector<1x16x128xf32> to vector<16x128xf32>
    %318 = vector.shape_cast %315 : vector<16x128xf32> to vector<1x16x128xf32>
    tpu.vector_store %arg6[%c0_47, %c0_48, %c0_49], %318 {strides = array<i32>} : memref<1x16x128xf32, #tpu.memory_space<vmem>>, vector<1x16x128xf32>,
    %c0_50 = arith.constant 0 : index
    %c0_51 = arith.constant 0 : index
    %c0_52 = arith.constant 0 : index
    %c0_53 = arith.constant 0 : index
    %319 = vector.load %arg3[%c0_50, %c0_51, %c0_52, %c0_53] : memref<1x2x16x6xi32, #tpu.memory_space<vmem>>, vector<1x1x16x6xi32>
    %320 = vector.shape_cast %319 : vector<1x1x16x6xi32> to vector<16x6xi32>
    %c0_54 = arith.constant 0 : index
    %c1_55 = arith.constant 1 : index
    %c0_56 = arith.constant 0 : index
    %c0_57 = arith.constant 0 : index
    %321 = vector.load %arg3[%c0_54, %c1_55, %c0_56, %c0_57] : memref<1x2x16x6xi32, #tpu.memory_space<vmem>>, vector<1x1x16x6xi32>
    %322 = vector.shape_cast %321 : vector<1x1x16x6xi32> to vector<16x6xi32>
    %c15_i32_58 = arith.constant 15 : i32
    %323 = vector.broadcast %c15_i32_58 : i32 to vector<16x6xi32>
    %324 = arith.cmpi eq, %320, %323 : vector<16x6xi32>
    %325 = arith.extui %324 : vector<16x6xi1> to vector<16x6xi32>
    %326 = arith.sitofp %325 : vector<16x6xi32> to vector<16x6xf32>
    %cst_59 = arith.constant 0.000000e+00 : f32
    %327 = vector.broadcast %cst_59 : f32 to vector<16x6xf32>
    %328 = vector.extract_strided_slice %320 {offsets = [0, 0], sizes = [16, 1], strides = [1, 1]} : vector<16x6xi32> to vector<16x1xi32>
    %329 = vector.broadcast %328 : vector<16x1xi32> to vector<16x16xi32>
    %330 = vector.broadcast %7 : vector<1x16xi32> to vector<16x16xi32>
    %331 = arith.cmpi eq, %329, %330 : vector<16x16xi32>
    %332 = arith.extui %331 : vector<16x16xi1> to vector<16x16xi32>
    %333 = arith.sitofp %332 : vector<16x16xi32> to vector<16x16xf32>
    %cst_60 = arith.constant dense<0.000000e+00> : vector<16x128xf32>
    %334 = tpu.matmul %333, %6, %cst_60 {dimension_numbers = #tpu.dot_dimension_numbers<[1], [0], [0], [1], [0, 0, 1, 1], [], []>} : vector<16x16xf32>, vector<16x128xf32>, vector<16x128xf32> -> vector<16x128xf32>
    %335 = vector.extract_strided_slice %334 {offsets = [0, 1], sizes = [16, 1], strides = [1, 1]} : vector<16x128xf32> to vector<16x1xf32>
    %c0_i32_61 = arith.constant 0 : i32
    %336 = vector.broadcast %c0_i32_61 : i32 to vector<1x6xi32>
    %337 = arith.cmpi eq, %8, %336 : vector<1x6xi32>
    %338 = arith.extui %337 : vector<1x6xi1> to vector<1x6xi32>
    %339 = arith.sitofp %338 : vector<1x6xi32> to vector<1x6xf32>
    %340 = vector.broadcast %335 : vector<16x1xf32> to vector<16x6xf32>
    %341 = vector.broadcast %339 : vector<1x6xf32> to vector<16x6xf32>
    %342 = arith.mulf %340, %341 : vector<16x6xf32>
    %343 = arith.addf %327, %342 : vector<16x6xf32>
    %344 = vector.extract_strided_slice %320 {offsets = [0, 1], sizes = [16, 1], strides = [1, 1]} : vector<16x6xi32> to vector<16x1xi32>
    %345 = vector.broadcast %344 : vector<16x1xi32> to vector<16x16xi32>
    %346 = vector.broadcast %7 : vector<1x16xi32> to vector<16x16xi32>
    %347 = arith.cmpi eq, %345, %346 : vector<16x16xi32>
    %348 = arith.extui %347 : vector<16x16xi1> to vector<16x16xi32>
    %349 = arith.sitofp %348 : vector<16x16xi32> to vector<16x16xf32>
    %cst_62 = arith.constant dense<0.000000e+00> : vector<16x128xf32>
    %350 = tpu.matmul %349, %6, %cst_62 {dimension_numbers = #tpu.dot_dimension_numbers<[1], [0], [0], [1], [0, 0, 1, 1], [], []>} : vector<16x16xf32>, vector<16x128xf32>, vector<16x128xf32> -> vector<16x128xf32>
    %351 = vector.extract_strided_slice %350 {offsets = [0, 1], sizes = [16, 1], strides = [1, 1]} : vector<16x128xf32> to vector<16x1xf32>
    %c1_i32_63 = arith.constant 1 : i32
    %352 = vector.broadcast %c1_i32_63 : i32 to vector<1x6xi32>
    %353 = arith.cmpi eq, %8, %352 : vector<1x6xi32>
    %354 = arith.extui %353 : vector<1x6xi1> to vector<1x6xi32>
    %355 = arith.sitofp %354 : vector<1x6xi32> to vector<1x6xf32>
    %356 = vector.broadcast %351 : vector<16x1xf32> to vector<16x6xf32>
    %357 = vector.broadcast %355 : vector<1x6xf32> to vector<16x6xf32>
    %358 = arith.mulf %356, %357 : vector<16x6xf32>
    %359 = arith.addf %343, %358 : vector<16x6xf32>
    %360 = vector.extract_strided_slice %320 {offsets = [0, 2], sizes = [16, 1], strides = [1, 1]} : vector<16x6xi32> to vector<16x1xi32>
    %361 = vector.broadcast %360 : vector<16x1xi32> to vector<16x16xi32>
    %362 = vector.broadcast %7 : vector<1x16xi32> to vector<16x16xi32>
    %363 = arith.cmpi eq, %361, %362 : vector<16x16xi32>
    %364 = arith.extui %363 : vector<16x16xi1> to vector<16x16xi32>
    %365 = arith.sitofp %364 : vector<16x16xi32> to vector<16x16xf32>
    %cst_64 = arith.constant dense<0.000000e+00> : vector<16x128xf32>
    %366 = tpu.matmul %365, %6, %cst_64 {dimension_numbers = #tpu.dot_dimension_numbers<[1], [0], [0], [1], [0, 0, 1, 1], [], []>} : vector<16x16xf32>, vector<16x128xf32>, vector<16x128xf32> -> vector<16x128xf32>
    %367 = vector.extract_strided_slice %366 {offsets = [0, 1], sizes = [16, 1], strides = [1, 1]} : vector<16x128xf32> to vector<16x1xf32>
    %c2_i32_65 = arith.constant 2 : i32
    %368 = vector.broadcast %c2_i32_65 : i32 to vector<1x6xi32>
    %369 = arith.cmpi eq, %8, %368 : vector<1x6xi32>
    %370 = arith.extui %369 : vector<1x6xi1> to vector<1x6xi32>
    %371 = arith.sitofp %370 : vector<1x6xi32> to vector<1x6xf32>
    %372 = vector.broadcast %367 : vector<16x1xf32> to vector<16x6xf32>
    %373 = vector.broadcast %371 : vector<1x6xf32> to vector<16x6xf32>
    %374 = arith.mulf %372, %373 : vector<16x6xf32>
    %375 = arith.addf %359, %374 : vector<16x6xf32>
    %376 = vector.extract_strided_slice %320 {offsets = [0, 3], sizes = [16, 1], strides = [1, 1]} : vector<16x6xi32> to vector<16x1xi32>
    %377 = vector.broadcast %376 : vector<16x1xi32> to vector<16x16xi32>
    %378 = vector.broadcast %7 : vector<1x16xi32> to vector<16x16xi32>
    %379 = arith.cmpi eq, %377, %378 : vector<16x16xi32>
    %380 = arith.extui %379 : vector<16x16xi1> to vector<16x16xi32>
    %381 = arith.sitofp %380 : vector<16x16xi32> to vector<16x16xf32>
    %cst_66 = arith.constant dense<0.000000e+00> : vector<16x128xf32>
    %382 = tpu.matmul %381, %6, %cst_66 {dimension_numbers = #tpu.dot_dimension_numbers<[1], [0], [0], [1], [0, 0, 1, 1], [], []>} : vector<16x16xf32>, vector<16x128xf32>, vector<16x128xf32> -> vector<16x128xf32>
    %383 = vector.extract_strided_slice %382 {offsets = [0, 1], sizes = [16, 1], strides = [1, 1]} : vector<16x128xf32> to vector<16x1xf32>
    %c3_i32_67 = arith.constant 3 : i32
    %384 = vector.broadcast %c3_i32_67 : i32 to vector<1x6xi32>
    %385 = arith.cmpi eq, %8, %384 : vector<1x6xi32>
    %386 = arith.extui %385 : vector<1x6xi1> to vector<1x6xi32>
    %387 = arith.sitofp %386 : vector<1x6xi32> to vector<1x6xf32>
    %388 = vector.broadcast %383 : vector<16x1xf32> to vector<16x6xf32>
    %389 = vector.broadcast %387 : vector<1x6xf32> to vector<16x6xf32>
    %390 = arith.mulf %388, %389 : vector<16x6xf32>
    %391 = arith.addf %375, %390 : vector<16x6xf32>
    %392 = vector.extract_strided_slice %320 {offsets = [0, 4], sizes = [16, 1], strides = [1, 1]} : vector<16x6xi32> to vector<16x1xi32>
    %393 = vector.broadcast %392 : vector<16x1xi32> to vector<16x16xi32>
    %394 = vector.broadcast %7 : vector<1x16xi32> to vector<16x16xi32>
    %395 = arith.cmpi eq, %393, %394 : vector<16x16xi32>
    %396 = arith.extui %395 : vector<16x16xi1> to vector<16x16xi32>
    %397 = arith.sitofp %396 : vector<16x16xi32> to vector<16x16xf32>
    %cst_68 = arith.constant dense<0.000000e+00> : vector<16x128xf32>
    %398 = tpu.matmul %397, %6, %cst_68 {dimension_numbers = #tpu.dot_dimension_numbers<[1], [0], [0], [1], [0, 0, 1, 1], [], []>} : vector<16x16xf32>, vector<16x128xf32>, vector<16x128xf32> -> vector<16x128xf32>
    %399 = vector.extract_strided_slice %398 {offsets = [0, 1], sizes = [16, 1], strides = [1, 1]} : vector<16x128xf32> to vector<16x1xf32>
    %c4_i32_69 = arith.constant 4 : i32
    %400 = vector.broadcast %c4_i32_69 : i32 to vector<1x6xi32>
    %401 = arith.cmpi eq, %8, %400 : vector<1x6xi32>
    %402 = arith.extui %401 : vector<1x6xi1> to vector<1x6xi32>
    %403 = arith.sitofp %402 : vector<1x6xi32> to vector<1x6xf32>
    %404 = vector.broadcast %399 : vector<16x1xf32> to vector<16x6xf32>
    %405 = vector.broadcast %403 : vector<1x6xf32> to vector<16x6xf32>
    %406 = arith.mulf %404, %405 : vector<16x6xf32>
    %407 = arith.addf %391, %406 : vector<16x6xf32>
    %408 = vector.extract_strided_slice %320 {offsets = [0, 5], sizes = [16, 1], strides = [1, 1]} : vector<16x6xi32> to vector<16x1xi32>
    %409 = vector.broadcast %408 : vector<16x1xi32> to vector<16x16xi32>
    %410 = vector.broadcast %7 : vector<1x16xi32> to vector<16x16xi32>
    %411 = arith.cmpi eq, %409, %410 : vector<16x16xi32>
    %412 = arith.extui %411 : vector<16x16xi1> to vector<16x16xi32>
    %413 = arith.sitofp %412 : vector<16x16xi32> to vector<16x16xf32>
    %cst_70 = arith.constant dense<0.000000e+00> : vector<16x128xf32>
    %414 = tpu.matmul %413, %6, %cst_70 {dimension_numbers = #tpu.dot_dimension_numbers<[1], [0], [0], [1], [0, 0, 1, 1], [], []>} : vector<16x16xf32>, vector<16x128xf32>, vector<16x128xf32> -> vector<16x128xf32>
    %415 = vector.extract_strided_slice %414 {offsets = [0, 1], sizes = [16, 1], strides = [1, 1]} : vector<16x128xf32> to vector<16x1xf32>
    %c5_i32_71 = arith.constant 5 : i32
    %416 = vector.broadcast %c5_i32_71 : i32 to vector<1x6xi32>
    %417 = arith.cmpi eq, %8, %416 : vector<1x6xi32>
    %418 = arith.extui %417 : vector<1x6xi1> to vector<1x6xi32>
    %419 = arith.sitofp %418 : vector<1x6xi32> to vector<1x6xf32>
    %420 = vector.broadcast %415 : vector<16x1xf32> to vector<16x6xf32>
    %421 = vector.broadcast %419 : vector<1x6xf32> to vector<16x6xf32>
    %422 = arith.mulf %420, %421 : vector<16x6xf32>
    %423 = arith.addf %407, %422 : vector<16x6xf32>
    %424 = vector.extract_strided_slice %322 {offsets = [0, 0], sizes = [16, 1], strides = [1, 1]} : vector<16x6xi32> to vector<16x1xi32>
    %425 = vector.broadcast %424 : vector<16x1xi32> to vector<16x16xi32>
    %426 = vector.broadcast %7 : vector<1x16xi32> to vector<16x16xi32>
    %427 = arith.cmpi eq, %425, %426 : vector<16x16xi32>
    %428 = arith.extui %427 : vector<16x16xi1> to vector<16x16xi32>
    %429 = arith.sitofp %428 : vector<16x16xi32> to vector<16x16xf32>
    %cst_72 = arith.constant dense<0.000000e+00> : vector<16x6xf32>
    %430 = tpu.matmul %429, %423, %cst_72 {dimension_numbers = #tpu.dot_dimension_numbers<[1], [0], [0], [1], [0, 0, 1, 1], [], []>} : vector<16x16xf32>, vector<16x6xf32>, vector<16x6xf32> -> vector<16x6xf32>
    %431 = vector.broadcast %5 : vector<16x1xf32> to vector<16x6xf32>
    %432 = arith.mulf %431, %430 : vector<16x6xf32>
    %cst_73 = arith.constant dense<0.000000e+00> : vector<16x6xf32>
    %433 = tpu.matmul %429, %326, %cst_73 {dimension_numbers = #tpu.dot_dimension_numbers<[1], [0], [0], [1], [0, 0, 1, 1], [], []>} : vector<16x16xf32>, vector<16x6xf32>, vector<16x6xf32> -> vector<16x6xf32>
    %434 = vector.extract_strided_slice %322 {offsets = [0, 1], sizes = [16, 1], strides = [1, 1]} : vector<16x6xi32> to vector<16x1xi32>
    %435 = vector.broadcast %434 : vector<16x1xi32> to vector<16x16xi32>
    %436 = vector.broadcast %7 : vector<1x16xi32> to vector<16x16xi32>
    %437 = arith.cmpi eq, %435, %436 : vector<16x16xi32>
    %438 = arith.extui %437 : vector<16x16xi1> to vector<16x16xi32>
    %439 = arith.sitofp %438 : vector<16x16xi32> to vector<16x16xf32>
    %cst_74 = arith.constant dense<0.000000e+00> : vector<16x6xf32>
    %440 = tpu.matmul %439, %423, %cst_74 {dimension_numbers = #tpu.dot_dimension_numbers<[1], [0], [0], [1], [0, 0, 1, 1], [], []>} : vector<16x16xf32>, vector<16x6xf32>, vector<16x6xf32> -> vector<16x6xf32>
    %441 = vector.broadcast %5 : vector<16x1xf32> to vector<16x6xf32>
    %442 = arith.mulf %441, %440 : vector<16x6xf32>
    %cst_75 = arith.constant dense<0.000000e+00> : vector<16x6xf32>
    %443 = tpu.matmul %439, %326, %cst_75 {dimension_numbers = #tpu.dot_dimension_numbers<[1], [0], [0], [1], [0, 0, 1, 1], [], []>} : vector<16x16xf32>, vector<16x6xf32>, vector<16x6xf32> -> vector<16x6xf32>
    %444 = vector.extract_strided_slice %322 {offsets = [0, 2], sizes = [16, 1], strides = [1, 1]} : vector<16x6xi32> to vector<16x1xi32>
    %445 = vector.broadcast %444 : vector<16x1xi32> to vector<16x16xi32>
    %446 = vector.broadcast %7 : vector<1x16xi32> to vector<16x16xi32>
    %447 = arith.cmpi eq, %445, %446 : vector<16x16xi32>
    %448 = arith.extui %447 : vector<16x16xi1> to vector<16x16xi32>
    %449 = arith.sitofp %448 : vector<16x16xi32> to vector<16x16xf32>
    %cst_76 = arith.constant dense<0.000000e+00> : vector<16x6xf32>
    %450 = tpu.matmul %449, %423, %cst_76 {dimension_numbers = #tpu.dot_dimension_numbers<[1], [0], [0], [1], [0, 0, 1, 1], [], []>} : vector<16x16xf32>, vector<16x6xf32>, vector<16x6xf32> -> vector<16x6xf32>
    %451 = vector.broadcast %5 : vector<16x1xf32> to vector<16x6xf32>
    %452 = arith.mulf %451, %450 : vector<16x6xf32>
    %cst_77 = arith.constant dense<0.000000e+00> : vector<16x6xf32>
    %453 = tpu.matmul %449, %326, %cst_77 {dimension_numbers = #tpu.dot_dimension_numbers<[1], [0], [0], [1], [0, 0, 1, 1], [], []>} : vector<16x16xf32>, vector<16x6xf32>, vector<16x6xf32> -> vector<16x6xf32>
    %454 = vector.extract_strided_slice %322 {offsets = [0, 3], sizes = [16, 1], strides = [1, 1]} : vector<16x6xi32> to vector<16x1xi32>
    %455 = vector.broadcast %454 : vector<16x1xi32> to vector<16x16xi32>
    %456 = vector.broadcast %7 : vector<1x16xi32> to vector<16x16xi32>
    %457 = arith.cmpi eq, %455, %456 : vector<16x16xi32>
    %458 = arith.extui %457 : vector<16x16xi1> to vector<16x16xi32>
    %459 = arith.sitofp %458 : vector<16x16xi32> to vector<16x16xf32>
    %cst_78 = arith.constant dense<0.000000e+00> : vector<16x6xf32>
    %460 = tpu.matmul %459, %423, %cst_78 {dimension_numbers = #tpu.dot_dimension_numbers<[1], [0], [0], [1], [0, 0, 1, 1], [], []>} : vector<16x16xf32>, vector<16x6xf32>, vector<16x6xf32> -> vector<16x6xf32>
    %461 = vector.broadcast %5 : vector<16x1xf32> to vector<16x6xf32>
    %462 = arith.mulf %461, %460 : vector<16x6xf32>
    %cst_79 = arith.constant dense<0.000000e+00> : vector<16x6xf32>
    %463 = tpu.matmul %459, %326, %cst_79 {dimension_numbers = #tpu.dot_dimension_numbers<[1], [0], [0], [1], [0, 0, 1, 1], [], []>} : vector<16x16xf32>, vector<16x6xf32>, vector<16x6xf32> -> vector<16x6xf32>
    %464 = vector.extract_strided_slice %322 {offsets = [0, 4], sizes = [16, 1], strides = [1, 1]} : vector<16x6xi32> to vector<16x1xi32>
    %465 = vector.broadcast %464 : vector<16x1xi32> to vector<16x16xi32>
    %466 = vector.broadcast %7 : vector<1x16xi32> to vector<16x16xi32>
    %467 = arith.cmpi eq, %465, %466 : vector<16x16xi32>
    %468 = arith.extui %467 : vector<16x16xi1> to vector<16x16xi32>
    %469 = arith.sitofp %468 : vector<16x16xi32> to vector<16x16xf32>
    %cst_80 = arith.constant dense<0.000000e+00> : vector<16x6xf32>
    %470 = tpu.matmul %469, %423, %cst_80 {dimension_numbers = #tpu.dot_dimension_numbers<[1], [0], [0], [1], [0, 0, 1, 1], [], []>} : vector<16x16xf32>, vector<16x6xf32>, vector<16x6xf32> -> vector<16x6xf32>
    %471 = vector.broadcast %5 : vector<16x1xf32> to vector<16x6xf32>
    %472 = arith.mulf %471, %470 : vector<16x6xf32>
    %cst_81 = arith.constant dense<0.000000e+00> : vector<16x6xf32>
    %473 = tpu.matmul %469, %326, %cst_81 {dimension_numbers = #tpu.dot_dimension_numbers<[1], [0], [0], [1], [0, 0, 1, 1], [], []>} : vector<16x16xf32>, vector<16x6xf32>, vector<16x6xf32> -> vector<16x6xf32>
    %474 = vector.extract_strided_slice %322 {offsets = [0, 5], sizes = [16, 1], strides = [1, 1]} : vector<16x6xi32> to vector<16x1xi32>
    %475 = vector.broadcast %474 : vector<16x1xi32> to vector<16x16xi32>
    %476 = vector.broadcast %7 : vector<1x16xi32> to vector<16x16xi32>
    %477 = arith.cmpi eq, %475, %476 : vector<16x16xi32>
    %478 = arith.extui %477 : vector<16x16xi1> to vector<16x16xi32>
    %479 = arith.sitofp %478 : vector<16x16xi32> to vector<16x16xf32>
    %cst_82 = arith.constant dense<0.000000e+00> : vector<16x6xf32>
    %480 = tpu.matmul %479, %423, %cst_82 {dimension_numbers = #tpu.dot_dimension_numbers<[1], [0], [0], [1], [0, 0, 1, 1], [], []>} : vector<16x16xf32>, vector<16x6xf32>, vector<16x6xf32> -> vector<16x6xf32>
    %481 = vector.broadcast %5 : vector<16x1xf32> to vector<16x6xf32>
    %482 = arith.mulf %481, %480 : vector<16x6xf32>
    %cst_83 = arith.constant dense<0.000000e+00> : vector<16x6xf32>
    %483 = tpu.matmul %479, %326, %cst_83 {dimension_numbers = #tpu.dot_dimension_numbers<[1], [0], [0], [1], [0, 0, 1, 1], [], []>} : vector<16x16xf32>, vector<16x6xf32>, vector<16x6xf32> -> vector<16x6xf32>
    %484 = arith.minimumf %432, %442 : vector<16x6xf32>
    %485 = arith.minimumf %484, %452 : vector<16x6xf32>
    %486 = arith.minimumf %485, %462 : vector<16x6xf32>
    %487 = arith.minimumf %486, %472 : vector<16x6xf32>
    %488 = arith.minimumf %487, %482 : vector<16x6xf32>
    %489 = vector.shape_cast %488 : vector<16x6xf32> to vector<1x16x6xf32>
    %cst_84 = arith.constant dense<0x7F800000> : vector<1xf32>
    %490 = vector.multi_reduction <minimumf>, %489, %cst_84 [1, 2] : vector<1x16x6xf32> to vector<1xf32>
    %491 = vector.shape_cast %490 : vector<1xf32> to vector<1x1x1xf32>
    %492 = vector.extract %491[0, 0, 0] : f32 from vector<1x1x1xf32>
    %cst_85 = arith.constant 1.000000e+00 : f32
    %493 = arith.subf %492, %cst_85 : f32
    %494 = tpu.iota {dimensions = array<i32: 1>} : vector<16x128xi32>
    %c36_i32 = arith.constant 36 : i32
    %495 = vector.broadcast %c36_i32 : i32 to vector<16x128xi32>
    %496 = arith.cmpi slt, %494, %495 : vector<16x128xi32>
    %cst_86 = arith.constant 0.000000e+00 : f32
    %cst_87 = arith.constant -1.000000e+30 : f32
    %497 = vector.broadcast %cst_86 : f32 to vector<16x128xf32>
    %498 = vector.broadcast %cst_87 : f32 to vector<16x128xf32>
    %499 = arith.select %496, %497, %498 : vector<16x128xi1>, vector<16x128xf32>
    %500 = tpu.iota {dimensions = array<i32: 0>} : vector<6x128xi32>
    %501 = tpu.iota {dimensions = array<i32: 1>} : vector<6x128xi32>
    %cst_88 = arith.constant 5.000000e-01 : f32
    %502 = vector.broadcast %cst_88 : f32 to vector<16x6xf32>
    %503 = arith.cmpf ogt, %433, %502 : vector<16x6xf32>
    %504 = vector.broadcast %493 : f32 to vector<16x6xf32>
    %505 = arith.select %503, %504, %432 : vector<16x6xi1>, vector<16x6xf32>
    %c0_i32_89 = arith.constant 0 : i32
    %506 = vector.broadcast %c0_i32_89 : i32 to vector<6x128xi32>
    %507 = arith.subi %501, %506 : vector<6x128xi32>
    %508 = arith.cmpi eq, %507, %500 : vector<6x128xi32>
    %509 = arith.extui %508 : vector<6x128xi1> to vector<6x128xi32>
    %510 = arith.sitofp %509 : vector<6x128xi32> to vector<6x128xf32>
    %cst_90 = arith.constant dense<0.000000e+00> : vector<16x128xf32>
    %511 = tpu.matmul %505, %510, %cst_90 {dimension_numbers = #tpu.dot_dimension_numbers<[1], [0], [0], [1], [0, 0, 1, 1], [], []>} : vector<16x6xf32>, vector<6x128xf32>, vector<16x128xf32> -> vector<16x128xf32>
    %512 = arith.addf %499, %511 : vector<16x128xf32>
    %cst_91 = arith.constant 5.000000e-01 : f32
    %513 = vector.broadcast %cst_91 : f32 to vector<16x6xf32>
    %514 = arith.cmpf ogt, %443, %513 : vector<16x6xf32>
    %515 = vector.broadcast %493 : f32 to vector<16x6xf32>
    %516 = arith.select %514, %515, %442 : vector<16x6xi1>, vector<16x6xf32>
    %c6_i32 = arith.constant 6 : i32
    %517 = vector.broadcast %c6_i32 : i32 to vector<6x128xi32>
    %518 = arith.subi %501, %517 : vector<6x128xi32>
    %519 = arith.cmpi eq, %518, %500 : vector<6x128xi32>
    %520 = arith.extui %519 : vector<6x128xi1> to vector<6x128xi32>
    %521 = arith.sitofp %520 : vector<6x128xi32> to vector<6x128xf32>
    %cst_92 = arith.constant dense<0.000000e+00> : vector<16x128xf32>
    %522 = tpu.matmul %516, %521, %cst_92 {dimension_numbers = #tpu.dot_dimension_numbers<[1], [0], [0], [1], [0, 0, 1, 1], [], []>} : vector<16x6xf32>, vector<6x128xf32>, vector<16x128xf32> -> vector<16x128xf32>
    %523 = arith.addf %512, %522 : vector<16x128xf32>
    %cst_93 = arith.constant 5.000000e-01 : f32
    %524 = vector.broadcast %cst_93 : f32 to vector<16x6xf32>
    %525 = arith.cmpf ogt, %453, %524 : vector<16x6xf32>
    %526 = vector.broadcast %493 : f32 to vector<16x6xf32>
    %527 = arith.select %525, %526, %452 : vector<16x6xi1>, vector<16x6xf32>
    %c12_i32 = arith.constant 12 : i32
    %528 = vector.broadcast %c12_i32 : i32 to vector<6x128xi32>
    %529 = arith.subi %501, %528 : vector<6x128xi32>
    %530 = arith.cmpi eq, %529, %500 : vector<6x128xi32>
    %531 = arith.extui %530 : vector<6x128xi1> to vector<6x128xi32>
    %532 = arith.sitofp %531 : vector<6x128xi32> to vector<6x128xf32>
    %cst_94 = arith.constant dense<0.000000e+00> : vector<16x128xf32>
    %533 = tpu.matmul %527, %532, %cst_94 {dimension_numbers = #tpu.dot_dimension_numbers<[1], [0], [0], [1], [0, 0, 1, 1], [], []>} : vector<16x6xf32>, vector<6x128xf32>, vector<16x128xf32> -> vector<16x128xf32>
    %534 = arith.addf %523, %533 : vector<16x128xf32>
    %cst_95 = arith.constant 5.000000e-01 : f32
    %535 = vector.broadcast %cst_95 : f32 to vector<16x6xf32>
    %536 = arith.cmpf ogt, %463, %535 : vector<16x6xf32>
    %537 = vector.broadcast %493 : f32 to vector<16x6xf32>
    %538 = arith.select %536, %537, %462 : vector<16x6xi1>, vector<16x6xf32>
    %c18_i32 = arith.constant 18 : i32
    %539 = vector.broadcast %c18_i32 : i32 to vector<6x128xi32>
    %540 = arith.subi %501, %539 : vector<6x128xi32>
    %541 = arith.cmpi eq, %540, %500 : vector<6x128xi32>
    %542 = arith.extui %541 : vector<6x128xi1> to vector<6x128xi32>
    %543 = arith.sitofp %542 : vector<6x128xi32> to vector<6x128xf32>
    %cst_96 = arith.constant dense<0.000000e+00> : vector<16x128xf32>
    %544 = tpu.matmul %538, %543, %cst_96 {dimension_numbers = #tpu.dot_dimension_numbers<[1], [0], [0], [1], [0, 0, 1, 1], [], []>} : vector<16x6xf32>, vector<6x128xf32>, vector<16x128xf32> -> vector<16x128xf32>
    %545 = arith.addf %534, %544 : vector<16x128xf32>
    %cst_97 = arith.constant 5.000000e-01 : f32
    %546 = vector.broadcast %cst_97 : f32 to vector<16x6xf32>
    %547 = arith.cmpf ogt, %473, %546 : vector<16x6xf32>
    %548 = vector.broadcast %493 : f32 to vector<16x6xf32>
    %549 = arith.select %547, %548, %472 : vector<16x6xi1>, vector<16x6xf32>
    %c24_i32 = arith.constant 24 : i32
    %550 = vector.broadcast %c24_i32 : i32 to vector<6x128xi32>
    %551 = arith.subi %501, %550 : vector<6x128xi32>
    %552 = arith.cmpi eq, %551, %500 : vector<6x128xi32>
    %553 = arith.extui %552 : vector<6x128xi1> to vector<6x128xi32>
    %554 = arith.sitofp %553 : vector<6x128xi32> to vector<6x128xf32>
    %cst_98 = arith.constant dense<0.000000e+00> : vector<16x128xf32>
    %555 = tpu.matmul %549, %554, %cst_98 {dimension_numbers = #tpu.dot_dimension_numbers<[1], [0], [0], [1], [0, 0, 1, 1], [], []>} : vector<16x6xf32>, vector<6x128xf32>, vector<16x128xf32> -> vector<16x128xf32>
    %556 = arith.addf %545, %555 : vector<16x128xf32>
    %cst_99 = arith.constant 5.000000e-01 : f32
    %557 = vector.broadcast %cst_99 : f32 to vector<16x6xf32>
    %558 = arith.cmpf ogt, %483, %557 : vector<16x6xf32>
    %559 = vector.broadcast %493 : f32 to vector<16x6xf32>
    %560 = arith.select %558, %559, %482 : vector<16x6xi1>, vector<16x6xf32>
    %c30_i32 = arith.constant 30 : i32
    %561 = vector.broadcast %c30_i32 : i32 to vector<6x128xi32>
    %562 = arith.subi %501, %561 : vector<6x128xi32>
    %563 = arith.cmpi eq, %562, %500 : vector<6x128xi32>
    %564 = arith.extui %563 : vector<6x128xi1> to vector<6x128xi32>
    %565 = arith.sitofp %564 : vector<6x128xi32> to vector<6x128xf32>
    %cst_100 = arith.constant dense<0.000000e+00> : vector<16x128xf32>
    %566 = tpu.matmul %560, %565, %cst_100 {dimension_numbers = #tpu.dot_dimension_numbers<[1], [0], [0], [1], [0, 0, 1, 1], [], []>} : vector<16x6xf32>, vector<6x128xf32>, vector<16x128xf32> -> vector<16x128xf32>
    %567 = arith.addf %556, %566 : vector<16x128xf32>
    %c0_101 = arith.constant 0 : index
    %c0_102 = arith.constant 0 : index
    %c0_103 = arith.constant 0 : index
    %568 = vector.load %arg7[%c0_101, %c0_102, %c0_103] : memref<1x16x128xf32, #tpu.memory_space<vmem>>, vector<1x16x128xf32>
    %569 = vector.shape_cast %568 : vector<1x16x128xf32> to vector<16x128xf32>
    %570 = vector.shape_cast %567 : vector<16x128xf32> to vector<1x16x128xf32>
    tpu.vector_store %arg7[%c0_101, %c0_102, %c0_103], %570 {strides = array<i32>} : memref<1x16x128xf32, #tpu.memory_space<vmem>>, vector<1x16x128xf32>,
    return
  }
  func.func @transform_0(%arg0: i32) -> (i32, i32, i32) {
    %c0_i32 = arith.constant 0 : i32
    %c0_i32_0 = arith.constant 0 : i32
    %c0_i32_1 = arith.constant 0 : i32
    return %arg0, %c0_i32, %c0_i32_0 : i32, i32, i32
  }
  func.func @transform_1(%arg0: i32) -> (i32, i32, i32) {
    %c0_i32 = arith.constant 0 : i32
    %c0_i32_0 = arith.constant 0 : i32
    %c0_i32_1 = arith.constant 0 : i32
    return %arg0, %c0_i32, %c0_i32_0 : i32, i32, i32
  }
  func.func @transform_2(%arg0: i32) -> (i32, i32, i32, i32) {
    %c0_i32 = arith.constant 0 : i32
    %c0_i32_0 = arith.constant 0 : i32
    %c0_i32_1 = arith.constant 0 : i32
    %c0_i32_2 = arith.constant 0 : i32
    return %arg0, %c0_i32, %c0_i32_0, %c0_i32_1 : i32, i32, i32, i32
  }
  func.func @transform_3(%arg0: i32) -> (i32, i32, i32) {
    %c0_i32 = arith.constant 0 : i32
    %c0_i32_0 = arith.constant 0 : i32
    %c0_i32_1 = arith.constant 0 : i32
    return %arg0, %c0_i32, %c0_i32_0 : i32, i32, i32
  }
  func.func @transform_4(%arg0: i32) -> (i32, i32, i32) {
    %c0_i32 = arith.constant 0 : i32
    %c0_i32_0 = arith.constant 0 : i32
    %c0_i32_1 = arith.constant 0 : i32
    return %arg0, %c0_i32, %c0_i32_0 : i32, i32, i32
  }
  func.func @transform_5(%arg0: i32) -> (i32, i32, i32) {
    %c0_i32 = arith.constant 0 : i32
    %c0_i32_0 = arith.constant 0 : i32
    %c0_i32_1 = arith.constant 0 : i32
    return %arg0, %c0_i32, %c0_i32_0 : i32, i32, i32
  }
  func.func @transform_6(%arg0: i32) -> (i32, i32, i32) {
    %c0_i32 = arith.constant 0 : i32
    %c0_i32_0 = arith.constant 0 : i32
    %c0_i32_1 = arith.constant 0 : i32
    return %arg0, %c0_i32, %c0_i32_0 : i32, i32, i32
  }
}

module attributes {stable_mosaic.version = 11 : i64} {
  func.func @_headsum_logsoftmax_kernel(%arg0: i32, %arg1: memref<2x16x128xf32, #tpu.memory_space<vmem>>, %arg2: memref<16x128xf32, #tpu.memory_space<vmem>>) attributes {dimension_semantics = [#tpu.dimension_semantics<arbitrary>], iteration_bounds = array<i64: 1>, scalar_prefetch = 0 : i64, scratch_operands = 0 : i64, tpu.core_type = #tpu.core_type<tc>, window_params = [{pipeline_mode = #tpu.pipeline_mode<synchronous>, transform_indices = @transform_0, window_bounds = array<i64: 2, 16, 128>}, {pipeline_mode = #tpu.pipeline_mode<synchronous>, transform_indices = @transform_1, window_bounds = array<i64: 16, 128>}]} {
    %c0 = arith.constant 0 : index
    %c0_0 = arith.constant 0 : index
    %c0_1 = arith.constant 0 : index
    %0 = vector.load %arg1[%c0, %c0_0, %c0_1] : memref<2x16x128xf32, #tpu.memory_space<vmem>>, vector<2x16x128xf32>
    %cst = arith.constant dense<0.000000e+00> : vector<16x128xf32>
    %1 = vector.multi_reduction <add>, %0, %cst [0] : vector<2x16x128xf32> to vector<16x128xf32>
    %2 = tpu.iota {dimensions = array<i32: 1>} : vector<16x128xi32>
    %c8_i32 = arith.constant 8 : i32
    %3 = vector.broadcast %c8_i32 : i32 to vector<16x128xi32>
    %4 = arith.cmpi slt, %2, %3 : vector<16x128xi32>
    %cst_2 = arith.constant -1.000000e+30 : f32
    %5 = vector.broadcast %cst_2 : f32 to vector<16x128xf32>
    %6 = arith.select %4, %1, %5 : vector<16x128xi1>, vector<16x128xf32>
    %cst_3 = arith.constant dense<0xFF800000> : vector<16xf32>
    %7 = vector.multi_reduction <maximumf>, %6, %cst_3 [1] : vector<16x128xf32> to vector<16xf32>
    %8 = vector.shape_cast %7 : vector<16xf32> to vector<16x1xf32>
    %9 = vector.broadcast %8 : vector<16x1xf32> to vector<16x128xf32>
    %10 = arith.subf %6, %9 : vector<16x128xf32>
    %11 = math.exp %10 : vector<16x128xf32>
    %cst_4 = arith.constant 0.000000e+00 : f32
    %12 = vector.broadcast %cst_4 : f32 to vector<16x128xf32>
    %13 = arith.select %4, %11, %12 : vector<16x128xi1>, vector<16x128xf32>
    %cst_5 = arith.constant dense<0.000000e+00> : vector<16xf32>
    %14 = vector.multi_reduction <add>, %13, %cst_5 [1] : vector<16x128xf32> to vector<16xf32>
    %15 = vector.shape_cast %14 : vector<16xf32> to vector<16x1xf32>
    %16 = math.log %15 : vector<16x1xf32>
    %17 = vector.broadcast %16 : vector<16x1xf32> to vector<16x128xf32>
    %18 = arith.subf %10, %17 : vector<16x128xf32>
    %c0_6 = arith.constant 0 : index
    %c0_7 = arith.constant 0 : index
    %19 = vector.load %arg2[%c0_6, %c0_7] : memref<16x128xf32, #tpu.memory_space<vmem>>, vector<16x128xf32>
    tpu.vector_store %arg2[%c0_6, %c0_7], %18 {strides = array<i32>} : memref<16x128xf32, #tpu.memory_space<vmem>>, vector<16x128xf32>,
    return
  }
  func.func @transform_0(%arg0: i32) -> (i32, i32, i32) {
    %c0_i32 = arith.constant 0 : i32
    %c0_i32_0 = arith.constant 0 : i32
    %c0_i32_1 = arith.constant 0 : i32
    %c0_i32_2 = arith.constant 0 : i32
    return %c0_i32, %c0_i32_0, %c0_i32_1 : i32, i32, i32
  }
  func.func @transform_1(%arg0: i32) -> (i32, i32) {
    %c0_i32 = arith.constant 0 : i32
    %c0_i32_0 = arith.constant 0 : i32
    %c0_i32_1 = arith.constant 0 : i32
    return %c0_i32, %c0_i32_0 : i32, i32
  }
}

</mosaic_0001>

<bundles_post_ra>
// kernel: _lambda_.5
= control target key start
LH: loop header
LB: loop body
LE: loop exit
PB: predicated region body
PF: predicated region fallthrough
CT: control target
= control target key end

     0   :  { %v14_v0 = vlaneseq  ;;  %s87_s0 = inlined_call_operand.vmem [shape: f32[2,16,128], index: 0, kind: input, shape index: {}]   ;;  %s88_s1 = inlined_call_operand.vmem [shape: f32[16,128], index: 1, kind: output, shape index: {}]  }
   0x1   :  { %v8_v1 = vld [vmem:[%s87_s0] sm:$0xff]  ;;  %v10_v2 = vld [vmem:[%s87_s0 + $0x10] sm:$0xff]  ;;  %v9_v3 = vld [vmem:[%s87_s0 + $0x8] sm:$0xff] }
   0x2   :  { %v12_v4 = vadd.f32 %v10_v2, %v8_v1  ;;  %v15_v5 = vand.u32 127, %v14_v0  ;;  %v11_v6 = vld [vmem:[%s87_s0 + $0x18] sm:$0xff] }
   0x3   :  { %v13_v7 = vadd.f32 %v11_v6, %v9_v3 }
   0x4   :  { %vm16_vm0 = vcmp.lt.s32.totalorder %v15_v5, 8 }
   0x5   :  { %v17_v8 = vsel %vm16_vm0, %v12_v4, -1e+30  ;;  %v18_v9 = vsel %vm16_vm0, %v13_v7, -1e+30 }
   0x6   :  { %19 = vmax.xlane.f32.xlu0 %v17_v8 }
   0xa   :  { %21 = vmax.xlane.f32.xlu0 %v18_v9 }
  0x93   :  { %v20_v10 = vpop.xlane.xlu0 %19 }
  0x94   :  { %v23_v11 = vsub.f32 %v17_v8, %v20_v10 }
  0x96   :  { %v25_v12 = vmul.f32 1.442695, %v23_v11 }
  0x97   :  { %v22_v13 = vpop.xlane.xlu0 %21 }
  0x98   :  { %47 = vpow2.f32 %v25_v12  ;;  %v24_v14 = vsub.f32 %v18_v9, %v22_v13 }
  0x9a   :  { %v27_v15 = vmul.f32 1.442695, %v24_v14 }
  0x9c   :  { %49 = vpow2.f32 %v27_v15 }
  0xa2   :  { %v48_v16 = vpop.eup %47 }
  0xa3   :  { %v29_v17 = vsel %vm16_vm0, %v48_v16, 0.0 }
  0xa4   :  { %31 = vadd.xlane.f32.xlu1 %v29_v17 }
  0xa6   :  { %v50_v18 = vpop.eup %49 }
  0xa7   :  { %v30_v19 = vsel %vm16_vm0, %v50_v18, 0.0 }
  0xa8   :  { %33 = vadd.xlane.f32.xlu1 %v30_v19 }
 0x131   :  { %v32_v20 = vpop.xlane.xlu1 %31 }
 0x132   :  { %51 = vlog2.f32 %v32_v20 }
 0x135   :  { %v34_v21 = vpop.xlane.xlu1 %33 }
 0x136   :  { %53 = vlog2.f32 %v34_v21 }
 0x13c   :  { %v52_v22 = vpop.eup %51 }
 0x13d   :  { %v36_v23 = vmul.f32 0.6931472, %v52_v22 }
 0x13f   :  { %v39_v24 = vsub.f32 %v23_v11, %v36_v23 }
 0x140   :  { %v54_v25 = vpop.eup %53 }
 0x141   :  { %41 = vst [vmem:[%s88_s1] sm:$0xff] %v39_v24  ;;  %v38_v26 = vmul.f32 0.6931472, %v54_v25 }
 0x143   :  { %v40_v27 = vsub.f32 %v24_v14, %v38_v26 }
 0x145   :  { %42 = vst [vmem:[%s88_s1 + $0x8] sm:$0xff] %v40_v27 }

// kernel: _lambda_.3
= control target key start
LH: loop header
LB: loop body
LE: loop exit
PB: predicated region body
PF: predicated region fallthrough
CT: control target
= control target key end

     0   :  { %s4121_s21 = smov 0   ;;  %s4744_s0 = inlined_call_operand.vmem [shape: f32[1,16,16], index: 0, kind: input, shape index: {}]   ;;  %s4745_s1 = inlined_call_operand.vmem [shape: f32[2,16,256], index: 1, kind: input, shape index: {}]   ;;  %s4746_s2 = inlined_call_operand.vmem [shape: s32[2,1,16,6], index: 2, kind: input, shape index: {}]   ;;  %s4747_s3 = inlined_call_operand.vmem [shape: f32[2,1,128], index: 3, kind: input, shape index: {}]   ;;  %s4748_s4 = inlined_call_operand.vmem [shape: f32[2,1,128], index: 4, kind: input, shape index: {}]   ;;  %s4749_s5 = inlined_call_operand.vmem [shape: f32[2,16,128], index: 5, kind: output, shape index: {0}]   ;;  %s4750_s6 = inlined_call_operand.vmem [shape: f32[2,16,128], index: 6, kind: output, shape index: {1}]  }
   0x1 LB: > { %s3502_s22 = sadd.s32 4294967295, %s4075_s21   ;;  %p3506_p0 = scmp.ge.s32.totalorder %s4075_s21, 1  ;;  %s4075_s21 = sphi %s4121_s21, %s17_s21  }
   0x2   : > { %p241_p1 = scmp.lt.s32.totalorder %s4075_s21, 3 }
   0x4   : > { %p242_p2 = pnand %p3506_p0, %p241_p1 }
   0x6   : > { %245 = sbr.rel (%p242_p2) target bundleno = 1376 (0x560), region = 40 }
   0xd   : > { %p287_p3 = scmp.lt.s32.totalorder %s3502_s22, 1  ;;  %v4761_v0 = vmov 0.0   ;;  %v4756_v1 = vmov 1   ;;  %v4079_v2 = vmov 0   ;;  %v313_v11 = vld [vmem:[%s4744_s0] sm:$0xff]  ;;  %vm319_vm0 = vcmask 130048  }
   0xe   : > { %390 = vmatprep.mubr.f32.mxu1 %v4761_v0  ;;  %4030 = vset.pattern.permute.xlu1 %v4756_v1  ;;  %v4753_v12 = vmov 2   ;;  %v314_v13 = vld [vmem:[%s4744_s0 + $0x8] sm:$0xff]  ;;  %v4752_v14 = vmov 3   ;;  %v4754_v15 = vmov 4   ;;  %v4751_v16 = vmov 5  }
   0xf   : > { %s4779_s22 = smov (!%p287_p3, %s3502_s22), 1  ;;  %4029 = vset.pattern.permute.xlu0 %v4079_v2  ;;  %601 = vmatprep.mubr.f32.mxu0 %v4761_v0  ;;  %v4758_v31 = vlaneseq }
  0x10   : > { %s3644_s23 = sshll.u32 %s4779_s22, 5  ;;  %s4137_s24 = sshll.u32 %s4779_s22, 4 }
  0x11   : > { %s291_s27 = scalar_lea.vmem %s4745_s1, %s3644_s23  ;;  %s296_s30 = scalar_lea.vmem %s4746_s2, %s4137_s24  ;;  %v4226_v37 = vand.u32 127, %v4758_v31 }
  0x12   : > { %v316_v3 = vld [vmem:[%s291_s27 + $0x8] sm:$0xff]  ;;  %v318_v4 = vld [vmem:[%s291_s27 + $0x18] sm:$0xff]  ;;  %v315_v5 = vld [vmem:[%s291_s27] sm:$0xff]  ;;  %s312_s17 = scalar_lea.vmem %s4750_s6, %s4137_s24  ;;  %s299_s20 = scalar_lea.vmem %s4747_s3, %s4779_s22 }
  0x13   : > { %v3894_v6 = vpack.c.bf16 %v318_v4, %v316_v3  ;;  %v317_v7 = vld [vmem:[%s291_s27 + $0x10] sm:$0xff]  ;;  %v4146_v8 = vld [vmem:[%s296_s30 + $0x8] sm:$0xff]  ;;  %v4148_v9 = vld [vmem:[%s296_s30] sm:$0xff]  ;;  %s302_s26 = scalar_lea.vmem %s4748_s4, %s4779_s22  ;;  %s307_s29 = scalar_lea.vmem %s4749_s5, %s4137_s24 }
  0x14   : > { %v3896_v10 = vpack.c.bf16 %v317_v7, %v315_v5  ;;  %523 = vperm.xlu1 %4030, %v4146_v8   ;;  %408 = vperm.xlu0 %4029, %v4148_v9  }
  0x15   : > { %3895 = vmatprep.subr.bf16.mxu1 %v3894_v6 }
  0x16   : > { %3897 = vmatpush1.bf16.msra.mxu1 %v3896_v10 }
  0x18   : > { %4031 = vset.pattern.permute.xlu1 %v4753_v12  ;;  %411 = vperm.xlu0 %4029, %v4146_v8  }
  0x19   : > { %3515 = vmatmul.mubr.msk.f32.vlgmr.msra.gmra.mrb[0].mxu1 %vm319_vm0, %v313_v11  ;;  %632 = vperm.xlu1 %4031, %v4148_v9  }
  0x1a   : > { %396 = vmatprep.mubr.f32.mxu1 %v4761_v0 }
  0x1c   : > { %4032 = vset.pattern.permute.xlu0 %v4756_v1 }
  0x1d   : > { %3516 = vmatmul.mubr.msk.f32.gmra.mrb[2].mxu1 %vm319_vm0, %v314_v13  ;;  %635 = vperm.xlu1 %4031, %v4146_v8  }
  0x1e   : > { %520 = vperm.xlu0 %4032, %v4148_v9   ;;  %489 = vmatprep.mubr.f32.mxu1 %v4761_v0 }
  0x21   : > { %4033 = vset.pattern.permute.xlu1 %v4752_v14 }
  0x22   : > { %744 = vperm.xlu1 %4033, %v4148_v9   ;;  %4034 = vset.pattern.permute.xlu0 %v4754_v15 }
  0x23   : > { %856 = vperm.xlu0 %4034, %v4148_v9  }
  0x26   : > { %747 = vperm.xlu1 %4033, %v4146_v8  }
  0x27   : > { %4036 = vset.pattern.permute.xlu0 %v4751_v16 }
  0x28   : > { %968 = vperm.xlu0 %4036, %v4148_v9  }
  0x2a   : > { %4035 = vset.pattern.permute.xlu1 %v4754_v15 }
  0x2b   : > { %859 = vperm.xlu1 %4035, %v4146_v8  }
  0x2c   : > { %971 = vperm.xlu0 %4036, %v4146_v8  }
  0x2f   : > { %4037 = vset.pattern.permute.xlu1 %v4079_v2 }
  0x30   : > { %1237 = vperm.xlu1 %4037, %v4148_v9   ;;  %4039 = vset.pattern.permute.xlu0 %v4756_v1 }
  0x31   : > { %1347 = vperm.xlu0 %4039, %v4146_v8  }
  0x34   : > { %1240 = vperm.xlu1 %4037, %v4146_v8  }
  0x35   : > { %4041 = vset.pattern.permute.xlu0 %v4752_v14 }
  0x36   : > { %1558 = vperm.xlu0 %4041, %v4148_v9  }
  0x38   : > { %4038 = vset.pattern.permute.xlu1 %v4756_v1 }
  0x39   : > { %1344 = vperm.xlu1 %4038, %v4148_v9  }
  0x3a   : > { %4044 = vset.pattern.permute.xlu0 %v4754_v15 }
  0x3b   : > { %1668 = vperm.xlu0 %4044, %v4146_v8  }
  0x3d   : > { %4040 = vset.pattern.permute.xlu1 %v4753_v12 }
  0x3e   : > { %1451 = vperm.xlu1 %4040, %v4148_v9  }
  0x3f   : > { %4046 = vset.pattern.permute.xlu0 %v4756_v1 }
  0x42   : > { %1454 = vperm.xlu1 %4040, %v4146_v8  }
  0x46   : > { %4042 = vset.pattern.permute.xlu1 %v4752_v14 }
  0x47   : > { %1561 = vperm.xlu1 %4042, %v4146_v8  }
  0x4b   : > { %4043 = vset.pattern.permute.xlu1 %v4754_v15 }
  0x4c   : > { %1665 = vperm.xlu1 %4043, %v4148_v9  }
  0x50   : > { %4045 = vset.pattern.permute.xlu1 %v4751_v16 }
  0x51   : > { %1772 = vperm.xlu1 %4045, %v4148_v9  }
  0x55   : > { %1775 = vperm.xlu1 %4045, %v4146_v8  }
  0x59   : > { %4047 = vset.pattern.permute.xlu1 %v4756_v1 }
  0x93   : > { %v524_v17 = vpop.permute.xlu1 %523  ;;  %v409_v21 = vpop.permute.xlu0 %408 }
  0x94   : > { %vm413_vm1 = vcmp.eq.s32.totalorder %v409_v21, %v4226_v37  ;;  %vm526_vm5 = vcmp.eq.s32.totalorder %v524_v17, %v4226_v37 }
  0x95   : > { %v3517_v40 = vsel %vm413_vm1, 1.0, %v4761_v0  ;;  %v3523_v47 = vsel %vm526_vm5, 1.0, %v4761_v0 }
  0x97   : > { %v412_v24 = vpop.permute.xlu0 %411 }
  0x98   : > { %v4201_v18 = vpop.permute.xlu1 %632  ;;  %vm414_vm4 = vcmp.eq.s32.totalorder %v412_v24, %v4226_v37 }
  0x99   : > { %v3518_v44 = vsel %vm414_vm4, 1.0, %v4761_v0  ;;  %vm637_vm7 = vcmp.eq.s32.totalorder %v4201_v18, %v4226_v37  ;;  %v4084_v18 = vmov 1.0|1.0  }
  0x9a   : > { %v3527_v51 = vsel %vm637_vm7, 1.0, %v4761_v0 }
  0x9c   : > { %v4203_v19 = vpop.permute.xlu1 %635 }
  0x9d   : > { %v521_v25 = vpop.permute.xlu0 %520  ;;  %vm638_vm9 = vcmp.eq.s32.totalorder %v4203_v19, %v4226_v37 }
  0x9e   : > { %vm525_vm2 = vcmp.eq.s32.totalorder %v521_v25, %v4226_v37  ;;  %v3528_v54 = vsel %vm638_vm9, 1.0, %v4761_v0  ;;  %vm1231_vm9 = vcmp.eq.s32.totalorder %v4146_v8, 15 }
  0x9f   : > { %v3522_v41 = vsel %vm525_vm2, 1.0, %v4761_v0 }
  0xa1   : > { %v745_v20 = vpop.permute.xlu1 %744 }
  0xa2   : > { %v4209_v27 = vpop.permute.xlu0 %856  ;;  %vm749_vm3 = vcmp.eq.s32.totalorder %v745_v20, %v4226_v37 }
  0xa3   : > { %v3532_v43 = vsel %vm749_vm3, 1.0, %v4761_v0  ;;  %vm861_vm12 = vcmp.eq.s32.totalorder %v4209_v27, %v4226_v37 }
  0xa4   : > { %v3537_v58 = vsel %vm861_vm12, 1.0, %v4761_v0 }
  0xa5   : > { %v748_v22 = vpop.permute.xlu1 %747 }
  0xa6   : > { %vm750_vm6 = vcmp.eq.s32.totalorder %v748_v22, %v4226_v37 }
  0xa7   : > { %v969_v36 = vpop.permute.xlu0 %968  ;;  %v3533_v48 = vsel %vm750_vm6, 1.0, %v4761_v0 }
  0xa8   : > { %vm973_vm8 = vcmp.eq.s32.totalorder %v969_v36, %v4226_v37 }
  0xa9   : > { %v3542_v52 = vsel %vm973_vm8, 1.0, %v4761_v0  ;;  %vm1230_vm8 = vcmp.eq.s32.totalorder %v4148_v9, 15 }
  0xaa   : > { %v4205_v23 = vpop.permute.xlu1 %859 }
  0xab   : > { %v972_v42 = vpop.permute.xlu0 %971  ;;  %vm862_vm1 = vcmp.eq.s32.totalorder %v4205_v23, %v4226_v37 }
  0xac   : > { %vm974_vm10 = vcmp.eq.s32.totalorder %v972_v42, %v4226_v37  ;;  %v3538_v62 = vsel %vm862_vm1, 1.0, %v4761_v0  ;;  %vm838_vm1 = vcmp.eq.s32.totalorder %v4226_v37, 3 }
  0xad   : > { %v3543_v55 = vsel %vm974_vm10, 1.0, %v4761_v0 }
  0xaf   : > { %v4207_v26 = vpop.permute.xlu1 %1237 }
  0xb0   : > { %v4250_v45 = vpop.permute.xlu0 %1347  ;;  %vm1242_vm2 = vcmp.eq.s32.totalorder %v4207_v26, %v4226_v37 }
  0xb1   : > { %v3552_v63 = vsel %vm1242_vm2, 1.0, %v4761_v0  ;;  %vm1350_vm5 = vcmp.eq.s32.totalorder %v4250_v45, %v4226_v37  ;;  %vm950_vm2 = vcmp.eq.s32.totalorder %v4226_v37, 4 }
  0xb2   : > { %v4352_v6 = vsel %vm1350_vm5, 1.0, %v4761_v0  ;;  %v4517_v15 = vsel %vm950_vm2, 1.0, %v4761_v0  ;;  %vm1105_vm5 = vcmp.ne.s32.totalorder %v4148_v9, 15 }
  0xb3   : > { %v4213_v29 = vpop.permute.xlu1 %1240 }
  0xb4   : > { %vm1243_vm3 = vcmp.eq.s32.totalorder %v4213_v29, %v4226_v37 }
  0xb5   : > { %v4269_v50 = vpop.permute.xlu0 %1558  ;;  %v4336_v3 = vsel %vm1243_vm3, 1.0, %v4761_v0  ;;  %vm1062_vm3 = vcmp.eq.s32.totalorder %v4226_v37, 5 }
  0xb6   : > { %vm1563_vm6 = vcmp.eq.s32.totalorder %v4269_v50, %v4226_v37 }
  0xb7   : > { %v4360_v7 = vsel %vm1563_vm6, 1.0, %v4761_v0 }
  0xb8   : > { %v4219_v33 = vpop.permute.xlu1 %1344 }
  0xb9   : > { %vm1349_vm4 = vcmp.eq.s32.totalorder %v4219_v33, %v4226_v37 }
  0xba   : > { %v1669_v56 = vpop.permute.xlu0 %1668  ;;  %v4339_v5 = vsel %vm1349_vm4, 1.0, %v4761_v0  ;;  %vm1091_vm4 = vcmask 48128  }
  0xbb   : > { %vm1671_vm15 = vcmp.eq.s32.totalorder %v1669_v56, %v4226_v37 }
  0xbc   : > { %v4318_v61 = vsel %vm1671_vm15, 1.0, %v4761_v0  ;;  %vm726_vm15 = vcmp.eq.s32.totalorder %v4226_v37, 2 }
  0xbd   : > { %v1452_v39 = vpop.permute.xlu1 %1451 }
  0xbe   : > { %vm1456_vm11 = vcmp.eq.s32.totalorder %v1452_v39, %v4226_v37 }
  0xbf   : > { %v4291_v57 = vsel %vm1456_vm11, 1.0, %v4761_v0  ;;  %vm4371_vm11 = vmpackc.low %vm1231_vm9, %vm1230_vm8 }
  0xc1   : > { %v1455_v46 = vpop.permute.xlu1 %1454 }
  0xc2   : > { %vm1457_vm13 = vcmp.eq.s32.totalorder %v1455_v46, %v4226_v37 }
  0xc3   : > { %v4303_v59 = vsel %vm1457_vm13, 1.0, %v4761_v0  ;;  %vm502_vm13 = vcmp.eq.s32.totalorder %v4226_v37, 0 }
  0xc6   : > { %v4266_v49 = vpop.permute.xlu1 %1561 }
  0xc7   : > { %vm1564_vm10 = vcmp.eq.s32.totalorder %v4266_v49, %v4226_v37 }
  0xc8   : > { %v4376_v17 = vsel %vm1564_vm10, 1.0, %v4761_v0 }
  0xcb   : > { %v1666_v53 = vpop.permute.xlu1 %1665 }
  0xcc   : > { %vm1670_vm14 = vcmp.eq.s32.totalorder %v1666_v53, %v4226_v37 }
  0xcd   : > { %v4308_v60 = vsel %vm1670_vm14, 1.0, %v4761_v0  ;;  %vm614_vm14 = vcmp.eq.s32.totalorder %v4226_v37, 1 }
  0xd0   : > { %v1773_v4 = vpop.permute.xlu1 %1772 }
  0xd1   : > { %vm1777_vm7 = vcmp.eq.s32.totalorder %v1773_v4, %v4226_v37 }
  0xd2   : > { %v4368_v11 = vsel %vm1777_vm7, 1.0, %v4761_v0  ;;  %vm2831_vm7 = vcmask 1045504  }
  0xd4   : > { %v1776_v10 = vpop.permute.xlu1 %1775 }
  0xd5   : > { %vm1778_vm12 = vcmp.eq.s32.totalorder %v1776_v10, %v4226_v37 }
  0xd6   : > { %v4387_v19 = vsel %vm1778_vm12, 1.0, %v4761_v0 }
  0xec   : > { %v4211_v28 = vpop.f32.mrb[0].mxu1 }
  0xed   : > { %4763 = vst [vmem:[#allocation2_spill] sm:$0xff] %v4211_v28  ;;  %v4215_v30 = vpop.f32.mrb[1].mxu1 }
  0xf0   : > { %v4217_v32 = vpop.f32.mrb[2].mxu1 }
  0xf1   : > { %4764 = vst [vmem:[#allocation3_spill] sm:$0xff] %v4217_v32  ;;  %v3900_v34 = vpack.c.bf16 %v4217_v32, %v4211_v28  ;;  %v4223_v35 = vpop.f32.mrb[3].mxu1  ;;  %v4522_v32 = vsel %vm1062_vm3, 1.0, %v4761_v0 }
  0xf2   : > { %v4230_v38 = vpack.c.bf16 %v4223_v35, %v4215_v30 }
  0xf4   : > { %3899 = vmatprep.subr.bf16.mxu1 %v4230_v38  ;;  %3903 = vmatprep.subr.bf16.mxu0 %v4230_v38 }
  0xf5   : > { %3901 = vmatpush1.bf16.msra.mxu1 %v3900_v34  ;;  %3905 = vmatpush1.bf16.msra.mxu0 %v3900_v34 }
  0xf6   : > { %3994 = vmatprep.subr.bf16.mxu1 %v4230_v38  ;;  %3911 = vmatprep.subr.bf16.mxu0 %v4230_v38 }
  0xf8   : > { %3519 = vmatmul.mubr.msk.f32.vlgmr.msra.gmra.mrb[4].mxu1 %vm319_vm0, %v3517_v40  ;;  %3524 = vmatmul.mubr.msk.f32.vlgmr.msra.gmra.mrb[0].mxu0 %vm319_vm0, %v3522_v41 }
  0xf9   : > { %3995 = vmatpush1.bf16.msra.mxu1 %v3900_v34  ;;  %3913 = vmatpush1.bf16.msra.mxu0 %v3900_v34 }
  0xfa   : > { %3907 = vmatprep.subr.bf16.mxu1 %v4230_v38  ;;  %3919 = vmatprep.subr.bf16.mxu0 %v4230_v38 }
  0xfb   : > { %495 = vmatprep.mubr.f32.mxu1 %v4761_v0  ;;  %825 = vmatprep.mubr.f32.mxu0 %v4761_v0 }
  0xfc   : > { %3520 = vmatmul.mubr.msk.f32.gmra.mrb[6].mxu1 %vm319_vm0, %v3518_v44  ;;  %3534 = vmatmul.mubr.msk.f32.vlgmr.msra.gmra.mrb[2].mxu0 %vm319_vm0, %v3532_v43 }
  0xfd   : > { %3921 = vmatpush1.bf16.msra.mxu0 %v3900_v34  ;;  %607 = vmatprep.mubr.f32.mxu1 %v4761_v0 }
  0xfe   : > { %3931 = vmatprep.subr.bf16.mxu0 %v4230_v38  ;;  %831 = vmatprep.mubr.f32.mxu0 %v4761_v0 }
 0x100   : > { %3525 = vmatmul.mubr.msk.f32.vlgmr.msra.gmra.mrb[8].mxu1 %vm319_vm0, %v3523_v47  ;;  %3535 = vmatmul.mubr.msk.f32.gmra.mrb[4].mxu0 %vm319_vm0, %v3533_v48 }
 0x101   : > { %3909 = vmatpush1.bf16.msra.mxu1 %v3900_v34  ;;  %713 = vmatprep.mubr.f32.mxu1 %v4761_v0 }
 0x102   : > { %3915 = vmatprep.subr.bf16.mxu1 %v4230_v38  ;;  %1049 = vmatprep.mubr.f32.mxu0 %v4761_v0 }
 0x104   : > { %3529 = vmatmul.mubr.msk.f32.vlgmr.msra.gmra.mrb[10].mxu1 %vm319_vm0, %v3527_v51  ;;  %3544 = vmatmul.mubr.msk.f32.vlgmr.msra.gmra.mrb[6].mxu0 %vm319_vm0, %v3542_v52 }
 0x105   : > { %3917 = vmatpush1.bf16.msra.mxu1 %v3900_v34  ;;  %3933 = vmatpush3.bf16.msra.mxu0 %v4230_v38 }
 0x106   : > { %3923 = vmatprep.subr.bf16.mxu1 %v4230_v38  ;;  %3939 = vmatprep.subr.bf16.mxu0 %v4230_v38 }
 0x107   : > { %719 = vmatprep.mubr.f32.mxu1 %v4761_v0  ;;  %1055 = vmatprep.mubr.f32.mxu0 %v4761_v0 }
 0x108   : > { %3530 = vmatmul.mubr.msk.f32.gmra.mrb[12].mxu1 %vm319_vm0, %v3528_v54  ;;  %3545 = vmatmul.mubr.msk.f32.gmra.mrb[8].mxu0 %vm319_vm0, %v3543_v55 }
 0x109   : > { %3756 = vmatprep.mubr.msk.f32.mxu0 %vm319_vm0, %v4291_v57  ;;  %937 = vmatprep.mubr.f32.mxu1 %v4761_v0 }
 0x10c   : > { %3539 = vmatmul.mubr.msk.f32.vlgmr.msra.gmra.mrb[14].mxu1 %vm319_vm0, %v3537_v58  ;;  %3757 = vmatmul.mubr.msk.f32.vlgmr.msra.gmra.mrb[10].mxu0 %vm319_vm0, %v4303_v59 }
 0x10d   : > { %3925 = vmatpush3.bf16.msra.mxu1 %v4230_v38  ;;  %3941 = vmatpush3.bf16.msra.mxu0 %v4230_v38 }
 0x10e   : > { %3927 = vmatprep.subr.bf16.mxu1 %v4230_v38  ;;  %943 = vmatprep.mubr.f32.mxu1 %v4761_v0 }
 0x10f   : > { %3770 = vmatprep.mubr.msk.f32.mxu0 %vm319_vm0, %v4308_v60 }
 0x110   : > { %3540 = vmatmul.mubr.msk.f32.gmra.mrb[16].mxu1 %vm319_vm0, %v3538_v62  ;;  %3771 = vmatmul.mubr.msk.f32.vlgmr.msra.gmra.mrb[12].mxu0 %vm319_vm0, %v4318_v61 }
 0x111   : > { %3742 = vmatprep.mubr.msk.f32.mxu1 %vm319_vm0, %v3552_v63  ;;  %3784 = vmatprep.mubr.msk.f32.mxu0 %vm319_vm0, %v3552_v63 }
 0x114   : > { %3743 = vmatmul.mubr.msk.f32.vlgmr.msra.gmra.mrb[18].mxu1 %vm319_vm0, %v4336_v3 }
 0x115   : > { %3929 = vmatpush3.bf16.msra.mxu1 %v4230_v38  ;;  %3749 = vmatprep.mubr.msk.f32.mxu1 %vm319_vm0, %v4339_v5 }
 0x116   : > { %3935 = vmatprep.subr.bf16.mxu1 %v4230_v38 }
 0x118   : > { %3750 = vmatmul.mubr.msk.f32.vlgmr.msra.gmra.mrb[20].mxu1 %vm319_vm0, %v4352_v6 }
 0x119   : > { %3937 = vmatpush3.bf16.msra.mxu1 %v4230_v38  ;;  %3763 = vmatprep.mubr.msk.f32.mxu1 %vm319_vm0, %v4360_v7 }
 0x11a   : > { %3943 = vmatprep.subr.bf16.mxu1 %v4230_v38 }
 0x11c   : > { %3764 = vmatmul.mubr.msk.f32.vlgmr.msra.gmra.mrb[22].mxu1 %vm319_vm0, %v4376_v17 }
 0x11d   : > { %3945 = vmatpush3.bf16.msra.mxu1 %v4230_v38  ;;  %3777 = vmatprep.mubr.msk.f32.mxu1 %vm319_vm0, %v4368_v11 }
 0x11e   : > { %3951 = vmatprep.subr.msk.bf16.mxu1 %vm4371_vm11, %v4084_v18 }
 0x120   : > { %3778 = vmatmul.mubr.msk.f32.vlgmr.msra.gmra.mrb[24].mxu1 %vm319_vm0, %v4387_v19 }
 0x121   : > { %3953 = vmatpush3.bf16.msk.msra.mxu1 %vm4371_vm11, %v4084_v18  ;;  %3791 = vmatprep.mubr.msk.f32.mxu1 %vm319_vm0, %v3552_v63 }
 0x122   : > { %3959 = vmatprep.subr.msk.bf16.mxu1 %vm4371_vm11, %v4084_v18 }
 0x124   : > { %3792 = vmatmul.mubr.msk.f32.vlgmr.msra.gmra.mrb[26].mxu1 %vm319_vm0, %v4336_v3 }
 0x125   : > { %3961 = vmatpush3.bf16.msk.msra.mxu1 %vm4371_vm11, %v4084_v18  ;;  %3805 = vmatprep.mubr.msk.f32.mxu1 %vm319_vm0, %v4339_v5 }
 0x126   : > { %3967 = vmatprep.subr.msk.bf16.mxu1 %vm4371_vm11, %v4084_v18 }
 0x128   : > { %3806 = vmatmul.mubr.msk.f32.vlgmr.msra.gmra.mrb[28].mxu1 %vm319_vm0, %v4352_v6 }
 0x129   : > { %3969 = vmatpush3.bf16.msk.msra.mxu1 %vm4371_vm11, %v4084_v18  ;;  %3819 = vmatprep.mubr.msk.f32.mxu1 %vm319_vm0, %v4291_v57 }
 0x12a   : > { %3975 = vmatprep.subr.msk.bf16.mxu1 %vm4371_vm11, %v4084_v18 }
 0x12c   : > { %3820 = vmatmul.mubr.msk.f32.vlgmr.msra.gmra.mrb[30].mxu1 %vm319_vm0, %v4303_v59 }
 0x12d   : > { %3977 = vmatpush3.bf16.msk.msra.mxu1 %vm4371_vm11, %v4084_v18  ;;  %3833 = vmatprep.mubr.msk.f32.mxu1 %vm319_vm0, %v4360_v7 }
 0x12e   : > { %3983 = vmatprep.subr.msk.bf16.mxu1 %vm4371_vm11, %v4084_v18 }
 0x130   : > { %3834 = vmatmul.mubr.msk.f32.vlgmr.msra.gmra.mrb[32].mxu1 %vm319_vm0, %v4376_v17 }
 0x131   : > { %3985 = vmatpush3.bf16.msk.msra.mxu1 %vm4371_vm11, %v4084_v18  ;;  %3847 = vmatprep.mubr.msk.f32.mxu1 %vm319_vm0, %v4308_v60 }
 0x132   : > { %3991 = vmatprep.subr.msk.bf16.mxu1 %vm4371_vm11, %v4084_v18 }
 0x134   : > { %3848 = vmatmul.mubr.msk.f32.vlgmr.msra.gmra.mrb[34].mxu1 %vm319_vm0, %v4318_v61 }
 0x135   : > { %3993 = vmatpush3.bf16.msk.msra.mxu1 %vm4371_vm11, %v4084_v18  ;;  %3861 = vmatprep.mubr.msk.f32.mxu1 %vm319_vm0, %v4368_v11 }
 0x138   : > { %3862 = vmatmul.mubr.msk.f32.vlgmr.msra.gmra.mrb[36].mxu1 %vm319_vm0, %v4387_v19 }
 0x1cb   : > { %v4436_v20 = vpop.f32.mrb[4].mxu1  ;;  %v4438_v21 = vpop.f32.mrb[0].mxu0 }
 0x1cc   : > { %v493_v22 = vpop.f32.mrb[5].mxu1  ;;  %v605_v23 = vpop.f32.mrb[1].mxu0 }
 0x1cf   : > { %v4440_v24 = vpop.f32.mrb[6].mxu1  ;;  %v4442_v25 = vpop.f32.mrb[2].mxu0 }
 0x1d0   : > { %v499_v26 = vpop.f32.mrb[7].mxu1  ;;  %v829_v27 = vpop.f32.mrb[3].mxu0 }
 0x1d3   : > { %v4444_v29 = vpop.f32.mrb[8].mxu1  ;;  %v4446_v33 = vpop.f32.mrb[4].mxu0 }
 0x1d4   : > { %v611_v34 = vpop.f32.mrb[9].mxu1  ;;  %v835_v36 = vpop.f32.mrb[5].mxu0 }
 0x1d7   : > { %v4448_v38 = vpop.f32.mrb[10].mxu1  ;;  %v4450_v39 = vpop.f32.mrb[6].mxu0 }
 0x1d8   : > { %v717_v40 = vpop.f32.mrb[11].mxu1  ;;  %v1053_v41 = vpop.f32.mrb[7].mxu0 }
 0x1db   : > { %v4452_v42 = vpop.f32.mrb[12].mxu1  ;;  %v4454_v43 = vpop.f32.mrb[8].mxu0 }
 0x1dc   : > { %4767 = vst [vmem:[#allocation4_spill] sm:$0xff] %v4454_v43  ;;  %v723_v44 = vpop.f32.mrb[13].mxu1  ;;  %v1059_v45 = vpop.f32.mrb[9].mxu0 }
 0x1df   : > { %v4456_v46 = vpop.f32.mrb[14].mxu1  ;;  %v3758_v47 = vpop.f32.mrb[10].mxu0 }
 0x1e0   : > { %1550 = vperm.xlu0 %4046, %v3758_v47   ;;  %v941_v48 = vpop.f32.mrb[15].mxu1  ;;  %v1534_v49 = vpop.f32.mrb[11].mxu0 }
 0x1e1   : > { %1545 = vperm.xlu1 %4047, %v1534_v49  }
 0x1e3   : > { %v4458_v50 = vpop.f32.mrb[16].mxu1  ;;  %v3772_v51 = vpop.f32.mrb[12].mxu0 }
 0x1e4   : > { %v947_v52 = vpop.f32.mrb[17].mxu1  ;;  %v1748_v53 = vpop.f32.mrb[13].mxu0  ;;  %1764 = vperm.xlu0 %4046, %v3772_v51  }
 0x1e5   : > { %1759 = vperm.xlu1 %4047, %v1748_v53  }
 0x1e7   : > { %v3744_v54 = vpop.f32.mrb[18].mxu1 }
 0x1e8   : > { %v1320_v55 = vpop.f32.mrb[19].mxu1 }
 0x1e9   : > { %1336 = vperm.xlu1 %4047, %v3744_v54   ;;  %1331 = vperm.xlu0 %4046, %v1320_v55  }
 0x1eb   : > { %v3751_v56 = vpop.f32.mrb[20].mxu1 }
 0x1ec   : > { %v1427_v58 = vpop.f32.mrb[21].mxu1 }
 0x1ed   : > { %1443 = vperm.xlu0 %4046, %v3751_v56   ;;  %1438 = vperm.xlu1 %4047, %v1427_v58  }
 0x1ef   : > { %v3765_v62 = vpop.f32.mrb[22].mxu1 }
 0x1f0   : > { %v1641_v63 = vpop.f32.mrb[23].mxu1 }
 0x1f1   : > { %1657 = vperm.xlu0 %4046, %v3765_v62   ;;  %1652 = vperm.xlu1 %4047, %v1641_v63  }
 0x1f3   : > { %v3779_v4 = vpop.f32.mrb[24].mxu1 }
 0x1f4   : > { %v1855_v10 = vpop.f32.mrb[25].mxu1 }
 0x1f5   : > { %1871 = vperm.xlu0 %4046, %v3779_v4   ;;  %1866 = vperm.xlu1 %4047, %v1855_v10   ;;  %v4511_v4 = vsel %vm838_vm1, 1.0, %v4761_v0 }
 0x1f7   : > { %v4460_v13 = vpop.f32.mrb[26].mxu1 }
 0x1f8   : > { %v4462_v18 = vpop.f32.mrb[27].mxu1  ;;  %vm2818_vm10 = vcmp.gt.f32.partialorder %v4460_v13, 0.5 }
 0x1f9   : > { %4049 = vset.pattern.permute.xlu0 %v4079_v2  ;;  %507 = vperm.xlu1 %4047, %v493_v22   ;;  %vm2817_vm11 = vcmp.gt.f32.partialorder %v4462_v18, 0.5 }
 0x1fa   : > { %1086 = vperm.xlu0 %4049, %v4223_v35  }
 0x1fb   : > { %v4466_v47 = vpop.f32.mrb[28].mxu1 }
 0x1fc   : > { %v4468_v49 = vpop.f32.mrb[29].mxu1 }
 0x1fd   : > { %619 = vperm.xlu1 %4047, %v605_v23   ;;  %vm2912_vm12 = vcmp.gt.f32.partialorder %v4468_v49, 0.5 }
 0x1fe   : > { %4050 = vset.pattern.permute.xlu0 %v4756_v1 }
 0x1ff   : > { %512 = vperm.xlu0 %4050, %v499_v26   ;;  %v4471_v51 = vpop.f32.mrb[30].mxu1 }
 0x200   : > { %v4473_v53 = vpop.f32.mrb[31].mxu1  ;;  %vm3007_vm2 = vcmp.gt.f32.partialorder %v4471_v51, 0.5 }
 0x201   : > { %731 = vperm.xlu1 %4047, %v717_v40  }
 0x203   : > { %624 = vperm.xlu0 %4050, %v611_v34   ;;  %v4475_v54 = vpop.f32.mrb[32].mxu1 }
 0x204   : > { %v4477_v55 = vpop.f32.mrb[33].mxu1 }
 0x205   : > { %843 = vperm.xlu1 %4047, %v829_v27   ;;  %vm3100_vm3 = vcmp.gt.f32.partialorder %v4477_v55, 0.5 }
 0x207   : > { %736 = vperm.xlu0 %4050, %v723_v44   ;;  %v4479_v35 = vpop.f32.mrb[34].mxu1 }
 0x208   : > { %v4481_v22 = vpop.f32.mrb[35].mxu1 }
 0x209   : > { %4048 = vset.pattern.permute.xlu1 %v4079_v2 }
 0x20a   : > { %1081 = vperm.xlu1 %4048, %v4215_v30  }
 0x20b   : > { %848 = vperm.xlu0 %4050, %v835_v36   ;;  %v4485_v23 = vpop.f32.mrb[36].mxu1 }
 0x20c   : > { %v4487_v26 = vpop.f32.mrb[37].mxu1 }
 0x20e   : > { %4051 = vset.pattern.permute.xlu1 %v4756_v1 }
 0x20f   : > { %1067 = vperm.xlu0 %4050, %v1053_v41   ;;  %955 = vperm.xlu1 %4051, %v941_v48   ;;  %v4496_v41 = vsel %vm502_vm13, 1.0, %v4761_v0  ;;  %v4499_v48 = vsel %vm614_vm14, 1.0, %v4761_v0  ;;  %vm2913_vm14 = vcmp.gt.f32.partialorder %v4466_v47, 0.5 }
 0x213   : > { %960 = vperm.xlu1 %4051, %v947_v52   ;;  %4052 = vset.pattern.permute.xlu0 %v4079_v2 }
 0x217   : > { %1072 = vperm.xlu1 %4051, %v1059_v45  }
 0x21b   : > { %4053 = vset.pattern.permute.xlu1 %v4079_v2  ;;  %v4503_v2 = vsel %vm726_vm15, 1.0, %v4761_v0  ;;  %vm3006_vm15 = vcmp.gt.f32.partialorder %v4473_v53, 0.5 }
 0x25f   : > { %v1551_v27 = vpop.permute.xlu0 %1550 }
 0x260   : > { %v1546_v34 = vpop.permute.xlu1 %1545  ;;  %v1554_v10 = vmul.f32 %v4503_v2, %v1551_v27 }
 0x261   : > { %v1553_v16 = vmul.f32 %v4503_v2, %v1546_v34 }
 0x263   : > { %v1765_v40 = vpop.permute.xlu0 %1764 }
 0x264   : > { %v1760_v44 = vpop.permute.xlu1 %1759  ;;  %v1768_v27 = vmul.f32 %v4517_v15, %v1765_v40 }
 0x265   : > { %v1767_v34 = vmul.f32 %v4517_v15, %v1760_v44 }
 0x268   : > { %v1337_v30 = vpop.permute.xlu1 %1336  ;;  %v1332_v36 = vpop.permute.xlu0 %1331 }
 0x269   : > { %v1340_v56 = vmul.f32 %v4496_v41, %v1337_v30  ;;  %v1339_v58 = vmul.f32 %v4496_v41, %v1332_v36 }
 0x26c   : > { %v1444_v45 = vpop.permute.xlu0 %1443  ;;  %v1439_v52 = vpop.permute.xlu1 %1438 }
 0x26d   : > { %v1447_v62 = vmul.f32 %v4499_v48, %v1444_v45  ;;  %v1446_v63 = vmul.f32 %v4499_v48, %v1439_v52 }
 0x26f   : > { %v1449_v14 = vadd.f32 %v1447_v62, %v1340_v56  ;;  %v1448_v12 = vadd.f32 %v1446_v63, %v1339_v58 }
 0x270   : > { %v1658_v30 = vpop.permute.xlu0 %1657  ;;  %v1653_v36 = vpop.permute.xlu1 %1652 }
 0x271   : > { %v1556_v1 = vadd.f32 %v1554_v10, %v1449_v14  ;;  %v1661_v45 = vmul.f32 %v4511_v4, %v1658_v30  ;;  %v1555_v52 = vadd.f32 %v1553_v16, %v1448_v12  ;;  %v1660_v31 = vmul.f32 %v4511_v4, %v1653_v36 }
 0x273   : > { %v1663_v56 = vadd.f32 %v1661_v45, %v1556_v1  ;;  %v1662_v58 = vadd.f32 %v1660_v31, %v1555_v52 }
 0x274   : > { %v1872_v62 = vpop.permute.xlu0 %1871  ;;  %v1867_v63 = vpop.permute.xlu1 %1866 }
 0x275   : > { %v1770_v43 = vadd.f32 %v1768_v27, %v1663_v56  ;;  %v1875_v28 = vmul.f32 %v4522_v32, %v1872_v62  ;;  %v1769_v14 = vadd.f32 %v1767_v34, %v1662_v58  ;;  %v1874_v10 = vmul.f32 %v4522_v32, %v1867_v63 }
 0x277   : > { %v1877_v12 = vadd.f32 %v1875_v28, %v1770_v43  ;;  %v1876_v16 = vadd.f32 %v1874_v10, %v1769_v14 }
 0x278   : > { %v508_v30 = vpop.permute.xlu1 %507 }
 0x279   : > { %v3946_v36 = vpack.c.bf16 %v1877_v12, %v1876_v16  ;;  %v4528_v0 = vpop.permute.xlu0 %1086 }
 0x27b   : > { %3947 = vmatprep.subr.bf16.mxu0 %v3946_v36 }
 0x27c   : > { %3949 = vmatpush3.bf16.msra.mxu0 %v3946_v36  ;;  %v620_v40 = vpop.permute.xlu1 %619 }
 0x27d   : > { %3955 = vmatprep.subr.bf16.mxu0 %v3946_v36  ;;  %v627_v45 = vmul.f32 %v4499_v48, %v620_v40 }
 0x27e   : > { %v513_v1 = vpop.permute.xlu0 %512 }
 0x27f   : > { %3785 = vmatmul.mubr.msk.f32.vlgmr.msra.gmra.mrb[14].mxu0 %vm319_vm0, %v4336_v3  ;;  %v515_v3 = vmul.f32 %v4496_v41, %v508_v30  ;;  %v516_v56 = vmul.f32 %v4496_v41, %v513_v1 }
 0x280   : > { %3957 = vmatpush3.bf16.msra.mxu0 %v3946_v36  ;;  %3798 = vmatprep.mubr.msk.f32.mxu0 %vm319_vm0, %v4339_v5  ;;  %v732_v31 = vpop.permute.xlu1 %731 }
 0x281   : > { %3963 = vmatprep.subr.bf16.mxu0 %v3946_v36  ;;  %v739_v5 = vmul.f32 %v4503_v2, %v732_v31  ;;  %v629_v52 = vadd.f32 %v627_v45, %v515_v3 }
 0x282   : > { %v625_v28 = vpop.permute.xlu0 %624 }
 0x283   : > { %3799 = vmatmul.mubr.msk.f32.vlgmr.msra.gmra.mrb[16].mxu0 %vm319_vm0, %v4352_v6 }
 0x284   : > { %3965 = vmatpush3.bf16.msra.mxu0 %v3946_v36  ;;  %3812 = vmatprep.mubr.msk.f32.mxu0 %vm319_vm0, %v4291_v57  ;;  %v844_v43 = vpop.permute.xlu1 %843 }
 0x285   : > { %3971 = vmatprep.subr.bf16.mxu0 %v3946_v36  ;;  %v851_v27 = vmul.f32 %v4511_v4, %v844_v43 }
 0x286   : > { %v737_v44 = vpop.permute.xlu0 %736 }
 0x287   : > { %3813 = vmatmul.mubr.msk.f32.vlgmr.msra.gmra.mrb[18].mxu0 %vm319_vm0, %v4303_v59  ;;  %v741_v59 = vadd.f32 %v739_v5, %v629_v52  ;;  %v740_v62 = vmul.f32 %v4503_v2, %v737_v44 }
 0x288   : > { %3973 = vmatpush3.bf16.msra.mxu0 %v3946_v36  ;;  %3826 = vmatprep.mubr.msk.f32.mxu0 %vm319_vm0, %v4360_v7  ;;  %v628_v7 = vmul.f32 %v4499_v48, %v625_v28 }
 0x289   : > { %3979 = vmatprep.subr.bf16.mxu0 %v3946_v36  ;;  %v4545_v6 = vpop.permute.xlu1 %1081  ;;  %v853_v58 = vadd.f32 %v851_v27, %v741_v59 }
 0x28a   : > { %v849_v57 = vpop.permute.xlu0 %848 }
 0x28b   : > { %3827 = vmatmul.mubr.msk.f32.vlgmr.msra.gmra.mrb[20].mxu0 %vm319_vm0, %v4376_v17  ;;  %v852_v48 = vmul.f32 %v4511_v4, %v849_v57 }
 0x28c   : > { %3981 = vmatpush3.bf16.msra.mxu0 %v3946_v36  ;;  %3840 = vmatprep.mubr.msk.f32.mxu0 %vm319_vm0, %v4308_v60  ;;  %v630_v60 = vadd.f32 %v628_v7, %v516_v56 }
 0x28d   : > { %3987 = vmatprep.subr.bf16.mxu0 %v3946_v36 }
 0x28e   : > { %v956_v34 = vpop.permute.xlu1 %955  ;;  %v1068_v17 = vpop.permute.xlu0 %1067  ;;  %v742_v12 = vadd.f32 %v740_v62, %v630_v60 }
 0x28f   : > { %v963_v63 = vmul.f32 %v4517_v15, %v956_v34  ;;  %3841 = vmatmul.mubr.msk.f32.vlgmr.msra.gmra.mrb[22].mxu0 %vm319_vm0, %v4318_v61  ;;  %v1075_v41 = vmul.f32 %v4522_v32, %v1068_v17 }
 0x290   : > { %3989 = vmatpush3.bf16.msra.mxu0 %v3946_v36  ;;  %3854 = vmatprep.mubr.msk.f32.mxu0 %vm319_vm0, %v4368_v11  ;;  %v854_v16 = vadd.f32 %v852_v48, %v742_v12 }
 0x291   : > { %v965_v14 = vadd.f32 %v963_v63, %v853_v58 }
 0x292   : > { %v961_v10 = vpop.permute.xlu1 %960 }
 0x293   : > { %v964_v2 = vmul.f32 %v4517_v15, %v961_v10  ;;  %3855 = vmatmul.mubr.msk.f32.vlgmr.msra.gmra.mrb[24].mxu0 %vm319_vm0, %v4387_v19  ;;  %v1077_v61 = vadd.f32 %v1075_v41, %v965_v14  ;;  %vm1106_vm0 = vcmp.ne.s32.totalorder %v4146_v8, 15  ;;  %v4769_v8 = vmov 0.0  }
 0x295   : > { %v966_v36 = vadd.f32 %v964_v2, %v854_v16  ;;  %v1089_v1 = vmul.f32 %v4545_v6, %v1077_v61 }
 0x296   : > { %v1073_v30 = vpop.permute.xlu1 %1072 }
 0x297   : > { %v1076_v40 = vmul.f32 %v4522_v32, %v1073_v30  ;;  %v1092_v31 = vsel %vm1091_vm4, %v1089_v1, inf }
 0x299   : > { %v1078_v11 = vadd.f32 %v1076_v40, %v966_v36 }
 0x29b   : > { %v1090_v4 = vmul.f32 %v4528_v0, %v1078_v11 }
 0x29d   : > { %v1093_v28 = vsel %vm1091_vm4, %v1090_v4, inf }
 0x29e   : > { %v1094_v15 = vmin.f32 %v1092_v31, %v1093_v28 }
 0x2a0   : > { %1095 = vmin.xlane.f32.xlu1 %v1094_v15 }
 0x32d   : > { %v1096_v43 = vpop.xlane.xlu1 %1095 }
 0x32e   : > { %v1097_v19 = vrot.slane %v1096_v43, 4 }
 0x330   : > { %v1098_v44 = vmin.f32 %v1096_v43, %v1097_v19 }
 0x332   : > { %v1099_v45 = vrot.slane %v1098_v44, 2 }
 0x334   : > { %v1100_v3 = vmin.f32 %v1098_v44, %v1099_v45 }
 0x336   : > { %v1101_v5 = vrot.slane %v1100_v3, 1 }
 0x338   : > { %v1102_v57 = vmin.f32 %v1100_v3, %v1101_v5 }
 0x33a   : > { %4008 = vpush %v1102_v57 }
 0x352   : > { %v3786_v32 = vpop.f32.mrb[14].mxu0 }
 0x353   : > { %v1944_v52 = vpop.f32.mrb[15].mxu0  ;;  %v4577_v63 = vmul.f32 %v3786_v32, %v4528_v0 }
 0x354   : > { %v4583_v48 = vmul.f32 %v1944_v52, %v4545_v6 }
 0x356   : > { %v3800_v27 = vpop.f32.mrb[16].mxu0 }
 0x357   : > { %v2096_v59 = vpop.f32.mrb[17].mxu0  ;;  %v4571_v56 = vmul.f32 %v3800_v27, %v4528_v0 }
 0x358   : > { %v4574_v58 = vmul.f32 %v2096_v59, %v4545_v6 }
 0x359   : > { %v2791_v10 = vmin.f32 %v4577_v63, %v4571_v56 }
 0x35a   : > { %v3814_v7 = vpop.f32.mrb[18].mxu0  ;;  %v2790_v41 = vmin.f32 %v4583_v48, %v4574_v58 }
 0x35b   : > { %v2248_v34 = vpop.f32.mrb[19].mxu0  ;;  %v4580_v17 = vmul.f32 %v3814_v7, %v4528_v0 }
 0x35c   : > { %v4586_v14 = vmul.f32 %v2248_v34, %v4545_v6 }
 0x35d   : > { %v2793_v61 = vmin.f32 %v2791_v10, %v4580_v17 }
 0x35e   : > { %v3828_v62 = vpop.f32.mrb[20].mxu0  ;;  %v2792_v40 = vmin.f32 %v2790_v41, %v4586_v14 }
 0x35f   : > { %v2400_v60 = vpop.f32.mrb[21].mxu0  ;;  %v4591_v12 = vmul.f32 %v3828_v62, %v4528_v0  ;;  %v4768_v62 = vlaneseq }
 0x360   : > { %v4596_v2 = vmul.f32 %v2400_v60, %v4545_v6 }
 0x361   : > { %v2795_v31 = vmin.f32 %v2793_v61, %v4591_v12  ;;  %v4625_v60 = vshrl.u32 %v4768_v62, 7 }
 0x362   : > { %v3842_v16 = vpop.f32.mrb[22].mxu0  ;;  %v2794_v28 = vmin.f32 %v2792_v40, %v4596_v2 }
 0x363   : > { %v4600_v30 = vmul.f32 %v3842_v16, %v4528_v0  ;;  %v2552_v36 = vpop.f32.mrb[23].mxu0  ;;  %vm2822_vm6 = vcmp.eq.s32.totalorder %v4226_v37, %v4625_v60 }
 0x364   : > { %v4604_v11 = vmul.f32 %v2552_v36, %v4545_v6  ;;  %v3613_v9 = vsel %vm2822_vm6, 1.0, %v4769_v8  ;;  %vm3194_vm6 = vcmp.gt.f32.partialorder %v4481_v22, 0.5 }
 0x365   : > { %v2797_v43 = vmin.f32 %v2795_v31, %v4600_v30  ;;  %3864 = vmatprep.subr.msk.mxu0 %vm2831_vm7, %v3613_v9 }
 0x366   : > { %v3856_v15 = vpop.f32.mrb[24].mxu0  ;;  %v2796_v45 = vmin.f32 %v2794_v28, %v4604_v11  ;;  %3865 = vmatpush3.msk.msra.mxu0 %vm2831_vm7, %v3613_v9  ;;  %v3627_v9 = vadd.s32 4294967278, %v4226_v37 }
 0x367   : > { %v4610_v19 = vmul.f32 %v3856_v15, %v4528_v0  ;;  %v2704_v44 = vpop.f32.mrb[25].mxu0 }
 0x368   : > { %v4614_v3 = vmul.f32 %v2704_v44, %v4545_v6  ;;  %vm3105_vm13 = vcmp.eq.s32.totalorder %v3627_v9, %v4625_v60 }
 0x369   : > { %v2799_v5 = vmin.f32 %v2797_v43, %v4610_v19  ;;  %v3628_v18 = vsel %vm3105_vm13, 1.0, %v4769_v8 }
 0x36a   : > { %v2798_v57 = vmin.f32 %v2796_v45, %v4614_v3 }
 0x36b   : > { %s4009_s11 = spop %4008  ;;  %v2801_v32 = vsel %vm1091_vm4, %v2799_v5, inf }
 0x36c   : > { %s3547_s12 = sadd.f32 -1000.0, %s4009_s11  ;;  %v2800_v52 = vsel %vm1091_vm4, %v2798_v57, inf }
 0x36d   : > { %v2802_v0 = vmin.f32 %v2800_v52, %v2801_v32 }
 0x36e   : > { %v1107_v27 = vstv %s3547_s12 }
 0x36f   : > { %2803 = vmin.xlane.f32.xlu0 %v2802_v0  ;;  %v1109_v59 = vsel %vm1106_vm0, %v1090_v4, %v1107_v27  ;;  %v1108_v6 = vsel %vm1105_vm5, %v1089_v1, %v1107_v27  ;;  %v3617_v1 = vadd.s32 4294967290, %v4226_v37  ;;  %v3622_v27 = vadd.s32 4294967284, %v4226_v37 }
 0x370   : > { %v1113_v7 = vsel %vm1091_vm4, %v1109_v59, -inf  ;;  %v1110_v34 = vsel %vm1091_vm4, %v1108_v6, -inf  ;;  %vm3101_vm5 = vcmp.gt.f32.partialorder %v4475_v54, 0.5 }
 0x371   : > { %1114 = vmax.xlane.f32.xlu1 %v1113_v7  ;;  %vm2917_vm8 = vcmp.eq.s32.totalorder %v3617_v1, %v4625_v60  ;;  %vm3011_vm9 = vcmp.eq.s32.totalorder %v3622_v27, %v4625_v60 }
 0x372   : > { %v3618_v4 = vsel %vm2917_vm8, 1.0, %v4769_v8  ;;  %vm3195_vm8 = vcmp.gt.f32.partialorder %v4479_v35, 0.5 }
 0x373   : > { %1111 = vmax.xlane.f32.xlu0 %v1110_v34  ;;  %3869 = vmatprep.subr.msk.mxu0 %vm2831_vm7, %v3618_v4  ;;  %v3623_v34 = vsel %vm3011_vm9, 1.0, %v4769_v8  ;;  %vm3288_vm9 = vcmp.gt.f32.partialorder %v4487_v26, 0.5 }
 0x3fc   : > { %v2804_v10 = vpop.xlane.xlu0 %2803 }
 0x3fd   : > { %v2805_v41 = vrot.slane %v2804_v10, 4 }
 0x3fe   : > { %v1115_v16 = vpop.xlane.xlu1 %1114 }
 0x3ff   : > { %v2806_v61 = vmin.f32 %v2804_v10, %v2805_v41  ;;  %v1117_v36 = vsub.f32 %v1109_v59, %v1115_v16 }
 0x400   : > { %v1112_v40 = vpop.xlane.xlu0 %1111 }
 0x401   : > { %v2807_v31 = vrot.slane %v2806_v61, 2  ;;  %v1120_v28 = vmul.f32 1.442695, %v1117_v36  ;;  %v1116_v15 = vsub.f32 %v1108_v6, %v1112_v40 }
 0x403   : > { %4061 = vpow2.f32 %v1120_v28  ;;  %v1118_v43 = vmul.f32 1.442695, %v1116_v15  ;;  %v2808_v44 = vmin.f32 %v2806_v61, %v2807_v31 }
 0x405   : > { %4063 = vpow2.f32 %v1118_v43  ;;  %v2809_v45 = vrot.slane %v2808_v44, 1  ;;  %v4085_v43 = vmov -1e+30  }
 0x407   : > { %v2810_v5 = vmin.f32 %v2808_v44, %v2809_v45 }
 0x409   : > { %4010 = vpush %v2810_v5 }
 0x40d   : > { %v4636_v57 = vpop.eup %4061 }
 0x40e   : > { %v1125_v32 = vsel %vm1091_vm4, %v4636_v57, 0.0 }
 0x40f   : > { %v4640_v52 = vpop.eup %4063  ;;  %1126 = vadd.xlane.f32.xlu1 %v1125_v32 }
 0x410   : > { %v1122_v0 = vsel %vm1091_vm4, %v4640_v52, 0.0 }
 0x411   : > { %1123 = vadd.xlane.f32.xlu0 %v1122_v0 }
 0x43a   : > { %s4011_s13 = spop %4010 }
 0x43b   : > { %s3612_s14 = sadd.f32 -1.0, %s4011_s13 }
 0x43d   : > { %v2819_v59 = vstv %s3612_s14 }
 0x43e   : > { %v2820_v6 = vsel %vm2817_vm11, %v2819_v59, %v4583_v48  ;;  %v2821_v7 = vsel %vm2818_vm10, %v2819_v59, %v4577_v63  ;;  %v2914_v62 = vsel %vm2912_vm12, %v2819_v59, %v4574_v58  ;;  %v2915_v13 = vsel %vm2913_vm14, %v2819_v59, %v4571_v56 }
 0x43f   : > { %3866 = vmatprep.mubr.msk.f32.mxu0 %vm1091_vm4, %v2820_v6  ;;  %v3008_v49 = vsel %vm3006_vm15, %v2819_v59, %v4586_v14  ;;  %v3632_v58 = vadd.s32 4294967272, %v4226_v37  ;;  %v3009_v47 = vsel %vm3007_vm2, %v2819_v59, %v4580_v17  ;;  %v3102_v56 = vsel %vm3100_vm3, %v2819_v59, %v4596_v2 }
 0x440   : > { %3867 = vmatmul.mubr.msk.f32.vlgmr.msra.gmra.mrb[26].mxu0 %vm1091_vm4, %v2821_v7  ;;  %v3637_v63 = vadd.s32 4294967266, %v4226_v37  ;;  %v3103_v51 = vsel %vm3101_vm5, %v2819_v59, %v4591_v12  ;;  %v3196_v17 = vsel %vm3194_vm6, %v2819_v59, %v4604_v11  ;;  %v3197_v54 = vsel %vm3195_vm8, %v2819_v59, %v4600_v30 }
 0x441   : > { %3871 = vmatprep.mubr.msk.f32.mxu0 %vm1091_vm4, %v2914_v62  ;;  %3870 = vmatpush3.msk.msra.mxu0 %vm2831_vm7, %v3618_v4  ;;  %vm3199_vm1 = vcmp.eq.s32.totalorder %v3632_v58, %v4625_v60  ;;  %v3290_v22 = vsel %vm3288_vm9, %v2819_v59, %v4614_v3  ;;  %vm3289_vm10 = vcmp.gt.f32.partialorder %v4485_v23, 0.5  ;;  %v4770_v11 = vmov 1  }
 0x442   : > { %3874 = vmatprep.subr.msk.mxu0 %vm2831_vm7, %v3623_v34  ;;  %v3633_v53 = vsel %vm3199_vm1, 1.0, %v4769_v8  ;;  %vm3293_vm0 = vcmp.eq.s32.totalorder %v3637_v63, %v4625_v60  ;;  %v3291_v48 = vsel %vm3289_vm10, %v2819_v59, %v4610_v19  ;;  %v4771_v23 = vmov 4  }
 0x443   : > { %v3638_v55 = vsel %vm3293_vm0, 1.0, %v4769_v8  ;;  %v4772_v19 = vmov 2   ;;  %v4773_v3 = vmov 3   ;;  %v4774_v60 = vmov 5  }
 0x448   : > { %3872 = vmatmul.mubr.msk.f32.vlgmr.msra.gmra.mrb[26].mxu0 %vm1091_vm4, %v2915_v13 }
 0x449   : > { %3876 = vmatprep.mubr.msk.f32.mxu0 %vm1091_vm4, %v3008_v49  ;;  %3875 = vmatpush3.msk.msra.mxu0 %vm2831_vm7, %v3623_v34  ;;  %v4775_v49 = vld [vmem:[#allocation2_spill] sm:$0xff] }
 0x44a   : > { %3879 = vmatprep.subr.msk.mxu0 %vm2831_vm7, %v3628_v18 }
 0x450   : > { %3877 = vmatmul.mubr.msk.f32.vlgmr.msra.gmra.mrb[26].mxu0 %vm1091_vm4, %v3009_v47  ;;  %v4776_v47 = vld [vmem:[#allocation4_spill] sm:$0xff] }
 0x451   : > { %3881 = vmatprep.mubr.msk.f32.mxu0 %vm1091_vm4, %v3102_v56  ;;  %3880 = vmatpush3.msk.msra.mxu0 %vm2831_vm7, %v3628_v18 }
 0x452   : > { %3884 = vmatprep.subr.msk.mxu0 %vm2831_vm7, %v3633_v53 }
 0x458   : > { %3882 = vmatmul.mubr.msk.f32.vlgmr.msra.gmra.mrb[26].mxu0 %vm1091_vm4, %v3103_v51 }
 0x459   : > { %3886 = vmatprep.mubr.msk.f32.mxu0 %vm1091_vm4, %v3196_v17  ;;  %3885 = vmatpush3.msk.msra.mxu0 %vm2831_vm7, %v3633_v53  ;;  %v3549_v53 = vld [vmem:[%s302_s26] ss:$0 sm:$0xff] }
 0x45a   : > { %3889 = vmatprep.subr.msk.mxu0 %vm2831_vm7, %v3638_v55 }
 0x460   : > { %3887 = vmatmul.mubr.msk.f32.vlgmr.msra.gmra.mrb[26].mxu0 %vm1091_vm4, %v3197_v54 }
 0x461   : > { %3891 = vmatprep.mubr.msk.f32.mxu0 %vm1091_vm4, %v3290_v22  ;;  %3890 = vmatpush3.msk.msra.mxu0 %vm2831_vm7, %v3638_v55  ;;  %v4777_v55 = vld [vmem:[#allocation3_spill] sm:$0xff] }
 0x468   : > { %3892 = vmatmul.mubr.msk.f32.vlgmr.msra.gmra.mrb[26].mxu0 %vm1091_vm4, %v3291_v48  ;;  %vm2813_vm4 = vcmp.lt.s32.totalorder %v4226_v37, 36 }
 0x469   : > { %v2814_v44 = vsel %vm2813_vm4, 0.0, %v4085_v43 }
 0x49c   : > { %v1127_v14 = vpop.xlane.xlu1 %1126 }
 0x49d   : > { %4065 = vrcp.f32 %v1127_v14 }
 0x49e   : > { %v1124_v35 = vpop.xlane.xlu0 %1123 }
 0x49f   : > { %4067 = vrcp.f32 %v1124_v35 }
 0x4a7   : > { %v4066_v26 = vpop.eup %4065 }
 0x4a8   : > { %v1131_v12 = vmul.f32 %v4066_v26, %v4636_v57 }
 0x4a9   : > { %v4068_v2 = vpop.eup %4067 }
 0x4aa   : > { %v1129_v30 = vmul.f32 %v4068_v2, %v4640_v52  ;;  %1139 = vperm.xlu1 %4053, %v1131_v12  }
 0x4ac   : > { %1134 = vperm.xlu0 %4052, %v1129_v30  }
 0x4ae   : > { %4054 = vset.pattern.permute.xlu1 %v4770_v11 }
 0x4af   : > { %1145 = vperm.xlu1 %4054, %v1129_v30  }
 0x4b0   : > { %4058 = vset.pattern.permute.xlu0 %v4771_v23 }
 0x4b1   : > { %1185 = vperm.xlu0 %4058, %v1131_v12  }
 0x4b3   : > { %1149 = vperm.xlu1 %4054, %v1131_v12  }
 0x4b5   : > { %4060 = vset.pattern.permute.xlu0 %v4770_v11 }
 0x4b7   : > { %4055 = vset.pattern.permute.xlu1 %v4772_v19 }
 0x4b8   : > { %1157 = vperm.xlu1 %4055, %v1129_v30  }
 0x4bc   : > { %1161 = vperm.xlu1 %4055, %v1131_v12  }
 0x4c0   : > { %4056 = vset.pattern.permute.xlu1 %v4773_v3 }
 0x4c1   : > { %1169 = vperm.xlu1 %4056, %v1129_v30  }
 0x4c5   : > { %1173 = vperm.xlu1 %4056, %v1131_v12  }
 0x4c9   : > { %4057 = vset.pattern.permute.xlu1 %v4771_v23 }
 0x4ca   : > { %1181 = vperm.xlu1 %4057, %v1129_v30  }
 0x4ce   : > { %4059 = vset.pattern.permute.xlu1 %v4774_v60 }
 0x4cf   : > { %1193 = vperm.xlu1 %4059, %v1129_v30  }
 0x4d3   : > { %1197 = vperm.xlu1 %4059, %v1131_v12  }
 0x529   : > { %v1140_v8 = vpop.permute.xlu1 %1139 }
 0x52a   : > { %v1143_v36 = vmul.f32 %v1140_v8, %v4440_v24 }
 0x52b   : > { %v1135_v1 = vpop.permute.xlu0 %1134 }
 0x52c   : > { %v1142_v10 = vmul.f32 %v1135_v1, %v4436_v20 }
 0x52e   : > { %v1146_v4 = vpop.permute.xlu1 %1145 }
 0x52f   : > { %v1152_v41 = vmul.f32 %v1146_v4, %v4438_v21 }
 0x530   : > { %v1186_v0 = vpop.permute.xlu0 %1185 }
 0x531   : > { %v1154_v16 = vadd.f32 %v1152_v41, %v1142_v10  ;;  %v1189_v6 = vmul.f32 %v1186_v0, %v4458_v50  ;;  %v3548_v50 = vld [vmem:[%s299_s20] ss:$0 sm:$0xff] }
 0x532   : > { %v1150_v61 = vpop.permute.xlu1 %1149 }
 0x533   : > { %v1153_v40 = vmul.f32 %v1150_v61, %v4444_v29 }
 0x535   : > { %v1155_v31 = vadd.f32 %v1153_v40, %v1143_v36 }
 0x537   : > { %v1158_v28 = vpop.permute.xlu1 %1157 }
 0x538   : > { %v1164_v15 = vmul.f32 %v1158_v28, %v4448_v38 }
 0x53a   : > { %v1166_v45 = vadd.f32 %v1164_v15, %v1154_v16 }
 0x53b   : > { %v1162_v5 = vpop.permute.xlu1 %1161  ;;  %v3893_v20 = vpop.f32.mrb[26].mxu0 }
 0x53c   : > { %v1165_v21 = vmul.f32 %v1162_v5, %v4452_v42  ;;  %v3996_v24 = vadd.f32 %v3893_v20, %v2814_v44  ;;  %v3371_v57 = vpop.f32.mrb[27].mxu0 }
 0x53d   : > { %v3997_v29 = vadd.f32 %v3371_v57, %v2814_v44 }
 0x53e   : > { %v1167_v32 = vadd.f32 %v1165_v21, %v1155_v31  ;;  %3383 = vst [vmem:[%s312_s17 + $0x8] sm:$0xff] %v3996_v24 }
 0x53f   : > { %3382 = vst [vmem:[%s312_s17] sm:$0xff] %v3997_v29 }
 0x540   : > { %v1170_v37 = vpop.permute.xlu1 %1169 }
 0x541   : > { %v1176_v38 = vmul.f32 %v1170_v37, %v4442_v25 }
 0x543   : > { %v1178_v52 = vadd.f32 %v1176_v38, %v1166_v45 }
 0x544   : > { %v1174_v27 = vpop.permute.xlu1 %1173 }
 0x545   : > { %v1177_v59 = vmul.f32 %v1174_v27, %v4446_v33 }
 0x547   : > { %v1179_v7 = vadd.f32 %v1177_v59, %v1167_v32 }
 0x549   : > { %v1182_v42 = vpop.permute.xlu1 %1181  ;;  %v1191_v34 = vadd.f32 %v1189_v6, %v1179_v7 }
 0x54a   : > { %v1188_v62 = vmul.f32 %v1182_v42, %v4456_v46 }
 0x54c   : > { %v1190_v9 = vadd.f32 %v1188_v62, %v1178_v52 }
 0x54e   : > { %v1194_v13 = vpop.permute.xlu1 %1193 }
 0x54f   : > { %v1200_v25 = vmul.f32 %v1194_v13, %v4450_v39 }
 0x551   : > { %v1202_v33 = vadd.f32 %v1200_v25, %v1190_v9 }
 0x552   : > { %v1198_v18 = vpop.permute.xlu1 %1197 }
 0x553   : > { %v1204_v58 = vadd.f32 %v1202_v33, %v4775_v49  ;;  %v1201_v46 = vmul.f32 %v1198_v18, %v4776_v47 }
 0x555   : > { %v1213_v56 = vmul.f32 %v3548_v50, %v1204_v58  ;;  %v1203_v63 = vadd.f32 %v1201_v46, %v1191_v34 }
 0x557   : > { %v1222_v51 = vadd.f32 %v3549_v53, %v1213_v56  ;;  %v1205_v17 = vadd.f32 %v1203_v63, %v4777_v55 }
 0x559   : > { %v1224_v39 = vmax.f32 %v1222_v51, 0.0  ;;  %v1214_v54 = vmul.f32 %v3548_v50, %v1205_v17 }
 0x55b   : > { %1226 = vst [vmem:[%s307_s29] sm:$0xff] %v1224_v39  ;;  %v1223_v22 = vadd.f32 %v3549_v53, %v1214_v54 }
 0x55d   : > { %v1225_v48 = vmax.f32 %v1223_v22, 0.0 }
 0x55f   : > { %1227 = vst [vmem:[%s307_s29 + $0x8] sm:$0xff] %v1225_v48 }
 0x560 PF: > { %s17_s21 = sadd.s32 1, %s4075_s21  }
 0x561   : > { %p14_p4 = scmp.ge.s32.totalorder %s17_s21, 4  }
 0x563   :  { %16 = sbr.rel (!%p14_p4) target bundleno = 1 (0x1), region = 91 }

// kernel: _lambda_.4
= control target key start
LH: loop header
LB: loop body
LE: loop exit
PB: predicated region body
PF: predicated region fallthrough
CT: control target
= control target key end

     0   :  { %12 = vsyncpa [#allocation3], 0  ;;  %s7678_s0 = inlined_call_operand.vmem [shape: f32[2,16,128], index: 0, kind: input, shape index: {}]   ;;  %s7679_s1 = inlined_call_operand.vmem [shape: f32[2,128,384], index: 1, kind: input, shape index: {}]   ;;  %s7680_s2 = inlined_call_operand.vmem [shape: s32[2,2,16,6], index: 2, kind: input, shape index: {}]   ;;  %s7681_s3 = inlined_call_operand.vmem [shape: f32[2,1,128], index: 3, kind: input, shape index: {}]   ;;  %s7682_s4 = inlined_call_operand.vmem [shape: f32[2,1,128], index: 4, kind: input, shape index: {}]   ;;  %s7683_s5 = inlined_call_operand.vmem [shape: f32[2,16,128], index: 5, kind: output, shape index: {0}]   ;;  %s7684_s6 = inlined_call_operand.hbm [shape: f32[2,16,128], index: 6, kind: output, shape index: {1}]  }
   0x1   :  { %14 = vsyncpa [#allocation3 + $0x1], 0  ;;  %s6561_s21 = smov 0   ;;  %s6563_s22 = smov 0  }
   0x2   :  { %s6565_s23 = smov 0   ;;  %s6567_s24 = smov 0  }
   0x3 LB: > { %s6582_s25 = sadd.s32 4294967295, %s6512_s24   ;;  %s5423_s26 = sadd.s32 4294967294, %s6512_s24   ;;  %s6512_s24 = sphi %s6567_s24, %s7755_s24   ;;  %s6508_s23 = sphi %s6565_s23, %s7754_s23   ;;  %s6504_s22 = sphi %s6563_s22, %s7753_s22   ;;  %s6500_s21 = sphi %s6561_s21, %s7752_s21  }
   0x4   : > { %s6586_s27 = sadd.s32 1, %s6512_s24   ;;  %s183_s28 = sadd.s32 1, %s6508_s23 }
   0x5   : > { %s180_s29 = ssub.s32 %s6512_s24, %s6586_s27  ;;  %p193_p0 = scmp.ne.s32.totalorder %s6508_s23, %s6504_s22 }
   0x6   : > { %p181_p1 = scmp.eq.s32.totalorder %s180_s29, 0  ;;  %p194_p2 = scmp.eq.s32.totalorder %s6582_s25, 1 }
   0x7   : > { %p199_p3 = scmp.ne.s32.totalorder %s6504_s22, %s6500_s21  ;;  %p200_p4 = scmp.eq.s32.totalorder %s5423_s26, 1 }
   0x8   : > { %s6597_s30 = scalar_select %p181_p1, %s6508_s23, %s183_s28  }
   0x9   : > { %p6599_p5 = por %p194_p2, %p193_p0  ;;  %p6603_p6 = por %p200_p4, %p199_p3 }
   0xa   : > { %p5426_p7 = scmp.ge.s32.totalorder %s6512_s24, 1  ;;  %p254_p8 = scmp.lt.s32.totalorder %s6512_s24, 3 }
   0xc   : > { %p255_p9 = pnand %p5426_p7, %p254_p8 }
   0xe   : > { %258 = sbr.rel (%p255_p9) target bundleno = 1557 (0x615), region = 40 }
  0x15   : > { %p305_p10 = scmp.lt.s32.totalorder %s6582_s25, 1  ;;  %v7686_v0 = vmov 0.0   ;;  %v7696_v1 = vmov 1   ;;  %v7698_v2 = vmov 0   ;;  %vm549_vm0 = vcmask 130048   ;;  %s302_s15 = sand.u32 1, %s6504_s22  }
  0x16   : > { %445 = vmatprep.mubr.f32.mxu0 %v7686_v0  ;;  %6367 = vset.pattern.permute.xlu1 %v7696_v1  ;;  %s5427_s16 = sshll.u32 %s302_s15, 4  ;;  %s5633_s19 = sshll.u32 %s6582_s25, 8 }
  0x17   : > { %s6613_s9 = scalar_select %p305_p10, %s6582_s25, 1  ;;  %6366 = vset.pattern.permute.xlu0 %v7698_v2 }
  0x18   : > { %s6523_s25 = smov [#allocation2]  }
  0x19   : > { %s6309_s10 = smul.u32 384, %s6613_s9  ;;  %s5630_s11 = sshll.u32 %s6613_s9, 4 }
  0x1a   : > { %s6623_s14 = scalar_lea.vmem %s7678_s0, %s5630_s11  ;;  %s5631_s18 = sshll.u32 %s6613_s9, 5 }
  0x1b   : > { %s6628_s17 = scalar_lea.vmem %s7679_s1, %s6309_s10  ;;  %v6631_v3 = vld [vmem:[%s6623_s14] sm:$0xff]  ;;  %s6668_s26 = scalar_lea.vmem %s7680_s2, %s5631_s18 }
  0x1c   : > { %v334_v4 = vld [vmem:[%s6628_s17 + $0x8] sm:$0xff]  ;;  %v337_v5 = vld [vmem:[%s6628_s17 + $0x20] sm:$0xff]  ;;  %v335_v6 = vld [vmem:[%s6628_s17 + $0x10] sm:$0xff]  ;;  %5822 = vmatprep.mubr.f32.mxu1 %v6631_v3 }
  0x1d   : > { %v6065_v7 = vpack.c.bf16 %v337_v5, %v334_v4  ;;  %v338_v8 = vld [vmem:[%s6628_s17 + $0x28] sm:$0xff]  ;;  %v333_v9 = vld [vmem:[%s6628_s17] sm:$0xff]  ;;  %v336_v10 = vld [vmem:[%s6628_s17 + $0x18] sm:$0xff] }
  0x1e   : > { %v6097_v11 = vpack.c.bf16 %v338_v8, %v335_v6  ;;  %v6067_v12 = vpack.c.bf16 %v336_v10, %v333_v9  ;;  %v340_v13 = vld [vmem:[%s6628_s17 + $0x38] sm:$0xff]  ;;  %v343_v14 = vld [vmem:[%s6628_s17 + $0x50] sm:$0xff]  ;;  %v341_v15 = vld [vmem:[%s6628_s17 + $0x40] sm:$0xff] }
  0x1f   : > { %6066 = vmatprep.subr.bf16.mxu0 %v6065_v7  ;;  %v6069_v16 = vpack.c.bf16 %v343_v14, %v340_v13  ;;  %v344_v17 = vld [vmem:[%s6628_s17 + $0x58] sm:$0xff]  ;;  %v339_v18 = vld [vmem:[%s6628_s17 + $0x30] sm:$0xff]  ;;  %v342_v19 = vld [vmem:[%s6628_s17 + $0x48] sm:$0xff] }
  0x20   : > { %6098 = vmatprep.subr.bf16.mxu1 %v6097_v11  ;;  %6068 = vmatpush1.bf16.msra.mxu0 %v6067_v12  ;;  %v6101_v20 = vpack.c.bf16 %v344_v17, %v341_v15  ;;  %v6071_v21 = vpack.c.bf16 %v342_v19, %v339_v18  ;;  %v346_v22 = vld [vmem:[%s6628_s17 + $0x68] sm:$0xff]  ;;  %v349_v23 = vld [vmem:[%s6628_s17 + $0x80] sm:$0xff]  ;;  %v347_v24 = vld [vmem:[%s6628_s17 + $0x70] sm:$0xff]  ;;  %v7692_v17 = vmov 2   ;;  %v7694_v19 = vmov 3  }
  0x21   : > { %6100 = vmatpush3.bf16.msra.mxu1 %v6097_v11  ;;  %6070 = vmatprep.subr.bf16.mxu0 %v6069_v16  ;;  %v6073_v25 = vpack.c.bf16 %v349_v23, %v346_v22  ;;  %v350_v26 = vld [vmem:[%s6628_s17 + $0x88] sm:$0xff]  ;;  %v345_v27 = vld [vmem:[%s6628_s17 + $0x60] sm:$0xff]  ;;  %v348_v28 = vld [vmem:[%s6628_s17 + $0x78] sm:$0xff]  ;;  %v7688_v22 = vmov 5  }
  0x22   : > { %6102 = vmatprep.subr.bf16.mxu1 %v6101_v20  ;;  %v6105_v29 = vpack.c.bf16 %v350_v26, %v347_v24  ;;  %v352_v30 = vld [vmem:[%s6628_s17 + $0x98] sm:$0xff]  ;;  %v355_v31 = vld [vmem:[%s6628_s17 + $0xb0] sm:$0xff]  ;;  %v353_v32 = vld [vmem:[%s6628_s17 + $0xa0] sm:$0xff]  ;;  %v6075_v34 = vpack.c.bf16 %v348_v28, %v345_v27  ;;  %v7685_v24 = vlaneseq }
  0x23   : > { %v356_v33 = vld [vmem:[%s6628_s17 + $0xb8] sm:$0xff]  ;;  %v6077_v35 = vpack.c.bf16 %v355_v31, %v352_v30  ;;  %v351_v36 = vld [vmem:[%s6628_s17 + $0x90] sm:$0xff]  ;;  %v354_v37 = vld [vmem:[%s6628_s17 + $0xa8] sm:$0xff] }
  0x24   : > { %6072 = vmatpush1.bf16.msra.mxu0 %v6071_v21  ;;  %v6109_v38 = vpack.c.bf16 %v356_v33, %v353_v32  ;;  %v358_v39 = vld [vmem:[%s6628_s17 + $0xc8] sm:$0xff]  ;;  %v361_v40 = vld [vmem:[%s6628_s17 + $0xe0] sm:$0xff]  ;;  %v359_v41 = vld [vmem:[%s6628_s17 + $0xd0] sm:$0xff]  ;;  %v6079_v43 = vpack.c.bf16 %v354_v37, %v351_v36  ;;  %v7690_v21 = vmov 4  }
  0x25   : > { %6104 = vmatpush3.bf16.msra.mxu1 %v6101_v20  ;;  %6074 = vmatprep.subr.bf16.mxu0 %v6073_v25  ;;  %v362_v42 = vld [vmem:[%s6628_s17 + $0xe8] sm:$0xff]  ;;  %v6081_v44 = vpack.c.bf16 %v361_v40, %v358_v39  ;;  %v357_v45 = vld [vmem:[%s6628_s17 + $0xc0] sm:$0xff]  ;;  %v360_v46 = vld [vmem:[%s6628_s17 + $0xd8] sm:$0xff]  ;;  %v6770_v25 = vand.u32 127, %v7685_v24 }
  0x26   : > { %6106 = vmatprep.subr.bf16.mxu1 %v6105_v29  ;;  %v6113_v47 = vpack.c.bf16 %v362_v42, %v359_v41  ;;  %v364_v48 = vld [vmem:[%s6628_s17 + $0xf8] sm:$0xff]  ;;  %v367_v49 = vld [vmem:[%s6628_s17 + $0x110] sm:$0xff]  ;;  %v365_v50 = vld [vmem:[%s6628_s17 + $0x100] sm:$0xff]  ;;  %v6083_v52 = vpack.c.bf16 %v360_v46, %v357_v45 }
  0x27   : > { %v368_v51 = vld [vmem:[%s6628_s17 + $0x118] sm:$0xff]  ;;  %v6675_v53 = vld [vmem:[%s6668_s26] sm:$0xff]  ;;  %v6085_v54 = vpack.c.bf16 %v367_v49, %v364_v48  ;;  %v363_v55 = vld [vmem:[%s6628_s17 + $0xf0] sm:$0xff] }
  0x28   : > { %6076 = vmatpush1.bf16.msra.mxu0 %v6075_v34  ;;  %v366_v56 = vld [vmem:[%s6628_s17 + $0x108] sm:$0xff]  ;;  %v6117_v57 = vpack.c.bf16 %v368_v51, %v365_v50  ;;  %v373_v59 = vld [vmem:[%s6628_s17 + $0x140] sm:$0xff]  ;;  %724 = vperm.xlu1 %6367, %v6675_v53   ;;  %v371_v60 = vld [vmem:[%s6628_s17 + $0x130] sm:$0xff] }
  0x29   : > { %6108 = vmatpush3.bf16.msra.mxu1 %v6105_v29  ;;  %6078 = vmatprep.subr.bf16.mxu0 %v6077_v35  ;;  %v370_v58 = vld [vmem:[%s6628_s17 + $0x128] sm:$0xff]  ;;  %v6087_v63 = vpack.c.bf16 %v366_v56, %v363_v55  ;;  %v369_v5 = vld [vmem:[%s6628_s17 + $0x120] sm:$0xff]  ;;  %v372_v6 = vld [vmem:[%s6628_s17 + $0x138] sm:$0xff] }
  0x2a   : > { %6110 = vmatprep.subr.bf16.mxu1 %v6109_v38  ;;  %v374_v61 = vld [vmem:[%s6628_s17 + $0x148] sm:$0xff]  ;;  %538 = vperm.xlu0 %6366, %v6675_v53   ;;  %v6089_v4 = vpack.c.bf16 %v373_v59, %v370_v58  ;;  %v376_v8 = vld [vmem:[%s6628_s17 + $0x158] sm:$0xff]  ;;  %v379_v9 = vld [vmem:[%s6628_s17 + $0x170] sm:$0xff]  ;;  %v6091_v12 = vpack.c.bf16 %v372_v6, %v369_v5 }
  0x2b   : > { %v6685_v62 = vld [vmem:[%s6668_s26 + $0x8] sm:$0xff]  ;;  %v6121_v7 = vpack.c.bf16 %v374_v61, %v371_v60  ;;  %v377_v10 = vld [vmem:[%s6628_s17 + $0x160] sm:$0xff]  ;;  %v380_v11 = vld [vmem:[%s6628_s17 + $0x178] sm:$0xff]  ;;  %v6093_v13 = vpack.c.bf16 %v379_v9, %v376_v8 }
  0x2c   : > { %6080 = vmatpush1.bf16.msra.mxu0 %v6079_v43  ;;  %727 = vperm.xlu1 %6367, %v6685_v62   ;;  %v375_v14 = vld [vmem:[%s6628_s17 + $0x150] sm:$0xff]  ;;  %v378_v15 = vld [vmem:[%s6628_s17 + $0x168] sm:$0xff]  ;;  %v6125_v16 = vpack.c.bf16 %v380_v11, %v377_v10  ;;  %s304_s17 = scalar_lea.vmem [#allocation2], %s5427_s16 }
  0x2d   : > { %6112 = vmatpush3.bf16.msra.mxu1 %v6109_v38  ;;  %6082 = vmatprep.subr.bf16.mxu0 %v6081_v44  ;;  %v6095_v18 = vpack.c.bf16 %v378_v15, %v375_v14  ;;  %v332_v20 = vld [vmem:[%s6623_s14 + $0x8] sm:$0xff]  ;;  %v6723_v23 = vld [vmem:[%s6668_s26 + $0x10] sm:$0xff]  ;;  %s5294_s18 = sshll.u32 %s304_s17, 4  ;;  %s7591_s18 = int_to_ptr.vmem [resolvable:$true] %s5294_s18 }
  0x2e   : > { %6114 = vmatprep.subr.bf16.mxu1 %v6113_v47  ;;  %541 = vperm.xlu0 %6366, %v6685_v62  }
  0x30   : > { %6084 = vmatpush1.bf16.msra.mxu0 %v6083_v52  ;;  %6369 = vset.pattern.permute.xlu1 %v7692_v17 }
  0x31   : > { %6116 = vmatpush3.bf16.msra.mxu1 %v6113_v47  ;;  %6086 = vmatprep.subr.bf16.mxu0 %v6085_v54 }
  0x32   : > { %6118 = vmatprep.subr.bf16.mxu1 %v6117_v57  ;;  %912 = vperm.xlu1 %6369, %v6685_v62  }
  0x33   : > { %6368 = vset.pattern.permute.xlu0 %v7692_v17 }
  0x34   : > { %6088 = vmatpush1.bf16.msra.mxu0 %v6087_v63  ;;  %909 = vperm.xlu0 %6368, %v6675_v53  }
  0x35   : > { %6120 = vmatpush3.bf16.msra.mxu1 %v6117_v57  ;;  %6090 = vmatprep.subr.bf16.mxu0 %v6089_v4 }
  0x36   : > { %6122 = vmatprep.subr.bf16.mxu1 %v6121_v7  ;;  %6370 = vset.pattern.permute.xlu1 %v7694_v19 }
  0x37   : > { %1094 = vperm.xlu1 %6370, %v6675_v53  }
  0x38   : > { %6092 = vmatpush1.bf16.msra.mxu0 %v6091_v12  ;;  %6371 = vset.pattern.permute.xlu0 %v7694_v19 }
  0x39   : > { %6124 = vmatpush3.bf16.msra.mxu1 %v6121_v7  ;;  %6094 = vmatprep.subr.bf16.mxu0 %v6093_v13 }
  0x3a   : > { %6126 = vmatprep.subr.bf16.mxu1 %v6125_v16  ;;  %1097 = vperm.xlu0 %6371, %v6685_v62  }
  0x3b   : > { %6372 = vset.pattern.permute.xlu1 %v7690_v21 }
  0x3c   : > { %6096 = vmatpush1.bf16.msra.mxu0 %v6095_v18  ;;  %1279 = vperm.xlu1 %6372, %v6675_v53  }
  0x3d   : > { %6128 = vmatpush3.bf16.msra.mxu1 %v6125_v16 }
  0x3e   : > { %6373 = vset.pattern.permute.xlu0 %v7688_v22 }
  0x3f   : > { %446 = vmatmul.mubr.f32.vlgmr.msra.gmra.mrb[0].mxu0 %v6631_v3  ;;  %1464 = vperm.xlu0 %6373, %v6675_v53   ;;  %v6716_v3 = vld [vmem:[%s6668_s26 + $0x18] sm:$0xff] }
  0x40   : > { %5823 = vmatmul.mubr.f32.vlgmr.msra.gmra.mrb[0].mxu1 %v332_v20  ;;  %451 = vmatprep.mubr.f32.mxu0 %v7686_v0 }
  0x41   : > { %1282 = vperm.xlu1 %6372, %v6685_v62  }
  0x43   : > { %452 = vmatmul.mubr.f32.gmra.mrb[2].mxu0 %v332_v20  ;;  %6376 = vset.pattern.permute.xlu0 %v7698_v2 }
  0x44   : > { %620 = vmatprep.mubr.f32.mxu0 %v7686_v0  ;;  %1782 = vperm.xlu0 %6376, %v6716_v3  }
  0x45   : > { %6374 = vset.pattern.permute.xlu1 %v7688_v22 }
  0x46   : > { %1467 = vperm.xlu1 %6374, %v6685_v62  }
  0x48   : > { %6378 = vset.pattern.permute.xlu0 %v7692_v17 }
  0x49   : > { %2143 = vperm.xlu0 %6378, %v6723_v23  }
  0x4a   : > { %6375 = vset.pattern.permute.xlu1 %v7698_v2 }
  0x4b   : > { %1779 = vperm.xlu1 %6375, %v6723_v23  }
  0x4d   : > { %6381 = vset.pattern.permute.xlu0 %v7694_v19 }
  0x4e   : > { %2328 = vperm.xlu0 %6381, %v6716_v3  }
  0x4f   : > { %6377 = vset.pattern.permute.xlu1 %v7696_v1 }
  0x50   : > { %1961 = vperm.xlu1 %6377, %v6723_v23  }
  0x52   : > { %6383 = vset.pattern.permute.xlu0 %v7688_v22 }
  0x53   : > { %2689 = vperm.xlu0 %6383, %v6723_v23  }
  0x54   : > { %1964 = vperm.xlu1 %6377, %v6716_v3  }
  0x57   : > { %6386 = vset.pattern.permute.xlu0 %v7698_v2 }
  0x58   : > { %3020 = vperm.xlu0 %6386, %v6685_v62   ;;  %6379 = vset.pattern.permute.xlu1 %v7692_v17 }
  0x59   : > { %2146 = vperm.xlu1 %6379, %v6716_v3  }
  0x5c   : > { %6388 = vset.pattern.permute.xlu0 %v7692_v17 }
  0x5d   : > { %3231 = vperm.xlu0 %6388, %v6675_v53   ;;  %6380 = vset.pattern.permute.xlu1 %v7694_v19 }
  0x5e   : > { %2325 = vperm.xlu1 %6380, %v6723_v23  }
  0x61   : > { %6391 = vset.pattern.permute.xlu0 %v7694_v19 }
  0x62   : > { %3341 = vperm.xlu0 %6391, %v6685_v62   ;;  %6382 = vset.pattern.permute.xlu1 %v7690_v21 }
  0x63   : > { %2507 = vperm.xlu1 %6382, %v6723_v23  }
  0x66   : > { %6393 = vset.pattern.permute.xlu0 %v7688_v22 }
  0x67   : > { %3552 = vperm.xlu0 %6393, %v6675_v53   ;;  %2510 = vperm.xlu1 %6382, %v6716_v3  }
  0x6b   : > { %6395 = vset.pattern.permute.xlu0 %v7696_v1  ;;  %6384 = vset.pattern.permute.xlu1 %v7688_v22 }
  0x6c   : > { %2692 = vperm.xlu1 %6384, %v6716_v3  }
  0x70   : > { %6385 = vset.pattern.permute.xlu1 %v7698_v2 }
  0x71   : > { %3017 = vperm.xlu1 %6385, %v6675_v53  }
  0x75   : > { %6387 = vset.pattern.permute.xlu1 %v7696_v1 }
  0x76   : > { %3124 = vperm.xlu1 %6387, %v6675_v53  }
  0x7a   : > { %3127 = vperm.xlu1 %6387, %v6685_v62  }
  0x7e   : > { %6389 = vset.pattern.permute.xlu1 %v7692_v17 }
  0x7f   : > { %3234 = vperm.xlu1 %6389, %v6685_v62  }
  0x83   : > { %6390 = vset.pattern.permute.xlu1 %v7694_v19 }
  0x84   : > { %3338 = vperm.xlu1 %6390, %v6675_v53  }
  0x88   : > { %6392 = vset.pattern.permute.xlu1 %v7690_v21 }
  0x89   : > { %3445 = vperm.xlu1 %6392, %v6675_v53  }
  0x8d   : > { %3448 = vperm.xlu1 %6392, %v6685_v62  }
  0x91   : > { %6394 = vset.pattern.permute.xlu1 %v7688_v22 }
  0x92   : > { %3555 = vperm.xlu1 %6394, %v6685_v62  }
  0x96   : > { %6396 = vset.pattern.permute.xlu1 %v7696_v1 }
  0xa7   : > { %v725_v26 = vpop.permute.xlu1 %724 }
  0xa8   : > { %vm729_vm1 = vcmp.eq.s32.totalorder %v725_v26, %v6770_v25 }
  0xa9   : > { %v6774_v27 = vsel %vm729_vm1, 1.0, %v7686_v0  ;;  %v539_v34 = vpop.permute.xlu0 %538 }
  0xaa   : > { %5836 = vmatprep.mubr.msk.f32.mxu1 %vm549_vm0, %v6774_v27  ;;  %vm543_vm4 = vcmp.eq.s32.totalorder %v539_v34, %v6770_v25 }
  0xab   : > { %v728_v28 = vpop.permute.xlu1 %727  ;;  %v5435_v52 = vsel %vm543_vm4, 1.0, %v7686_v0 }
  0xac   : > { %vm730_vm2 = vcmp.eq.s32.totalorder %v728_v28, %v6770_v25 }
  0xad   : > { %v542_v36 = vpop.permute.xlu0 %541  ;;  %v5443_v49 = vsel %vm730_vm2, 1.0, %v7686_v0 }
  0xae   : > { %vm544_vm5 = vcmp.eq.s32.totalorder %v542_v36, %v6770_v25 }
  0xaf   : > { %v5436_v56 = vsel %vm544_vm5, 1.0, %v7686_v0 }
  0xb1   : > { %v913_v29 = vpop.permute.xlu1 %912 }
  0xb2   : > { %vm915_vm6 = vcmp.eq.s32.totalorder %v913_v29, %v6770_v25 }
  0xb3   : > { %v910_v43 = vpop.permute.xlu0 %909  ;;  %v5450_v57 = vsel %vm915_vm6, 1.0, %v7686_v0 }
  0xb4   : > { %vm914_vm3 = vcmp.eq.s32.totalorder %v910_v43, %v6770_v25 }
  0xb5   : > { %v5449_v51 = vsel %vm914_vm3, 1.0, %v7686_v0 }
  0xb6   : > { %v1095_v30 = vpop.permute.xlu1 %1094 }
  0xb7   : > { %vm1099_vm7 = vcmp.eq.s32.totalorder %v1095_v30, %v6770_v25 }
  0xb8   : > { %v5456_v58 = vsel %vm1099_vm7, 1.0, %v7686_v0 }
  0xb9   : > { %v1098_v54 = vpop.permute.xlu0 %1097 }
  0xba   : > { %vm1100_vm8 = vcmp.eq.s32.totalorder %v1098_v54, %v6770_v25 }
  0xbb   : > { %v6778_v31 = vpop.permute.xlu1 %1279  ;;  %v5457_v59 = vsel %vm1100_vm8, 1.0, %v7686_v0 }
  0xbc   : > { %vm1284_vm9 = vcmp.eq.s32.totalorder %v6778_v31, %v6770_v25 }
  0xbd   : > { %v5463_v63 = vsel %vm1284_vm9, 1.0, %v7686_v0 }
  0xbe   : > { %v1465_v61 = vpop.permute.xlu0 %1464 }
  0xbf   : > { %vm1469_vm10 = vcmp.eq.s32.totalorder %v1465_v61, %v6770_v25 }
  0xc0   : > { %v6780_v32 = vpop.permute.xlu1 %1282  ;;  %v5470_v5 = vsel %vm1469_vm10, 1.0, %v7686_v0 }
  0xc1   : > { %vm1285_vm11 = vcmp.eq.s32.totalorder %v6780_v32, %v6770_v25 }
  0xc2   : > { %v5464_v6 = vsel %vm1285_vm11, 1.0, %v7686_v0 }
  0xc3   : > { %v1783_v9 = vpop.permute.xlu0 %1782 }
  0xc4   : > { %vm1785_vm14 = vcmp.eq.s32.totalorder %v1783_v9, %v6770_v25 }
  0xc5   : > { %v6782_v33 = vpop.permute.xlu1 %1467  ;;  %v5481_v12 = vsel %vm1785_vm14, 1.0, %v7686_v0 }
  0xc6   : > { %vm1470_vm12 = vcmp.eq.s32.totalorder %v6782_v33, %v6770_v25 }
  0xc7   : > { %v5471_v8 = vsel %vm1470_vm12, 1.0, %v7686_v0 }
  0xc8   : > { %v2144_v13 = vpop.permute.xlu0 %2143 }
  0xc9   : > { %vm2148_vm2 = vcmp.eq.s32.totalorder %v2144_v13, %v6770_v25 }
  0xca   : > { %v6784_v35 = vpop.permute.xlu1 %1779  ;;  %v5492_v18 = vsel %vm2148_vm2, 1.0, %v7686_v0 }
  0xcb   : > { %vm1784_vm13 = vcmp.eq.s32.totalorder %v6784_v35, %v6770_v25 }
  0xcc   : > { %v5480_v10 = vsel %vm1784_vm13, 1.0, %v7686_v0 }
  0xcd   : > { %v2329_v20 = vpop.permute.xlu0 %2328 }
  0xce   : > { %vm2331_vm5 = vcmp.eq.s32.totalorder %v2329_v20, %v6770_v25 }
  0xcf   : > { %v6786_v37 = vpop.permute.xlu1 %1961  ;;  %v6952_v29 = vsel %vm2331_vm5, 1.0, %v7686_v0 }
  0xd0   : > { %vm1966_vm15 = vcmp.eq.s32.totalorder %v6786_v37, %v6770_v25 }
  0xd1   : > { %v5486_v14 = vsel %vm1966_vm15, 1.0, %v7686_v0 }
  0xd2   : > { %v2690_v31 = vpop.permute.xlu0 %2689 }
  0xd3   : > { %v6800_v45 = vpop.permute.xlu1 %1964  ;;  %vm2694_vm7 = vcmp.eq.s32.totalorder %v2690_v31, %v6770_v25 }
  0xd4   : > { %vm1967_vm1 = vcmp.eq.s32.totalorder %v6800_v45, %v6770_v25  ;;  %v5510_v35 = vsel %vm2694_vm7, 1.0, %v7686_v0  ;;  %vm3010_vm7 = vcmp.eq.s32.totalorder %v6675_v53, 15  ;;  %v7726_v53 = vmov 1  }
  0xd5   : > { %v5487_v16 = vsel %vm1967_vm1, 1.0, %v7686_v0 }
  0xd7   : > { %v3021_v34 = vpop.permute.xlu0 %3020 }
  0xd8   : > { %v6816_v50 = vpop.permute.xlu1 %2146  ;;  %vm3023_vm11 = vcmp.eq.s32.totalorder %v3021_v34, %v6770_v25 }
  0xd9   : > { %vm2149_vm3 = vcmp.eq.s32.totalorder %v6816_v50, %v6770_v25 }
  0xdd   : > { %v6834_v55 = vpop.permute.xlu1 %2325 }
  0xde   : > { %vm2330_vm4 = vcmp.eq.s32.totalorder %v6834_v55, %v6770_v25 }
  0xdf   : > { %v5498_v28 = vsel %vm2330_vm4, 1.0, %v7686_v0 }
  0xe2   : > { %v6849_v60 = vpop.permute.xlu1 %2507 }
  0xe3   : > { %vm2512_vm6 = vcmp.eq.s32.totalorder %v6849_v60, %v6770_v25 }
  0xe4   : > { %v5504_v32 = vsel %vm2512_vm6, 1.0, %v7686_v0 }
  0xe6   : > { %v6870_v4 = vpop.permute.xlu1 %2510 }
  0xe7   : > { %vm2513_vm8 = vcmp.eq.s32.totalorder %v6870_v4, %v6770_v25 }
  0xe8   : > { %v5505_v36 = vsel %vm2513_vm8, 1.0, %v7686_v0  ;;  %vm3011_vm8 = vcmp.eq.s32.totalorder %v6685_v62, 15  ;;  %v7727_v62 = vmov 3  }
  0xeb   : > { %v6883_v7 = vpop.permute.xlu1 %2692 }
  0xec   : > { %vm2695_vm9 = vcmp.eq.s32.totalorder %v6883_v7, %v6770_v25 }
  0xed   : > { %v5511_v43 = vsel %vm2695_vm9, 1.0, %v7686_v0  ;;  %vm7156_vm9 = vmpackc.low %vm3011_vm8, %vm3010_vm7 }
  0xf0   : > { %v6899_v11 = vpop.permute.xlu1 %3017 }
  0xf1   : > { %vm3022_vm10 = vcmp.eq.s32.totalorder %v6899_v11, %v6770_v25 }
  0xf2   : > { %v5523_v45 = vsel %vm3022_vm10, 1.0, %v7686_v0  ;;  %vm891_vm10 = vcmp.eq.s32.totalorder %v6770_v25, 1 }
  0xf5   : > { %v6918_v15 = vpop.permute.xlu1 %3124 }
  0xf6   : > { %vm3129_vm1 = vcmp.eq.s32.totalorder %v6918_v15, %v6770_v25 }
  0xf7   : > { %v5527_v55 = vsel %vm3129_vm1, 1.0, %v7686_v0 }
  0xf9   : > { %v6932_v26 = vpop.permute.xlu1 %3127 }
  0xfa   : > { %vm3130_vm2 = vcmp.eq.s32.totalorder %v6932_v26, %v6770_v25 }
  0xfe   : > { %v3235_v30 = vpop.permute.xlu1 %3234 }
  0xff   : > { %vm3237_vm13 = vcmp.eq.s32.totalorder %v3235_v30, %v6770_v25 }
 0x103   : > { %v6969_v33 = vpop.permute.xlu1 %3338 }
 0x108   : > { %v3446_v37 = vpop.permute.xlu1 %3445 }
 0x109   : > { %vm3450_vm14 = vcmp.eq.s32.totalorder %v3446_v37, %v6770_v25 }
 0x112   : > { %v6788_v38 = vpop.f32.mrb[0].mxu0 }
 0x113   : > { %7704 = vst [vmem:[#allocation5_spill] sm:$0xff] %v6788_v38  ;;  %v6790_v39 = vpop.f32.mrb[0].mxu1  ;;  %v449_v40 = vpop.f32.mrb[1].mxu0 }
 0x114   : > { %v6792_v41 = vpop.f32.mrb[1].mxu1 }
 0x115   : > { %v6796_v42 = vpack.c.bf16 %v6790_v39, %v6792_v41 }
 0x116   : > { %v6798_v44 = vpop.f32.mrb[2].mxu0 }
 0x117   : > { %7705 = vst [vmem:[#allocation6_spill] sm:$0xff] %v6798_v44  ;;  %v6805_v46 = vpack.c.bf16 %v6798_v44, %v6788_v38  ;;  %6142 = vmatprep.subr.bf16.mxu1 %v6796_v42  ;;  %v455_v47 = vpop.f32.mrb[3].mxu0 }
 0x118   : > { %v6808_v48 = vpack.c.bf16 %v455_v47, %v449_v40  ;;  %6144 = vmatpush3.bf16.msra.mxu1 %v6796_v42  ;;  %v3232_v40 = vpop.permute.xlu0 %3231  ;;  %v5524_v47 = vsel %vm3023_vm11, 1.0, %v7686_v0  ;;  %vm706_vm11 = vcmp.eq.s32.totalorder %v6770_v25, 0 }
 0x119   : > { %vm3236_vm12 = vcmp.eq.s32.totalorder %v3232_v40, %v6770_v25 }
 0x11a   : > { %6130 = vmatprep.subr.bf16.mxu0 %v6808_v48  ;;  %6146 = vmatprep.subr.bf16.mxu1 %v6808_v48  ;;  %v5531_v50 = vsel %vm3236_vm12, 1.0, %v7686_v0  ;;  %vm1076_vm12 = vcmp.eq.s32.totalorder %v6770_v25, 2 }
 0x11b   : > { %5837 = vmatmul.mubr.msk.f32.vlgmr.msra.gmra.mrb[2].mxu1 %vm549_vm0, %v5443_v49  ;;  %6132 = vmatpush1.bf16.msra.mxu0 %v6805_v46 }
 0x11c   : > { %6148 = vmatpush1.bf16.msra.mxu1 %v6805_v46  ;;  %990 = vmatprep.mubr.f32.mxu1 %v7686_v0  ;;  %v3342_v54 = vpop.permute.xlu0 %3341 }
 0x11d   : > { %6134 = vmatprep.subr.bf16.mxu0 %v6796_v42  ;;  %6158 = vmatprep.subr.bf16.mxu1 %v6796_v42  ;;  %vm3344_vm4 = vcmp.eq.s32.totalorder %v3342_v54, %v6770_v25 }
 0x11e   : > { %5437 = vmatmul.mubr.msk.f32.vlgmr.msra.gmra.mrb[4].mxu0 %vm549_vm0, %v5435_v52 }
 0x11f   : > { %5451 = vmatmul.mubr.msk.f32.vlgmr.msra.gmra.mrb[4].mxu1 %vm549_vm0, %v5449_v51  ;;  %6136 = vmatpush3.bf16.msra.mxu0 %v6796_v42 }
 0x120   : > { %6160 = vmatpush3.bf16.msra.mxu1 %v6796_v42  ;;  %6138 = vmatprep.subr.bf16.mxu0 %v6808_v48 }
 0x121   : > { %6162 = vmatprep.subr.bf16.mxu1 %v6808_v48  ;;  %625 = vmatprep.mubr.f32.mxu0 %v7686_v0 }
 0x122   : > { %995 = vmatprep.mubr.f32.mxu1 %v7686_v0  ;;  %5438 = vmatmul.mubr.msk.f32.gmra.mrb[6].mxu0 %vm549_vm0, %v5436_v56 }
 0x123   : > { %5452 = vmatmul.mubr.msk.f32.gmra.mrb[6].mxu1 %vm549_vm0, %v5450_v57  ;;  %5829 = vmatprep.mubr.msk.f32.mxu0 %vm549_vm0, %v5435_v52  ;;  %v5539_v52 = vsel %vm3450_vm14, 1.0, %v7686_v0  ;;  %vm1446_vm14 = vcmp.eq.s32.totalorder %v6770_v25, 4 }
 0x124   : > { %5850 = vmatprep.mubr.msk.f32.mxu1 %vm549_vm0, %v5456_v58 }
 0x126   : > { %5830 = vmatmul.mubr.msk.f32.vlgmr.msra.gmra.mrb[8].mxu0 %vm549_vm0, %v5436_v56  ;;  %v5528_v56 = vsel %vm3130_vm2, 1.0, %v7686_v0 }
 0x127   : > { %6140 = vmatpush1.bf16.msra.mxu0 %v6805_v46  ;;  %5851 = vmatmul.mubr.msk.f32.vlgmr.msra.gmra.mrb[8].mxu1 %vm549_vm0, %v5457_v59 }
 0x128   : > { %6164 = vmatpush1.bf16.msra.mxu1 %v6805_v46  ;;  %6150 = vmatprep.subr.bf16.mxu0 %v6796_v42 }
 0x129   : > { %6174 = vmatprep.subr.bf16.mxu1 %v6796_v42  ;;  %805 = vmatprep.mubr.f32.mxu0 %v7686_v0 }
 0x12a   : > { %1360 = vmatprep.mubr.f32.mxu1 %v7686_v0  ;;  %5444 = vmatmul.mubr.msk.f32.vlgmr.msra.gmra.mrb[10].mxu0 %vm549_vm0, %v6774_v27  ;;  %v5493_v27 = vsel %vm2149_vm3, 1.0, %v7686_v0  ;;  %vm3343_vm3 = vcmp.eq.s32.totalorder %v6969_v33, %v6770_v25 }
 0x12b   : > { %6152 = vmatpush3.bf16.msra.mxu0 %v6796_v42  ;;  %5465 = vmatmul.mubr.msk.f32.vlgmr.msra.gmra.mrb[10].mxu1 %vm549_vm0, %v5463_v63 }
 0x12c   : > { %6176 = vmatpush3.bf16.msra.mxu1 %v6796_v42  ;;  %6154 = vmatprep.subr.bf16.mxu0 %v6808_v48 }
 0x12d   : > { %6178 = vmatprep.subr.bf16.mxu1 %v6808_v48  ;;  %810 = vmatprep.mubr.f32.mxu0 %v7686_v0 }
 0x12e   : > { %1365 = vmatprep.mubr.f32.mxu1 %v7686_v0  ;;  %5445 = vmatmul.mubr.msk.f32.gmra.mrb[12].mxu0 %vm549_vm0, %v5443_v49  ;;  %v3449_v49 = vpop.permute.xlu1 %3448 }
 0x12f   : > { %5466 = vmatmul.mubr.msk.f32.gmra.mrb[12].mxu1 %vm549_vm0, %v5464_v6  ;;  %5843 = vmatprep.mubr.msk.f32.mxu0 %vm549_vm0, %v5449_v51  ;;  %vm3451_vm15 = vcmp.eq.s32.totalorder %v3449_v49, %v6770_v25  ;;  %v5532_v51 = vsel %vm3237_vm13, 1.0, %v7686_v0  ;;  %vm1261_vm13 = vcmp.eq.s32.totalorder %v6770_v25, 3 }
 0x130   : > { %5864 = vmatprep.mubr.msk.f32.mxu1 %vm549_vm0, %v5470_v5 }
 0x132   : > { %5844 = vmatmul.mubr.msk.f32.vlgmr.msra.gmra.mrb[14].mxu0 %vm549_vm0, %v5450_v57  ;;  %v3556_v57 = vpop.permute.xlu1 %3555 }
 0x133   : > { %6156 = vmatpush1.bf16.msra.mxu0 %v6805_v46  ;;  %5865 = vmatmul.mubr.msk.f32.vlgmr.msra.gmra.mrb[14].mxu1 %vm549_vm0, %v5471_v8  ;;  %vm3558_vm6 = vcmp.eq.s32.totalorder %v3556_v57, %v6770_v25 }
 0x134   : > { %6180 = vmatpush1.bf16.msra.mxu1 %v6805_v46  ;;  %6166 = vmatprep.subr.bf16.mxu0 %v6796_v42  ;;  %v5544_v61 = vsel %vm3558_vm6, 1.0, %v7686_v0 }
 0x135   : > { %6190 = vmatprep.subr.bf16.mxu1 %v6796_v42  ;;  %1175 = vmatprep.mubr.f32.mxu0 %v7686_v0 }
 0x136   : > { %1860 = vmatprep.mubr.f32.mxu1 %v7686_v0  ;;  %5458 = vmatmul.mubr.msk.f32.vlgmr.msra.gmra.mrb[16].mxu0 %vm549_vm0, %v5456_v58  ;;  %v5535_v58 = vsel %vm3343_vm3, 1.0, %v7686_v0 }
 0x137   : > { %6168 = vmatpush3.bf16.msra.mxu0 %v6796_v42  ;;  %5482 = vmatmul.mubr.msk.f32.vlgmr.msra.gmra.mrb[16].mxu1 %vm549_vm0, %v5480_v10 }
 0x138   : > { %6192 = vmatpush3.bf16.msra.mxu1 %v6796_v42  ;;  %6170 = vmatprep.subr.bf16.mxu0 %v6808_v48 }
 0x139   : > { %6194 = vmatprep.subr.bf16.mxu1 %v6808_v48  ;;  %1180 = vmatprep.mubr.f32.mxu0 %v7686_v0 }
 0x13a   : > { %1865 = vmatprep.mubr.f32.mxu1 %v7686_v0  ;;  %5459 = vmatmul.mubr.msk.f32.gmra.mrb[18].mxu0 %vm549_vm0, %v5457_v59  ;;  %v5536_v59 = vsel %vm3344_vm4, 1.0, %v7686_v0 }
 0x13b   : > { %5483 = vmatmul.mubr.msk.f32.gmra.mrb[18].mxu1 %vm549_vm0, %v5481_v12  ;;  %5857 = vmatprep.mubr.msk.f32.mxu0 %vm549_vm0, %v5463_v63 }
 0x13c   : > { %5878 = vmatprep.mubr.msk.f32.mxu1 %vm549_vm0, %v5486_v14 }
 0x13e   : > { %5858 = vmatmul.mubr.msk.f32.vlgmr.msra.gmra.mrb[20].mxu0 %vm549_vm0, %v5464_v6 }
 0x13f   : > { %6172 = vmatpush1.bf16.msra.mxu0 %v6805_v46  ;;  %5879 = vmatmul.mubr.msk.f32.vlgmr.msra.gmra.mrb[20].mxu1 %vm549_vm0, %v5487_v16 }
 0x140   : > { %6196 = vmatpush1.bf16.msra.mxu1 %v6805_v46  ;;  %6182 = vmatprep.subr.bf16.mxu0 %v6796_v42 }
 0x141   : > { %6206 = vmatprep.subr.bf16.mxu1 %v6796_v42  ;;  %1545 = vmatprep.mubr.f32.mxu0 %v7686_v0 }
 0x142   : > { %2224 = vmatprep.mubr.f32.mxu1 %v7686_v0  ;;  %5472 = vmatmul.mubr.msk.f32.vlgmr.msra.gmra.mrb[22].mxu0 %vm549_vm0, %v5470_v5 }
 0x143   : > { %6184 = vmatpush3.bf16.msra.mxu0 %v6796_v42  ;;  %5494 = vmatmul.mubr.msk.f32.vlgmr.msra.gmra.mrb[22].mxu1 %vm549_vm0, %v5492_v18 }
 0x144   : > { %6208 = vmatpush3.bf16.msra.mxu1 %v6796_v42  ;;  %6186 = vmatprep.subr.bf16.mxu0 %v6808_v48 }
 0x145   : > { %6210 = vmatprep.subr.bf16.mxu1 %v6808_v48  ;;  %1550 = vmatprep.mubr.f32.mxu0 %v7686_v0 }
 0x146   : > { %2229 = vmatprep.mubr.f32.mxu1 %v7686_v0  ;;  %5473 = vmatmul.mubr.msk.f32.gmra.mrb[24].mxu0 %vm549_vm0, %v5471_v8 }
 0x147   : > { %5495 = vmatmul.mubr.msk.f32.gmra.mrb[24].mxu1 %vm549_vm0, %v5493_v27  ;;  %5871 = vmatprep.mubr.msk.f32.mxu0 %vm549_vm0, %v5480_v10 }
 0x148   : > { %5892 = vmatprep.mubr.msk.f32.mxu1 %vm549_vm0, %v5498_v28 }
 0x14a   : > { %5872 = vmatmul.mubr.msk.f32.vlgmr.msra.gmra.mrb[26].mxu0 %vm549_vm0, %v5481_v12 }
 0x14b   : > { %6188 = vmatpush1.bf16.msra.mxu0 %v6805_v46  ;;  %5893 = vmatmul.mubr.msk.f32.vlgmr.msra.gmra.mrb[26].mxu1 %vm549_vm0, %v6952_v29 }
 0x14c   : > { %6212 = vmatpush1.bf16.msra.mxu1 %v6805_v46  ;;  %6198 = vmatprep.subr.bf16.mxu0 %v6796_v42 }
 0x14d   : > { %6222 = vmatprep.subr.bf16.mxu1 %v6796_v42  ;;  %2042 = vmatprep.mubr.f32.mxu0 %v7686_v0 }
 0x14e   : > { %2588 = vmatprep.mubr.f32.mxu1 %v7686_v0  ;;  %5488 = vmatmul.mubr.msk.f32.vlgmr.msra.gmra.mrb[28].mxu0 %vm549_vm0, %v5486_v14 }
 0x14f   : > { %6200 = vmatpush3.bf16.msra.mxu0 %v6796_v42  ;;  %5506 = vmatmul.mubr.msk.f32.vlgmr.msra.gmra.mrb[28].mxu1 %vm549_vm0, %v5504_v32 }
 0x150   : > { %6224 = vmatpush3.bf16.msra.mxu1 %v6796_v42  ;;  %6202 = vmatprep.subr.bf16.mxu0 %v6808_v48 }
 0x151   : > { %6226 = vmatprep.subr.bf16.mxu1 %v6796_v42  ;;  %2047 = vmatprep.mubr.f32.mxu0 %v7686_v0 }
 0x152   : > { %2593 = vmatprep.mubr.f32.mxu1 %v7686_v0  ;;  %5489 = vmatmul.mubr.msk.f32.gmra.mrb[30].mxu0 %vm549_vm0, %v5487_v16 }
 0x153   : > { %5507 = vmatmul.mubr.msk.f32.gmra.mrb[30].mxu1 %vm549_vm0, %v5505_v36  ;;  %5885 = vmatprep.mubr.msk.f32.mxu0 %vm549_vm0, %v5492_v18 }
 0x154   : > { %5906 = vmatprep.mubr.msk.f32.mxu1 %vm549_vm0, %v5510_v35 }
 0x156   : > { %5886 = vmatmul.mubr.msk.f32.vlgmr.msra.gmra.mrb[32].mxu0 %vm549_vm0, %v5493_v27 }
 0x157   : > { %6204 = vmatpush1.bf16.msra.mxu0 %v6805_v46  ;;  %5907 = vmatmul.mubr.msk.f32.vlgmr.msra.gmra.mrb[32].mxu1 %vm549_vm0, %v5511_v43 }
 0x158   : > { %6228 = vmatpush3.bf16.msra.mxu1 %v6796_v42  ;;  %6214 = vmatprep.subr.bf16.mxu0 %v6796_v42 }
 0x159   : > { %5913 = vmatprep.mubr.msk.f32.mxu1 %vm549_vm0, %v5523_v45  ;;  %6234 = vmatprep.subr.bf16.mxu1 %v6796_v42 }
 0x15a   : > { %2406 = vmatprep.mubr.f32.mxu0 %v7686_v0 }
 0x15b   : > { %5500 = vmatmul.mubr.msk.f32.vlgmr.msra.gmra.mrb[34].mxu0 %vm549_vm0, %v5498_v28  ;;  %5914 = vmatmul.mubr.msk.f32.vlgmr.msra.gmra.mrb[34].mxu1 %vm549_vm0, %v5524_v47 }
 0x15c   : > { %6216 = vmatpush3.bf16.msra.mxu0 %v6796_v42  ;;  %6236 = vmatpush3.bf16.msra.mxu1 %v6796_v42 }
 0x15d   : > { %6218 = vmatprep.subr.bf16.mxu0 %v6808_v48  ;;  %6242 = vmatprep.subr.bf16.mxu1 %v6796_v42  ;;  %v5540_v48 = vsel %vm3451_vm15, 1.0, %v7686_v0  ;;  %vm1631_vm15 = vcmp.eq.s32.totalorder %v6770_v25, 5 }
 0x15e   : > { %2411 = vmatprep.mubr.f32.mxu0 %v7686_v0  ;;  %5927 = vmatprep.mubr.msk.f32.mxu1 %vm549_vm0, %v5531_v50 }
 0x15f   : > { %5501 = vmatmul.mubr.msk.f32.gmra.mrb[36].mxu0 %vm549_vm0, %v6952_v29  ;;  %5928 = vmatmul.mubr.msk.f32.vlgmr.msra.gmra.mrb[36].mxu1 %vm549_vm0, %v5532_v51 }
 0x160   : > { %6244 = vmatpush3.bf16.msra.mxu1 %v6796_v42  ;;  %5899 = vmatprep.mubr.msk.f32.mxu0 %vm549_vm0, %v5504_v32 }
 0x161   : > { %5941 = vmatprep.mubr.msk.f32.mxu1 %vm549_vm0, %v5539_v52 }
 0x163   : > { %5900 = vmatmul.mubr.msk.f32.vlgmr.msra.gmra.mrb[38].mxu0 %vm549_vm0, %v5505_v36  ;;  %5942 = vmatmul.mubr.msk.f32.vlgmr.msra.gmra.mrb[38].mxu1 %vm549_vm0, %v5540_v48 }
 0x164   : > { %6220 = vmatpush1.bf16.msra.mxu0 %v6805_v46  ;;  %2770 = vmatprep.mubr.f32.mxu0 %v7686_v0  ;;  %v3553_v46 = vpop.permute.xlu0 %3552 }
 0x165   : > { %6230 = vmatprep.subr.bf16.mxu0 %v6796_v42  ;;  %vm3557_vm5 = vcmp.eq.s32.totalorder %v3553_v46, %v6770_v25 }
 0x166   : > { %v5543_v60 = vsel %vm3557_vm5, 1.0, %v7686_v0 }
 0x167   : > { %5512 = vmatmul.mubr.msk.f32.vlgmr.msra.gmra.mrb[40].mxu0 %vm549_vm0, %v5510_v35 }
 0x168   : > { %6232 = vmatpush3.bf16.msra.mxu0 %v6796_v42  ;;  %2775 = vmatprep.mubr.f32.mxu0 %v7686_v0 }
 0x169   : > { %6238 = vmatprep.subr.bf16.mxu0 %v6796_v42 }
 0x16b   : > { %5513 = vmatmul.mubr.msk.f32.gmra.mrb[42].mxu0 %vm549_vm0, %v5511_v43 }
 0x16c   : > { %5920 = vmatprep.mubr.msk.f32.mxu0 %vm549_vm0, %v5527_v55 }
 0x16f   : > { %5921 = vmatmul.mubr.msk.f32.vlgmr.msra.gmra.mrb[44].mxu0 %vm549_vm0, %v5528_v56 }
 0x170   : > { %6240 = vmatpush3.bf16.msra.mxu0 %v6796_v42  ;;  %5934 = vmatprep.mubr.msk.f32.mxu0 %vm549_vm0, %v5535_v58 }
 0x171   : > { %6246 = vmatprep.subr.bf16.mxu0 %v6796_v42 }
 0x173   : > { %5935 = vmatmul.mubr.msk.f32.vlgmr.msra.gmra.mrb[46].mxu0 %vm549_vm0, %v5536_v59 }
 0x174   : > { %6248 = vmatpush3.bf16.msra.mxu0 %v6796_v42  ;;  %5948 = vmatprep.mubr.msk.f32.mxu0 %vm549_vm0, %v5543_v60 }
 0x177   : > { %5949 = vmatmul.mubr.msk.f32.vlgmr.msra.gmra.mrb[48].mxu0 %vm549_vm0, %v5544_v61 }
 0x1ee   : > { %v7058_v63 = vpop.f32.mrb[2].mxu1 }
 0x1ef   : > { %v7060_v4 = vpop.f32.mrb[3].mxu1 }
 0x1f1   : > { %v7062_v5 = vpop.f32.mrb[4].mxu0 }
 0x1f2   : > { %v7064_v6 = vpop.f32.mrb[4].mxu1  ;;  %v624_v7 = vpop.f32.mrb[5].mxu0 }
 0x1f3   : > { %v994_v8 = vpop.f32.mrb[5].mxu1 }
 0x1f5   : > { %v7066_v9 = vpop.f32.mrb[6].mxu0 }
 0x1f6   : > { %v7068_v10 = vpop.f32.mrb[6].mxu1  ;;  %v629_v42 = vpop.f32.mrb[7].mxu0 }
 0x1f7   : > { %v999_v11 = vpop.f32.mrb[7].mxu1 }
 0x1f9   : > { %v7070_v12 = vpop.f32.mrb[8].mxu0 }
 0x1fa   : > { %v7072_v13 = vpop.f32.mrb[9].mxu0  ;;  %v7074_v14 = vpop.f32.mrb[8].mxu1 }
 0x1fb   : > { %v7076_v15 = vpop.f32.mrb[9].mxu1 }
 0x1fd   : > { %v7078_v16 = vpop.f32.mrb[10].mxu0 }
 0x1fe   : > { %v7080_v18 = vpop.f32.mrb[10].mxu1  ;;  %v809_v20 = vpop.f32.mrb[11].mxu0 }
 0x1ff   : > { %7706 = vst [vmem:[#allocation7_spill] sm:$0xff] %v7080_v18  ;;  %v1364_v26 = vpop.f32.mrb[11].mxu1 }
 0x201   : > { %v7082_v27 = vpop.f32.mrb[12].mxu0 }
 0x202   : > { %v7084_v28 = vpop.f32.mrb[12].mxu1  ;;  %v814_v29 = vpop.f32.mrb[13].mxu0 }
 0x203   : > { %7707 = vst [vmem:[#allocation8_spill] sm:$0xff] %v7084_v28  ;;  %v1369_v30 = vpop.f32.mrb[13].mxu1 }
 0x205   : > { %v7086_v31 = vpop.f32.mrb[14].mxu0 }
 0x206   : > { %v7088_v32 = vpop.f32.mrb[14].mxu1  ;;  %v7090_v33 = vpop.f32.mrb[15].mxu0 }
 0x207   : > { %v7092_v34 = vpop.f32.mrb[15].mxu1 }
 0x209   : > { %v7094_v35 = vpop.f32.mrb[16].mxu0 }
 0x20a   : > { %v1862_v36 = vpop.f32.mrb[16].mxu1  ;;  %v1179_v37 = vpop.f32.mrb[17].mxu0 }
 0x20b   : > { %v7096_v40 = vpop.f32.mrb[17].mxu1 }
 0x20c   : > { %7708 = vst [vmem:[#allocation9_spill] sm:$0xff] %v7096_v40 }
 0x20d   : > { %v7098_v43 = vpop.f32.mrb[18].mxu0 }
 0x20e   : > { %7709 = vst [vmem:[#allocation10_spill] sm:$0xff] %v7098_v43  ;;  %v1184_v45 = vpop.f32.mrb[19].mxu0  ;;  %v1867_v47 = vpop.f32.mrb[18].mxu1 }
 0x20f   : > { %v7100_v49 = vpop.f32.mrb[19].mxu1 }
 0x210   : > { %7710 = vst [vmem:[#allocation11_spill] sm:$0xff] %v7100_v49 }
 0x211   : > { %v7102_v50 = vpop.f32.mrb[20].mxu0 }
 0x212   : > { %v7104_v51 = vpop.f32.mrb[20].mxu1  ;;  %v7106_v52 = vpop.f32.mrb[21].mxu0 }
 0x213   : > { %v7108_v48 = vpop.f32.mrb[21].mxu1 }
 0x215   : > { %v7110_v54 = vpop.f32.mrb[22].mxu0 }
 0x216   : > { %7711 = vst [vmem:[#allocation12_spill] sm:$0xff] %v7110_v54  ;;  %v1549_v55 = vpop.f32.mrb[23].mxu0  ;;  %v2226_v46 = vpop.f32.mrb[22].mxu1 }
 0x217   : > { %v7112_v56 = vpop.f32.mrb[23].mxu1 }
 0x218   : > { %7712 = vst [vmem:[#allocation13_spill] sm:$0xff] %v7112_v56 }
 0x219   : > { %v7114_v57 = vpop.f32.mrb[24].mxu0 }
 0x21a   : > { %7713 = vst [vmem:[#allocation14_spill] sm:$0xff] %v7114_v57  ;;  %v2231_v58 = vpop.f32.mrb[24].mxu1  ;;  %v1554_v59 = vpop.f32.mrb[25].mxu0 }
 0x21b   : > { %v7116_v60 = vpop.f32.mrb[25].mxu1 }
 0x21c   : > { %7714 = vst [vmem:[#allocation15_spill] sm:$0xff] %v7116_v60 }
 0x21d   : > { %v7118_v61 = vpop.f32.mrb[26].mxu0 }
 0x21e   : > { %v7120_v7 = vpop.f32.mrb[27].mxu0  ;;  %v7122_v8 = vpop.f32.mrb[26].mxu1 }
 0x21f   : > { %v7124_v42 = vpop.f32.mrb[27].mxu1 }
 0x221   : > { %v2044_v11 = vpop.f32.mrb[28].mxu0 }
 0x222   : > { %v2590_v20 = vpop.f32.mrb[28].mxu1  ;;  %v7126_v26 = vpop.f32.mrb[29].mxu0 }
 0x223   : > { %7715 = vst [vmem:[#allocation16_spill] sm:$0xff] %v7126_v26  ;;  %v7128_v29 = vpop.f32.mrb[29].mxu1 }
 0x224   : > { %7716 = vst [vmem:[#allocation17_spill] sm:$0xff] %v7128_v29 }
 0x225   : > { %v2049_v30 = vpop.f32.mrb[30].mxu0 }
 0x226   : > { %v2595_v36 = vpop.f32.mrb[30].mxu1  ;;  %v7130_v37 = vpop.f32.mrb[31].mxu0 }
 0x227   : > { %7717 = vst [vmem:[#allocation18_spill] sm:$0xff] %v7130_v37  ;;  %v7132_v45 = vpop.f32.mrb[31].mxu1 }
 0x228   : > { %7718 = vst [vmem:[#allocation19_spill] sm:$0xff] %v7132_v45 }
 0x229   : > { %v7134_v47 = vpop.f32.mrb[32].mxu0 }
 0x22a   : > { %v7136_v55 = vpop.f32.mrb[32].mxu1  ;;  %v7138_v46 = vpop.f32.mrb[33].mxu0 }
 0x22b   : > { %v7140_v58 = vpop.f32.mrb[33].mxu1 }
 0x22e   : > { %v2408_v59 = vpop.f32.mrb[34].mxu0  ;;  %v5915_v11 = vpop.f32.mrb[34].mxu1 }
 0x22f   : > { %v7142_v20 = vpop.f32.mrb[35].mxu0  ;;  %v3100_v24 = vpop.f32.mrb[35].mxu1  ;;  %3116 = vperm.xlu0 %6395, %v5915_v11  }
 0x230   : > { %7719 = vst [vmem:[#allocation20_spill] sm:$0xff] %v7142_v20  ;;  %3111 = vperm.xlu1 %6396, %v3100_v24  }
 0x232   : > { %v2413_v30 = vpop.f32.mrb[36].mxu0  ;;  %v5929_v36 = vpop.f32.mrb[36].mxu1 }
 0x233   : > { %v7144_v0 = vpop.f32.mrb[37].mxu0  ;;  %v3314_v22 = vpop.f32.mrb[37].mxu1 }
 0x234   : > { %7720 = vst [vmem:[#allocation21_spill] sm:$0xff] %v7144_v0  ;;  %3330 = vperm.xlu1 %6396, %v5929_v36   ;;  %3325 = vperm.xlu0 %6395, %v3314_v22  }
 0x236   : > { %v7146_v21 = vpop.f32.mrb[38].mxu0  ;;  %v5943_v17 = vpop.f32.mrb[38].mxu1 }
 0x237   : > { %v7148_v19 = vpop.f32.mrb[39].mxu0  ;;  %v3528_v1 = vpop.f32.mrb[39].mxu1 }
 0x238   : > { %3544 = vperm.xlu1 %6396, %v5943_v17   ;;  %3539 = vperm.xlu0 %6395, %v3528_v1   ;;  %v7725_v17 = vmov 0  }
 0x23a   : > { %v2772_v59 = vpop.f32.mrb[40].mxu0 }
 0x23b   : > { %v7150_v2 = vpop.f32.mrb[41].mxu0  ;;  %v7730_v59 = vmov 5  }
 0x23c   : > { %7721 = vst [vmem:[#allocation22_spill] sm:$0xff] %v7150_v2 }
 0x23e   : > { %v2777_v11 = vpop.f32.mrb[42].mxu0 }
 0x23f   : > { %v7152_v24 = vpop.f32.mrb[43].mxu0 }
 0x240   : > { %7722 = vst [vmem:[#allocation23_spill] sm:$0xff] %v7152_v24 }
 0x242   : > { %v5922_v30 = vpop.f32.mrb[44].mxu0 }
 0x243   : > { %3223 = vperm.xlu1 %6396, %v5922_v30   ;;  %v3207_v45 = vpop.f32.mrb[45].mxu0 }
 0x246   : > { %v5936_v29 = vpop.f32.mrb[46].mxu0 }
 0x247   : > { %3218 = vperm.xlu1 %6396, %v3207_v45   ;;  %v3421_v22 = vpop.f32.mrb[47].mxu0  ;;  %v6521_v45 = vmov 1.0|1.0  }
 0x248   : > { %3432 = vperm.xlu0 %6395, %v3421_v22   ;;  %6254 = vmatprep.subr.msk.bf16.mxu0 %vm7156_vm9, %v6521_v45 }
 0x249   : > { %6256 = vmatpush3.bf16.msk.msra.mxu0 %vm7156_vm9, %v6521_v45 }
 0x24a   : > { %v5950_v36 = vpop.f32.mrb[48].mxu0  ;;  %6262 = vmatprep.subr.msk.bf16.mxu0 %vm7156_vm9, %v6521_v45 }
 0x24b   : > { %3437 = vperm.xlu1 %6396, %v5936_v29   ;;  %v3635_v20 = vpop.f32.mrb[49].mxu0  ;;  %v7728_v29 = vmov 2  }
 0x24c   : > { %3646 = vperm.xlu0 %6395, %v3635_v20   ;;  %v7729_v20 = vmov 4  }
 0x24f   : > { %3651 = vperm.xlu1 %6396, %v5950_v36  }
 0x250   : > { %6397 = vset.pattern.permute.xlu0 %v7725_v17 }
 0x251   : > { %3659 = vperm.xlu0 %6397, %v6723_v23  }
 0x253   : > { %6398 = vset.pattern.permute.xlu1 %v7725_v17 }
 0x254   : > { %3662 = vperm.xlu1 %6398, %v6716_v3  }
 0x255   : > { %6400 = vset.pattern.permute.xlu0 %v7726_v53 }
 0x256   : > { %3832 = vperm.xlu0 %6400, %v6716_v3  }
 0x258   : > { %6399 = vset.pattern.permute.xlu1 %v7726_v53 }
 0x259   : > { %3829 = vperm.xlu1 %6399, %v6723_v23  }
 0x25a   : > { %6402 = vset.pattern.permute.xlu0 %v7727_v62 }
 0x25b   : > { %4169 = vperm.xlu0 %6402, %v6723_v23  }
 0x25d   : > { %6401 = vset.pattern.permute.xlu1 %v7728_v29 }
 0x25e   : > { %3999 = vperm.xlu1 %6401, %v6723_v23  }
 0x25f   : > { %6405 = vset.pattern.permute.xlu0 %v7729_v20 }
 0x260   : > { %4342 = vperm.xlu0 %6405, %v6716_v3  }
 0x262   : > { %4002 = vperm.xlu1 %6401, %v6716_v3  }
 0x264   : > { %6409 = vset.pattern.permute.xlu0 %v7725_v17 }
 0x265   : > { %1655 = vperm.xlu0 %6409, %v6790_v39  }
 0x266   : > { %6403 = vset.pattern.permute.xlu1 %v7727_v62 }
 0x267   : > { %4172 = vperm.xlu1 %6403, %v6716_v3  }
 0x269   : > { %6410 = vset.pattern.permute.xlu0 %v7726_v53 }
 0x26a   : > { %711 = vperm.xlu0 %6410, %v7072_v13  }
 0x26b   : > { %6404 = vset.pattern.permute.xlu1 %v7729_v20 }
 0x26c   : > { %4339 = vperm.xlu1 %6404, %v6723_v23  }
 0x26e   : > { %901 = vperm.xlu0 %6410, %v7058_v63   ;;  %v7731_v63 = vmov 0.0  }
 0x270   : > { %6406 = vset.pattern.permute.xlu1 %v7730_v59 }
 0x271   : > { %4509 = vperm.xlu1 %6406, %v6723_v23  }
 0x272   : > { %1086 = vperm.xlu0 %6410, %v7086_v31   ;;  %v7237_v31 = vsel %vm1076_vm12, 1.0, %v7731_v63 }
 0x275   : > { %4512 = vperm.xlu1 %6406, %v6716_v3  }
 0x276   : > { %1953 = vperm.xlu0 %6410, %v7118_v61  }
 0x279   : > { %6407 = vset.pattern.permute.xlu1 %v7726_v53 }
 0x27a   : > { %716 = vperm.xlu1 %6407, %v7070_v12   ;;  %2135 = vperm.xlu0 %6410, %v7104_v51   ;;  %v7230_v12 = vsel %vm706_vm11, 1.0, %v7731_v63 }
 0x27e   : > { %896 = vperm.xlu1 %6407, %v7060_v4   ;;  %1271 = vperm.xlu0 %6410, %v7074_v14   ;;  %v7227_v4 = vsel %vm891_vm10, 1.0, %v7731_v63 }
 0x282   : > { %1081 = vperm.xlu1 %6407, %v7090_v33   ;;  %1451 = vperm.xlu0 %6410, %v7106_v52   ;;  %v7244_v52 = vsel %vm1261_vm13, 1.0, %v7731_v63 }
 0x286   : > { %1948 = vperm.xlu1 %6407, %v7120_v7   ;;  %2499 = vperm.xlu0 %6410, %v7122_v8   ;;  %v7249_v7 = vsel %vm1446_vm14, 1.0, %v7731_v63 }
 0x28a   : > { %2130 = vperm.xlu1 %6407, %v7108_v48   ;;  %1641 = vperm.xlu0 %6410, %v7088_v32  }
 0x28e   : > { %1266 = vperm.xlu1 %6407, %v7076_v15   ;;  %2681 = vperm.xlu0 %6410, %v7146_v21  }
 0x292   : > { %6408 = vset.pattern.permute.xlu1 %v7725_v17  ;;  %2863 = vperm.xlu0 %6410, %v7136_v55  }
 0x293   : > { %1650 = vperm.xlu1 %6408, %v6792_v41  }
 0x296   : > { %6413 = vset.pattern.permute.xlu0 %v7725_v17 }
 0x297   : > { %6411 = vset.pattern.permute.xlu1 %v7726_v53 }
 0x298   : > { %2312 = vperm.xlu1 %6411, %v7138_v46  }
 0x29c   : > { %2317 = vperm.xlu1 %6411, %v7134_v47   ;;  %v7252_v47 = vsel %vm1631_vm15, 1.0, %v7731_v63 }
 0x2a0   : > { %1456 = vperm.xlu1 %6411, %v7102_v50  }
 0x2a4   : > { %2494 = vperm.xlu1 %6411, %v7124_v42  }
 0x2a8   : > { %1636 = vperm.xlu1 %6411, %v7092_v34  }
 0x2ac   : > { %2676 = vperm.xlu1 %6411, %v7148_v19  }
 0x2ae   : > { %v3117_v23 = vpop.permute.xlu0 %3116 }
 0x2af   : > { %v3112_v21 = vpop.permute.xlu1 %3111  ;;  %v3120_v15 = vmul.f32 %v7230_v12, %v3117_v23 }
 0x2b0   : > { %2858 = vperm.xlu1 %6411, %v7140_v58   ;;  %v3119_v33 = vmul.f32 %v7230_v12, %v3112_v21 }
 0x2b3   : > { %v3331_v3 = vpop.permute.xlu1 %3330  ;;  %v3326_v41 = vpop.permute.xlu0 %3325 }
 0x2b4   : > { %6412 = vset.pattern.permute.xlu1 %v7725_v17  ;;  %v3334_v48 = vmul.f32 %v7237_v31, %v3331_v3  ;;  %v3333_v61 = vmul.f32 %v7237_v31, %v3326_v41 }
 0x2b7   : > { %v3545_v39 = vpop.permute.xlu1 %3544  ;;  %v3540_v13 = vpop.permute.xlu0 %3539 }
 0x2b8   : > { %v3548_v22 = vmul.f32 %v7249_v7, %v3545_v39  ;;  %v3547_v36 = vmul.f32 %v7249_v7, %v3540_v13 }
 0x2c2   : > { %v3224_v19 = vpop.permute.xlu1 %3223 }
 0x2c3   : > { %v3227_v14 = vmul.f32 %v7227_v4, %v3224_v19 }
 0x2c5   : > { %v3229_v34 = vadd.f32 %v3227_v14, %v3120_v15 }
 0x2c6   : > { %v3219_v32 = vpop.permute.xlu1 %3218 }
 0x2c7   : > { %v3226_v50 = vmul.f32 %v7227_v4, %v3219_v32  ;;  %v3433_v51 = vpop.permute.xlu0 %3432  ;;  %v3336_v55 = vadd.f32 %v3334_v48, %v3229_v34 }
 0x2c8   : > { %v3440_v11 = vmul.f32 %v7244_v52, %v3433_v51 }
 0x2c9   : > { %v3228_v8 = vadd.f32 %v3226_v50, %v3119_v33 }
 0x2ca   : > { %v3438_v42 = vpop.permute.xlu1 %3437 }
 0x2cb   : > { %v3441_v46 = vmul.f32 %v7244_v52, %v3438_v42  ;;  %v3335_v58 = vadd.f32 %v3333_v61, %v3228_v8  ;;  %v3647_v30 = vpop.permute.xlu0 %3646 }
 0x2cc   : > { %v3654_v23 = vmul.f32 %v7252_v47, %v3647_v30 }
 0x2cd   : > { %v3443_v21 = vadd.f32 %v3441_v46, %v3336_v55  ;;  %v3442_v3 = vadd.f32 %v3440_v11, %v3335_v58 }
 0x2ce   : > { %v3652_v41 = vpop.permute.xlu1 %3651 }
 0x2cf   : > { %v3550_v19 = vadd.f32 %v3548_v22, %v3443_v21  ;;  %v3655_v14 = vmul.f32 %v7252_v47, %v3652_v41  ;;  %v3549_v15 = vadd.f32 %v3547_v36, %v3442_v3 }
 0x2d0   : > { %v3660_v32 = vpop.permute.xlu0 %3659 }
 0x2d1   : > { %v3657_v33 = vadd.f32 %v3655_v14, %v3550_v19  ;;  %v3656_v34 = vadd.f32 %v3654_v23, %v3549_v15  ;;  %vm3664_vm1 = vcmp.eq.s32.totalorder %v3660_v32, %v6770_v25 }
 0x2d2   : > { %v5547_v50 = vsel %vm3664_vm1, 1.0, %v7731_v63 }
 0x2d3   : > { %v7262_v51 = vpack.c.bf16 %v3657_v33, %v3656_v34  ;;  %v3663_v39 = vpop.permute.xlu1 %3662  ;;  %5955 = vmatprep.mubr.msk.f32.mxu1 %vm549_vm0, %v5547_v50  ;;  %5962 = vmatprep.mubr.msk.f32.mxu0 %vm549_vm0, %v5547_v50 }
 0x2d4   : > { %vm3665_vm2 = vcmp.eq.s32.totalorder %v3663_v39, %v6770_v25 }
 0x2d5   : > { %v5548_v13 = vsel %vm3665_vm2, 1.0, %v7731_v63  ;;  %6250 = vmatprep.subr.bf16.mxu1 %v7262_v51  ;;  %v3833_v48 = vpop.permute.xlu0 %3832 }
 0x2d6   : > { %6252 = vmatpush3.bf16.msra.mxu1 %v7262_v51  ;;  %5963 = vmatmul.mubr.msk.f32.vlgmr.msra.gmra.mrb[50].mxu0 %vm549_vm0, %v5548_v13  ;;  %vm3835_vm3 = vcmp.eq.s32.totalorder %v3833_v48, %v6770_v25 }
 0x2d7   : > { %6258 = vmatprep.subr.bf16.mxu1 %v7262_v51  ;;  %6264 = vmatpush3.bf16.msk.msra.mxu0 %vm7156_vm9, %v6521_v45  ;;  %v5556_v8 = vsel %vm3835_vm3, 1.0, %v7731_v63  ;;  %vm4719_vm3 = vcmask 1045504  }
 0x2d8   : > { %v3830_v61 = vpop.permute.xlu1 %3829  ;;  %6270 = vmatprep.subr.msk.bf16.mxu0 %vm7156_vm9, %v6521_v45 }
 0x2d9   : > { %vm3834_vm4 = vcmp.eq.s32.totalorder %v3830_v61, %v6770_v25  ;;  %5956 = vmatmul.mubr.msk.f32.vlgmr.msra.gmra.mrb[40].mxu1 %vm549_vm0, %v5548_v13 }
 0x2da   : > { %v5555_v42 = vsel %vm3834_vm4, 1.0, %v7731_v63  ;;  %6260 = vmatpush3.bf16.msra.mxu1 %v7262_v51  ;;  %v4170_v55 = vpop.permute.xlu0 %4169 }
 0x2db   : > { %6266 = vmatprep.subr.bf16.mxu1 %v7262_v51  ;;  %5969 = vmatprep.mubr.msk.f32.mxu1 %vm549_vm0, %v5555_v42  ;;  %vm4174_vm6 = vcmp.eq.s32.totalorder %v4170_v55, %v6770_v25 }
 0x2dc   : > { %5976 = vmatprep.mubr.msk.f32.mxu0 %vm549_vm0, %v5555_v42  ;;  %v5571_v22 = vsel %vm4174_vm6, 1.0, %v7731_v63 }
 0x2dd   : > { %v4000_v46 = vpop.permute.xlu1 %3999  ;;  %5970 = vmatmul.mubr.msk.f32.vlgmr.msra.gmra.mrb[42].mxu1 %vm549_vm0, %v5556_v8  ;;  %5977 = vmatmul.mubr.msk.f32.vlgmr.msra.gmra.mrb[52].mxu0 %vm549_vm0, %v5556_v8 }
 0x2de   : > { %vm4004_vm5 = vcmp.eq.s32.totalorder %v4000_v46, %v6770_v25  ;;  %6268 = vmatpush3.bf16.msra.mxu1 %v7262_v51  ;;  %6272 = vmatpush3.bf16.msk.msra.mxu0 %vm7156_vm9, %v6521_v45 }
 0x2df   : > { %v5563_v58 = vsel %vm4004_vm5, 1.0, %v7731_v63  ;;  %6274 = vmatprep.subr.bf16.mxu1 %v7262_v51  ;;  %6278 = vmatprep.subr.msk.bf16.mxu0 %vm7156_vm9, %v6521_v45  ;;  %v4343_v11 = vpop.permute.xlu0 %4342 }
 0x2e0   : > { %5983 = vmatprep.mubr.msk.f32.mxu1 %vm549_vm0, %v5563_v58  ;;  %5990 = vmatprep.mubr.msk.f32.mxu0 %vm549_vm0, %v5563_v58  ;;  %vm4345_vm10 = vcmp.eq.s32.totalorder %v4343_v11, %v6770_v25 }
 0x2e1   : > { %v4003_v30 = vpop.permute.xlu1 %4002  ;;  %v5580_v19 = vsel %vm4345_vm10, 1.0, %v7731_v63 }
 0x2e2   : > { %vm4005_vm7 = vcmp.eq.s32.totalorder %v4003_v30, %v6770_v25 }
 0x2e3   : > { %v5564_v36 = vsel %vm4005_vm7, 1.0, %v7731_v63 }
 0x2e4   : > { %5984 = vmatmul.mubr.msk.f32.vlgmr.msra.gmra.mrb[44].mxu1 %vm549_vm0, %v5564_v36  ;;  %5991 = vmatmul.mubr.msk.f32.vlgmr.msra.gmra.mrb[54].mxu0 %vm549_vm0, %v5564_v36  ;;  %v7313_v3 = vpop.permute.xlu0 %1655 }
 0x2e5   : > { %6276 = vmatpush3.bf16.msra.mxu1 %v7262_v51  ;;  %5997 = vmatprep.mubr.msk.f32.mxu1 %vm549_vm0, %v5571_v22 }
 0x2e6   : > { %6282 = vmatprep.subr.bf16.mxu1 %v7262_v51  ;;  %v4173_v21 = vpop.permute.xlu1 %4172  ;;  %6280 = vmatpush3.bf16.msk.msra.mxu0 %vm7156_vm9, %v6521_v45 }
 0x2e7   : > { %vm4175_vm8 = vcmp.eq.s32.totalorder %v4173_v21, %v6770_v25  ;;  %6004 = vmatprep.mubr.msk.f32.mxu0 %vm549_vm0, %v5571_v22  ;;  %6286 = vmatprep.subr.msk.bf16.mxu0 %vm7156_vm9, %v6521_v45 }
 0x2e8   : > { %v5572_v23 = vsel %vm4175_vm8, 1.0, %v7731_v63 }
 0x2e9   : > { %5998 = vmatmul.mubr.msk.f32.vlgmr.msra.gmra.mrb[46].mxu1 %vm549_vm0, %v5572_v23  ;;  %6005 = vmatmul.mubr.msk.f32.vlgmr.msra.gmra.mrb[56].mxu0 %vm549_vm0, %v5572_v23  ;;  %v712_v14 = vpop.permute.xlu0 %711 }
 0x2ea   : > { %6284 = vmatpush3.bf16.msra.mxu1 %v7262_v51  ;;  %6288 = vmatpush3.bf16.msk.msra.mxu0 %vm7156_vm9, %v6521_v45 }
 0x2eb   : > { %6290 = vmatprep.subr.bf16.mxu1 %v7262_v51  ;;  %v4340_v41 = vpop.permute.xlu1 %4339  ;;  %6294 = vmatprep.subr.msk.bf16.mxu0 %vm7156_vm9, %v6521_v45 }
 0x2ec   : > { %vm4344_vm11 = vcmp.eq.s32.totalorder %v4340_v41, %v6770_v25 }
 0x2ed   : > { %v5579_v15 = vsel %vm4344_vm11, 1.0, %v7731_v63  ;;  %v902_v34 = vpop.permute.xlu0 %901 }
 0x2ee   : > { %6011 = vmatprep.mubr.msk.f32.mxu1 %vm549_vm0, %v5579_v15  ;;  %6018 = vmatprep.mubr.msk.f32.mxu0 %vm549_vm0, %v5579_v15  ;;  %v905_v22 = vmul.f32 %v7227_v4, %v902_v34 }
 0x2ef   : > { %6012 = vmatmul.mubr.msk.f32.vlgmr.msra.gmra.mrb[48].mxu1 %vm549_vm0, %v5580_v19  ;;  %6019 = vmatmul.mubr.msk.f32.vlgmr.msra.gmra.mrb[58].mxu0 %vm549_vm0, %v5580_v19 }
 0x2f0   : > { %6292 = vmatpush3.bf16.msra.mxu1 %v7262_v51  ;;  %v4510_v32 = vpop.permute.xlu1 %4509  ;;  %6296 = vmatpush3.bf16.msk.msra.mxu0 %vm7156_vm9, %v6521_v45 }
 0x2f1   : > { %vm4514_vm12 = vcmp.eq.s32.totalorder %v4510_v32, %v6770_v25  ;;  %v1087_v1 = vpop.permute.xlu0 %1086 }
 0x2f2   : > { %v5587_v33 = vsel %vm4514_vm12, 1.0, %v7731_v63  ;;  %v1090_v41 = vmul.f32 %v7237_v31, %v1087_v1 }
 0x2f3   : > { %6025 = vmatprep.mubr.msk.f32.mxu1 %vm549_vm0, %v5587_v33  ;;  %6032 = vmatprep.mubr.msk.f32.mxu0 %vm549_vm0, %v5587_v33 }
 0x2f4   : > { %v4513_v50 = vpop.permute.xlu1 %4512 }
 0x2f5   : > { %vm4515_vm13 = vcmp.eq.s32.totalorder %v4513_v50, %v6770_v25  ;;  %v1954_v13 = vpop.permute.xlu0 %1953 }
 0x2f6   : > { %v5588_v39 = vsel %vm4515_vm13, 1.0, %v7731_v63 }
 0x2f7   : > { %6026 = vmatmul.mubr.msk.f32.vlgmr.msra.gmra.mrb[50].mxu1 %vm549_vm0, %v5588_v39  ;;  %6033 = vmatmul.mubr.msk.f32.vlgmr.msra.gmra.mrb[60].mxu0 %vm549_vm0, %v5588_v39  ;;  %v1957_v39 = vmul.f32 %v7230_v12, %v1954_v13  ;;  %vm1660_vm0 = vcmask 48128  }
 0x2f9   : > { %v717_v45 = vpop.permute.xlu1 %716  ;;  %v2136_v61 = vpop.permute.xlu0 %2135 }
 0x2fa   : > { %v720_v30 = vmul.f32 %v7230_v12, %v717_v45  ;;  %v2139_v19 = vmul.f32 %v7227_v4, %v2136_v61  ;;  %v719_v45 = vmul.f32 %v7230_v12, %v712_v14 }
 0x2fc   : > { %v907_v23 = vadd.f32 %v905_v22, %v720_v30  ;;  %v2141_v30 = vadd.f32 %v2139_v19, %v1957_v39 }
 0x2fd   : > { %v897_v51 = vpop.permute.xlu1 %896  ;;  %v1272_v55 = vpop.permute.xlu0 %1271 }
 0x2fe   : > { %v904_v32 = vmul.f32 %v7227_v4, %v897_v51  ;;  %v1092_v33 = vadd.f32 %v1090_v41, %v907_v23  ;;  %v1275_v50 = vmul.f32 %v7244_v52, %v1272_v55 }
 0x300   : > { %v906_v1 = vadd.f32 %v904_v32, %v719_v45  ;;  %v1277_v0 = vadd.f32 %v1275_v50, %v1092_v33 }
 0x301   : > { %v1082_v48 = vpop.permute.xlu1 %1081  ;;  %v1452_v58 = vpop.permute.xlu0 %1451 }
 0x302   : > { %v1089_v34 = vmul.f32 %v7237_v31, %v1082_v48  ;;  %v1459_v19 = vmul.f32 %v7249_v7, %v1452_v58 }
 0x304   : > { %v1091_v23 = vadd.f32 %v1089_v34, %v906_v1 }
 0x305   : > { %v1949_v8 = vpop.permute.xlu1 %1948  ;;  %v2500_v36 = vpop.permute.xlu0 %2499 }
 0x306   : > { %v2503_v37 = vmul.f32 %v7244_v52, %v2500_v36 }
 0x309   : > { %v2131_v42 = vpop.permute.xlu1 %2130  ;;  %v1642_v24 = vpop.permute.xlu0 %1641 }
 0x30a   : > { %v1645_v14 = vmul.f32 %v7252_v47, %v1642_v24 }
 0x30d   : > { %v1267_v46 = vpop.permute.xlu1 %1266  ;;  %v2682_v60 = vpop.permute.xlu0 %2681 }
 0x30e   : > { %v1274_v61 = vmul.f32 %v7244_v52, %v1267_v46  ;;  %v1956_v46 = vmul.f32 %v7230_v12, %v1949_v8  ;;  %v2685_v39 = vmul.f32 %v7249_v7, %v2682_v60 }
 0x310   : > { %v1276_v48 = vadd.f32 %v1274_v61, %v1091_v23 }
 0x311   : > { %v2864_v34 = vpop.permute.xlu0 %2863 }
 0x312   : > { %v7351_v11 = vpop.permute.xlu1 %1650  ;;  %v2867_v12 = vmul.f32 %v7252_v47, %v2864_v34 }
 0x317   : > { %v2313_v21 = vpop.permute.xlu1 %2312 }
 0x31b   : > { %v2318_v15 = vpop.permute.xlu1 %2317 }
 0x31c   : > { %v2321_v2 = vmul.f32 %v7237_v31, %v2318_v15  ;;  %v2138_v15 = vmul.f32 %v7227_v4, %v2131_v42 }
 0x31e   : > { %v2323_v41 = vadd.f32 %v2321_v2, %v2141_v30  ;;  %v1461_v2 = vadd.f32 %v1459_v19, %v1276_v48  ;;  %v2140_v36 = vadd.f32 %v2138_v15, %v1956_v46 }
 0x31f   : > { %v1457_v22 = vpop.permute.xlu1 %1456 }
 0x320   : > { %v1460_v51 = vmul.f32 %v7249_v7, %v1457_v22  ;;  %v2505_v32 = vadd.f32 %v2503_v37, %v2323_v41 }
 0x322   : > { %v1462_v55 = vadd.f32 %v1460_v51, %v1277_v0  ;;  %v2320_v0 = vmul.f32 %v7237_v31, %v2313_v21  ;;  %v2687_v24 = vadd.f32 %v2685_v39, %v2505_v32 }
 0x323   : > { %v2495_v13 = vpop.permute.xlu1 %2494 }
 0x324   : > { %v1647_v33 = vadd.f32 %v1645_v14, %v1462_v55  ;;  %v2502_v4 = vmul.f32 %v7244_v52, %v2495_v13  ;;  %v2322_v8 = vadd.f32 %v2320_v0, %v2140_v36  ;;  %v2869_v1 = vadd.f32 %v2867_v12, %v2687_v24 }
 0x326   : > { %v7374_v30 = vmul.f32 %v7313_v3, %v1647_v33  ;;  %v2504_v58 = vadd.f32 %v2502_v4, %v2322_v8  ;;  %v7388_v55 = vmul.f32 %v2869_v1, %v7313_v3 }
 0x327   : > { %v1637_v50 = vpop.permute.xlu1 %1636 }
 0x328   : > { %v1644_v45 = vmul.f32 %v7252_v47, %v1637_v50  ;;  %v1662_v22 = vsel %vm1660_vm0, %v7374_v30, inf  ;;  %v2873_v14 = vsel %vm1660_vm0, %v7388_v55, inf }
 0x32a   : > { %v1646_v37 = vadd.f32 %v1644_v45, %v1461_v2 }
 0x32b   : > { %v2677_v42 = vpop.permute.xlu1 %2676 }
 0x32c   : > { %v7379_v60 = vmul.f32 %v7351_v11, %v1646_v37  ;;  %v2684_v31 = vmul.f32 %v7249_v7, %v2677_v42 }
 0x32e   : > { %v1661_v21 = vsel %vm1660_vm0, %v7379_v60, inf  ;;  %v2686_v51 = vadd.f32 %v2684_v31, %v2504_v58 }
 0x32f   : > { %v2859_v52 = vpop.permute.xlu1 %2858  ;;  %v1663_v61 = vmin.f32 %v1661_v21, %v1662_v22 }
 0x330   : > { %v2866_v23 = vmul.f32 %v7252_v47, %v2859_v52 }
 0x331   : > { %1664 = vmin.xlane.f32.xlu1 %v1663_v61 }
 0x332   : > { %v2868_v41 = vadd.f32 %v2866_v23, %v2686_v51 }
 0x334   : > { %v7391_v7 = vmul.f32 %v2868_v41, %v7351_v11 }
 0x336   : > { %v2872_v13 = vsel %vm1660_vm0, %v7391_v7, inf }
 0x337   : > { %v2874_v48 = vmin.f32 %v2872_v13, %v2873_v14 }
 0x339   : > { %2875 = vmin.xlane.f32.xlu0 %v2874_v48 }
 0x3a9   : > { %v7397_v15 = vpop.f32.mrb[50].mxu0 }
 0x3aa   : > { %v7399_v19 = vpop.f32.mrb[51].mxu0  ;;  %vm4706_vm6 = vcmp.gt.f32.partialorder %v7397_v15, 0.5  ;;  %v5610_v15 = vadd.s32 4294967278, %v6770_v25 }
 0x3ab   : > { %vm4705_vm7 = vcmp.gt.f32.partialorder %v7399_v19, 0.5 }
 0x3ac   : > { %v5957_v47 = vpop.f32.mrb[40].mxu1 }
 0x3ad   : > { %v3742_v32 = vpop.f32.mrb[41].mxu1  ;;  %v7422_v1 = vmul.f32 %v5957_v47, %v7313_v3 }
 0x3ae   : > { %v7430_v41 = vmul.f32 %v3742_v32, %v7351_v11 }
 0x3b0   : > { %v5971_v33 = vpop.f32.mrb[42].mxu1  ;;  %v7401_v46 = vpop.f32.mrb[52].mxu0 }
 0x3b1   : > { %v3912_v50 = vpop.f32.mrb[43].mxu1  ;;  %v7403_v39 = vpop.f32.mrb[53].mxu0  ;;  %v7414_v8 = vmul.f32 %v5971_v33, %v7313_v3  ;;  %vm4801_vm11 = vcmp.gt.f32.partialorder %v7401_v46, 0.5 }
 0x3b2   : > { %v7417_v58 = vmul.f32 %v3912_v50, %v7351_v11  ;;  %vm4800_vm8 = vcmp.gt.f32.partialorder %v7403_v39, 0.5 }
 0x3b3   : > { %v4679_v14 = vmin.f32 %v7422_v1, %v7414_v8 }
 0x3b4   : > { %v4678_v33 = vmin.f32 %v7430_v41, %v7417_v58 }
 0x3b7   : > { %v5985_v0 = vpop.f32.mrb[44].mxu1  ;;  %v7405_v2 = vpop.f32.mrb[54].mxu0 }
 0x3b8   : > { %v4082_v45 = vpop.f32.mrb[45].mxu1  ;;  %v7407_v36 = vpop.f32.mrb[55].mxu0  ;;  %v7425_v52 = vmul.f32 %v5985_v0, %v7313_v3 }
 0x3b9   : > { %v7433_v13 = vmul.f32 %v4082_v45, %v7351_v11  ;;  %vm4894_vm12 = vcmp.gt.f32.partialorder %v7407_v36, 0.5 }
 0x3ba   : > { %v4681_v32 = vmin.f32 %v4679_v14, %v7425_v52 }
 0x3bb   : > { %v4680_v49 = vmin.f32 %v4678_v33, %v7433_v13 }
 0x3bc   : > { %v5999_v34 = vpop.f32.mrb[46].mxu1  ;;  %v7409_v24 = vpop.f32.mrb[56].mxu0 }
 0x3bd   : > { %v4252_v4 = vpop.f32.mrb[47].mxu1  ;;  %v7411_v37 = vpop.f32.mrb[57].mxu0  ;;  %v7438_v48 = vmul.f32 %v5999_v34, %v7313_v3 }
 0x3be   : > { %v1665_v42 = vpop.xlane.xlu1 %1664  ;;  %v7443_v50 = vmul.f32 %v4252_v4, %v7351_v11 }
 0x3bf   : > { %v1666_v12 = vrot.slane %v1665_v42, 4 }
 0x3c0   : > { %v4682_v4 = vmin.f32 %v4680_v49, %v7443_v50 }
 0x3c1   : > { %v1667_v31 = vmin.f32 %v1665_v42, %v1666_v12 }
 0x3c2   : > { %v6013_v21 = vpop.f32.mrb[48].mxu1  ;;  %v7419_v22 = vpop.f32.mrb[58].mxu0 }
 0x3c3   : > { %v1668_v61 = vrot.slane %v1667_v31, 2  ;;  %v4422_v51 = vpop.f32.mrb[49].mxu1  ;;  %v7427_v23 = vpop.f32.mrb[59].mxu0  ;;  %v7447_v42 = vmul.f32 %v6013_v21, %v7313_v3 }
 0x3c4   : > { %v7451_v34 = vmul.f32 %v4422_v51, %v7351_v11 }
 0x3c5   : > { %v1669_v47 = vmin.f32 %v1667_v31, %v1668_v61  ;;  %v4683_v31 = vmin.f32 %v4681_v32, %v7438_v48 }
 0x3c6   : > { %v2876_v0 = vpop.xlane.xlu0 %2875  ;;  %v4684_v32 = vmin.f32 %v4682_v4, %v7451_v34  ;;  %v6447_v4 = vld [vmem:[%s6668_s26 + $0x8] sm:$0xff] }
 0x3c7   : > { %v2877_v45 = vrot.slane %v2876_v0, 4  ;;  %v1670_v12 = vrot.slane %v1669_v47, 1  ;;  %v4685_v14 = vmin.f32 %v4683_v31, %v7447_v42  ;;  %vm1675_vm14 = vcmp.ne.s32.totalorder %v6447_v4, 15 }
 0x3c9   : > { %v2878_v61 = vmin.f32 %v2876_v0, %v2877_v45  ;;  %v1671_v56 = vmin.f32 %v1669_v47, %v1670_v12 }
 0x3ca   : > { %v6027_v26 = vpop.f32.mrb[50].mxu1  ;;  %v7455_v40 = vpop.f32.mrb[60].mxu0 }
 0x3cb   : > { %v2879_v21 = vrot.slane %v2878_v61, 2  ;;  %v7459_v44 = vmul.f32 %v6027_v26, %v7313_v3  ;;  %6310 = vpush %v1671_v56  ;;  %v4592_v33 = vpop.f32.mrb[51].mxu1  ;;  %v7461_v51 = vpop.f32.mrb[61].mxu0 }
 0x3cc   : > { %v7465_v47 = vmul.f32 %v4592_v33, %v7351_v11  ;;  %v6446_v11 = vld [vmem:[%s6668_s26] sm:$0xff] }
 0x3cd   : > { %v4687_v49 = vmin.f32 %v4685_v14, %v7459_v44  ;;  %v2880_v0 = vmin.f32 %v2878_v61, %v2879_v21  ;;  %vm1674_vm9 = vcmp.ne.s32.totalorder %v6446_v11, 15 }
 0x3ce   : > { %v4686_v45 = vmin.f32 %v4684_v32, %v7465_v47 }
 0x3cf   : > { %v4689_v12 = vsel %vm1660_vm0, %v4687_v49, inf  ;;  %v2881_v26 = vrot.slane %v2880_v0, 1  ;;  %v6448_v49 = vld [vmem:[%s6668_s26 + $0x18] sm:$0xff] }
 0x3d0   : > { %v4688_v56 = vsel %vm1660_vm0, %v4686_v45, inf  ;;  %vm2886_vm15 = vcmp.ne.s32.totalorder %v6448_v49, 15 }
 0x3d1   : > { %v4690_v3 = vmin.f32 %v4688_v56, %v4689_v12  ;;  %v2882_v31 = vmin.f32 %v2880_v0, %v2881_v26  ;;  %v6449_v0 = vld [vmem:[%s6668_s26 + $0x10] sm:$0xff]  ;;  %v7732_v56 = vlaneseq }
 0x3d2   : > { %vm2885_vm1 = vcmp.ne.s32.totalorder %v6449_v0, 15 }
 0x3d3   : > { %4691 = vmin.xlane.f32.xlu0 %v4690_v3  ;;  %6312 = vpush %v2882_v31  ;;  %v7484_v3 = vshrl.u32 %v7732_v56, 7 }
 0x3d5   : > { %vm4710_vm2 = vcmp.eq.s32.totalorder %v6770_v25, %v7484_v3  ;;  %vm4993_vm10 = vcmp.eq.s32.totalorder %v5610_v15, %v7484_v3 }
 0x3d6   : > { %v5596_v31 = vsel %vm4710_vm2, 1.0, %v7731_v63  ;;  %vm5082_vm2 = vcmp.gt.f32.partialorder %v7427_v23, 0.5 }
 0x3d7   : > { %6035 = vmatprep.subr.msk.mxu1 %vm4719_vm3, %v5596_v31 }
 0x3d8   : > { %6036 = vmatpush3.msk.msra.mxu1 %vm4719_vm3, %v5596_v31 }
 0x3fc   : > { %s6311_s28 = spop %6310 }
 0x3fd   : > { %s5477_s29 = sadd.f32 -1000.0, %s6311_s28  ;;  %s7596_s28 = scalar_lea.hbm %s7684_s6, %s5633_s19 }
 0x3ff   : > { %v1676_v61 = vstv %s5477_s29  ;;  %s7598_s29 = scalar_lea.sflag [#allocation3], %s302_s15 }
 0x400   : > { %v1677_v14 = vsel %vm1674_vm9, %v7379_v60, %v1676_v61  ;;  %v1678_v21 = vsel %vm1675_vm14, %v7374_v30, %v1676_v61  ;;  %vm4895_vm9 = vcmp.gt.f32.partialorder %v7405_v2, 0.5  ;;  %vm4988_vm14 = vcmp.gt.f32.partialorder %v7411_v37, 0.5 }
 0x401   : > { %v1679_v33 = vsel %vm1660_vm0, %v1677_v14, -inf  ;;  %v1682_v32 = vsel %vm1660_vm0, %v1678_v21, -inf }
 0x402   : > { %1680 = vmax.xlane.f32.xlu1 %v1679_v33  ;;  %1683 = vmax.xlane.f32.xlu0 %v1682_v32 }
 0x404   : > { %s6313_s10 = spop %6312 }
 0x405   : > { %s5516_s12 = sadd.f32 -1000.0, %s6313_s10  ;;  %s6450_s10 = scalar_lea.vmem %s7591_s18, 256 }
 0x406   : > { %p6451_p11 = scmp.ne.s32.totalorder %s7591_s18, %s6450_s10 }
 0x407   : > { %v2887_v45 = vstv %s5516_s12  ;;  %s6454_s12 = sshll.u32 %s6523_s25, 4  ;;  %s6455_s12 = int_to_ptr.vmem [resolvable:$false] %s6454_s12 }
 0x408   : > { %v2889_v12 = vsel %vm2886_vm15, %v7388_v55, %v2887_v45  ;;  %v2888_v26 = vsel %vm2885_vm1, %v7391_v7, %v2887_v45  ;;  %v5600_v55 = vadd.s32 4294967290, %v6770_v25  ;;  %vm4989_vm1 = vcmp.gt.f32.partialorder %v7409_v24, 0.5  ;;  %p6452_p12 = pnand %p6451_p11, %p6599_p5  ;;  %p6457_p0 = scmp.lt.s32.totalorder %s7591_s18, %s6455_s12 }
 0x409   : > { %v2893_v60 = vsel %vm1660_vm0, %v2889_v12, -inf  ;;  %v2890_v30 = vsel %vm1660_vm0, %v2888_v26, -inf }
 0x40a   : > { %2894 = vmax.xlane.f32.xlu0 %v2893_v60  ;;  %2891 = vmax.xlane.f32.xlu1 %v2890_v30  ;;  %vm4805_vm4 = vcmp.eq.s32.totalorder %v5600_v55, %v7484_v3  ;;  %p6453_p13 = pneg %p6452_p12 }
 0x40b   : > { %v5601_v7 = vsel %vm4805_vm4, 1.0, %v7731_v63  ;;  %vm5083_vm4 = vcmp.gt.f32.partialorder %v7419_v22, 0.5 }
 0x40c   : > { %6040 = vmatprep.subr.msk.mxu1 %vm4719_vm3, %v5601_v7 }
 0x460   : > { %v4692_v11 = vpop.xlane.xlu0 %4691 }
 0x461   : > { %v4693_v4 = vrot.slane %v4692_v11, 4 }
 0x463   : > { %v4694_v61 = vmin.f32 %v4692_v11, %v4693_v4  ;;  %v5605_v11 = vadd.s32 4294967284, %v6770_v25 }
 0x465   : > { %v4695_v33 = vrot.slane %v4694_v61, 2  ;;  %vm4899_vm5 = vcmp.eq.s32.totalorder %v5605_v11, %v7484_v3 }
 0x467   : > { %v4696_v32 = vmin.f32 %v4694_v61, %v4695_v33 }
 0x469   : > { %v4697_v49 = vrot.slane %v4696_v32, 1 }
 0x46b   : > { %v4698_v0 = vmin.f32 %v4696_v32, %v4697_v49 }
 0x46d   : > { %6314 = vpush %v4698_v0 }
 0x48f   : > { %v1681_v45 = vpop.xlane.xlu1 %1680  ;;  %v1684_v60 = vpop.xlane.xlu0 %1683 }
 0x490   : > { %v1685_v30 = vsub.f32 %v1677_v14, %v1681_v45  ;;  %v1686_v56 = vsub.f32 %v1678_v21, %v1684_v60  ;;  %v5611_v21 = vsel %vm4993_vm10, 1.0, %v7731_v63 }
 0x492   : > { %v1687_v31 = vmul.f32 1.442695, %v1685_v30  ;;  %v1689_v57 = vmul.f32 1.442695, %v1686_v56 }
 0x494   : > { %6430 = vpow2.f32 %v1687_v31 }
 0x495   : > { %6432 = vpow2.f32 %v1689_v57 }
 0x497   : > { %v2892_v55 = vpop.xlane.xlu1 %2891  ;;  %v2895_v38 = vpop.xlane.xlu0 %2894 }
 0x498   : > { %v2896_v28 = vsub.f32 %v2888_v26, %v2892_v55  ;;  %v2897_v54 = vsub.f32 %v2889_v12, %v2895_v38  ;;  %v5615_v26 = vadd.s32 4294967272, %v6770_v25 }
 0x49a   : > { %v2898_v18 = vmul.f32 1.442695, %v2896_v28  ;;  %v2900_v43 = vmul.f32 1.442695, %v2897_v54  ;;  %vm5087_vm13 = vcmp.eq.s32.totalorder %v5615_v26, %v7484_v3 }
 0x49b   : > { %v5616_v36 = vsel %vm5087_vm13, 1.0, %v7731_v63 }
 0x49c   : > { %6434 = vpow2.f32 %v2898_v18 }
 0x49d   : > { %6436 = vpow2.f32 %v2900_v43  ;;  %v5606_v43 = vsel %vm4899_vm5, 1.0, %v7731_v63  ;;  %vm5176_vm5 = vcmp.gt.f32.partialorder %v7461_v51, 0.5 }
 0x49e   : > { %v7496_v4 = vpop.eup %6430  ;;  %s6315_s13 = spop %6314 }
 0x49f   : > { %v7498_v61 = vpop.eup %6432  ;;  %s5595_s14 = sadd.f32 -1.0, %s6315_s13  ;;  %v1691_v14 = vsel %vm1660_vm0, %v7496_v4, 0.0  ;;  %s6456_s13 = scalar_lea.vmem %s6455_s12, 512 }
 0x4a0   : > { %1692 = vadd.xlane.f32.xlu1 %v1691_v14  ;;  %v1694_v57 = vsel %vm1660_vm0, %v7498_v61, 0.0  ;;  %p6458_p1 = scmp.lt.s32.totalorder %s6456_s13, %s6450_s10 }
 0x4a1   : > { %v4707_v38 = vstv %s5595_s14  ;;  %1695 = vadd.xlane.f32.xlu0 %v1694_v57 }
 0x4a2   : > { %v4708_v18 = vsel %vm4705_vm7, %v4707_v38, %v7430_v41  ;;  %v4709_v28 = vsel %vm4706_vm6, %v4707_v38, %v7422_v1  ;;  %v4802_v54 = vsel %vm4800_vm8, %v4707_v38, %v7417_v58  ;;  %v4803_v58 = vsel %vm4801_vm11, %v4707_v38, %v7414_v8  ;;  %p6459_p2 = por %p6458_p1, %p6457_p0 }
 0x4a3   : > { %6037 = vmatprep.mubr.msk.f32.mxu1 %vm1660_vm0, %v4708_v18  ;;  %v4896_v12 = vsel %vm4894_vm12, %v4707_v38, %v7433_v13  ;;  %v4897_v46 = vsel %vm4895_vm9, %v4707_v38, %v7425_v52  ;;  %v4990_v8 = vsel %vm4988_vm14, %v4707_v38, %v7443_v50  ;;  %v5620_v13 = vadd.s32 4294967266, %v6770_v25 }
 0x4a4   : > { %6038 = vmatmul.mubr.msk.f32.vlgmr.msra.gmra.mrb[52].mxu1 %vm1660_vm0, %v4709_v28  ;;  %v4991_v2 = vsel %vm4989_vm1, %v4707_v38, %v7438_v48  ;;  %v5084_v52 = vsel %vm5082_vm2, %v4707_v38, %v7451_v34  ;;  %v5085_v24 = vsel %vm5083_vm4, %v4707_v38, %v7447_v42  ;;  %vm5177_vm6 = vcmp.gt.f32.partialorder %v7455_v40, 0.5  ;;  %p6460_p3 = pnand %p6459_p2, %p6453_p13 }
 0x4a5   : > { %6042 = vmatprep.mubr.msk.f32.mxu1 %vm1660_vm0, %v4802_v54  ;;  %6041 = vmatpush3.msk.msra.mxu1 %vm4719_vm3, %v5601_v7  ;;  %vm5181_vm15 = vcmp.eq.s32.totalorder %v5620_v13, %v7484_v3  ;;  %v5179_v23 = vsel %vm5177_vm6, %v4707_v38, %v7459_v44 }
 0x4a6   : > { %v7517_v19 = vpop.eup %6434  ;;  %6045 = vmatprep.subr.msk.mxu1 %vm4719_vm3, %v5606_v43  ;;  %v5621_v37 = vsel %vm5181_vm15, 1.0, %v7731_v63  ;;  %v5178_v63 = vsel %vm5176_vm5, %v4707_v38, %v7465_v47 }
 0x4a7   : > { %v7520_v1 = vpop.eup %6436  ;;  %v2902_v39 = vsel %vm1660_vm0, %v7517_v19, 0.0 }
 0x4a8   : > { %2903 = vadd.xlane.f32.xlu1 %v2902_v39  ;;  %v2905_v41 = vsel %vm1660_vm0, %v7520_v1, 0.0 }
 0x4a9   : > { %2906 = vadd.xlane.f32.xlu0 %v2905_v41 }
 0x4ac   : > { %6043 = vmatmul.mubr.msk.f32.vlgmr.msra.gmra.mrb[52].mxu1 %vm1660_vm0, %v4803_v58 }
 0x4ad   : > { %6047 = vmatprep.mubr.msk.f32.mxu1 %vm1660_vm0, %v4896_v12  ;;  %6046 = vmatpush3.msk.msra.mxu1 %vm4719_vm3, %v5606_v43 }
 0x4ae   : > { %6050 = vmatprep.subr.msk.mxu1 %vm4719_vm3, %v5611_v21 }
 0x4b4   : > { %6048 = vmatmul.mubr.msk.f32.vlgmr.msra.gmra.mrb[52].mxu1 %vm1660_vm0, %v4897_v46 }
 0x4b5   : > { %6052 = vmatprep.mubr.msk.f32.mxu1 %vm1660_vm0, %v4990_v8  ;;  %6051 = vmatpush3.msk.msra.mxu1 %vm4719_vm3, %v5611_v21 }
 0x4b6   : > { %6055 = vmatprep.subr.msk.mxu1 %vm4719_vm3, %v5616_v36 }
 0x4bc   : > { %6053 = vmatmul.mubr.msk.f32.vlgmr.msra.gmra.mrb[52].mxu1 %vm1660_vm0, %v4991_v2 }
 0x4bd   : > { %6057 = vmatprep.mubr.msk.f32.mxu1 %vm1660_vm0, %v5084_v52  ;;  %6056 = vmatpush3.msk.msra.mxu1 %vm4719_vm3, %v5616_v36 }
 0x4be   : > { %6060 = vmatprep.subr.msk.mxu1 %vm4719_vm3, %v5621_v37 }
 0x4c4   : > { %6058 = vmatmul.mubr.msk.f32.vlgmr.msra.gmra.mrb[52].mxu1 %vm1660_vm0, %v5085_v24 }
 0x4c5   : > { %6062 = vmatprep.mubr.msk.f32.mxu1 %vm1660_vm0, %v5178_v63  ;;  %6061 = vmatpush3.msk.msra.mxu1 %vm4719_vm3, %v5621_v37 }
 0x4cc   : > { %6063 = vmatmul.mubr.msk.f32.vlgmr.msra.gmra.mrb[52].mxu1 %vm1660_vm0, %v5179_v23  ;;  %vm4701_vm0 = vcmp.lt.s32.totalorder %v6770_v25, 36 }
 0x52d   : > { %v1693_v48 = vpop.xlane.xlu1 %1692 }
 0x52e   : > { %6438 = vrcp.f32 %v1693_v48  ;;  %v1696_v22 = vpop.xlane.xlu0 %1695 }
 0x52f   : > { %6440 = vrcp.f32 %v1696_v22 }
 0x535   : > { %v2904_v47 = vpop.xlane.xlu1 %2903 }
 0x536   : > { %v2907_v50 = vpop.xlane.xlu0 %2906 }
 0x537   : > { %6442 = vrcp.f32 %v2907_v50 }
 0x538   : > { %v6439_v42 = vpop.eup %6438  ;;  %6444 = vrcp.f32 %v2904_v47 }
 0x539   : > { %v6441_v34 = vpop.eup %6440  ;;  %v1698_v51 = vmul.f32 %v6439_v42, %v7496_v4 }
 0x53a   : > { %v1700_v3 = vmul.f32 %v6441_v34, %v7498_v61 }
 0x53b   : > { %1703 = vperm.xlu1 %6412, %v1698_v51  }
 0x53c   : > { %1708 = vperm.xlu0 %6413, %v1700_v3  }
 0x53f   : > { %6414 = vset.pattern.permute.xlu1 %v7726_v53 }
 0x540   : > { %6418 = vset.pattern.permute.xlu0 %v7730_v59  ;;  %1714 = vperm.xlu1 %6414, %v1698_v51  }
 0x541   : > { %v6443_v44 = vpop.eup %6442  ;;  %1762 = vperm.xlu0 %6418, %v1698_v51  }
 0x542   : > { %v2911_v40 = vmul.f32 %v6443_v44, %v7520_v1  ;;  %v6445_v7 = vpop.eup %6444 }
 0x543   : > { %v2909_v33 = vmul.f32 %v6445_v7, %v7517_v19 }
 0x544   : > { %1718 = vperm.xlu1 %6414, %v1700_v3  }
 0x545   : > { %6421 = vset.pattern.permute.xlu0 %v7725_v17 }
 0x546   : > { %2919 = vperm.xlu0 %6421, %v2911_v40  }
 0x548   : > { %6415 = vset.pattern.permute.xlu1 %v7728_v29 }
 0x549   : > { %1726 = vperm.xlu1 %6415, %v1698_v51  }
 0x54a   : > { %6423 = vset.pattern.permute.xlu0 %v7728_v29 }
 0x54b   : > { %2937 = vperm.xlu0 %6423, %v2909_v33  }
 0x54d   : > { %1730 = vperm.xlu1 %6415, %v1700_v3  }
 0x54f   : > { %6426 = vset.pattern.permute.xlu0 %v7727_v62 }
 0x550   : > { %2953 = vperm.xlu0 %6426, %v2911_v40  }
 0x551   : > { %6416 = vset.pattern.permute.xlu1 %v7727_v62 }
 0x552   : > { %1738 = vperm.xlu1 %6416, %v1698_v51  }
 0x554   : > { %6428 = vset.pattern.permute.xlu0 %v7730_v59 }
 0x555   : > { %2973 = vperm.xlu0 %6428, %v2909_v33  }
 0x556   : > { %1742 = vperm.xlu1 %6416, %v1700_v3  }
 0x55a   : > { %6417 = vset.pattern.permute.xlu1 %v7729_v20 }
 0x55b   : > { %1750 = vperm.xlu1 %6417, %v1698_v51  }
 0x55f   : > { %1754 = vperm.xlu1 %6417, %v1700_v3  }
 0x563   : > { %6419 = vset.pattern.permute.xlu1 %v7730_v59 }
 0x564   : > { %1766 = vperm.xlu1 %6419, %v1700_v3  }
 0x568   : > { %6420 = vset.pattern.permute.xlu1 %v7725_v17  ;;  %v6522_v17 = vmov -1e+30  }
 0x569   : > { %2914 = vperm.xlu1 %6420, %v2909_v33  }
 0x56d   : > { %6422 = vset.pattern.permute.xlu1 %v7726_v53  ;;  %v4702_v53 = vsel %vm4701_vm0, 0.0, %v6522_v17 }
 0x56e   : > { %2925 = vperm.xlu1 %6422, %v2909_v33  }
 0x572   : > { %2929 = vperm.xlu1 %6422, %v2911_v40  }
 0x576   : > { %6424 = vset.pattern.permute.xlu1 %v7728_v29 }
 0x577   : > { %2941 = vperm.xlu1 %6424, %v2911_v40  }
 0x57b   : > { %6425 = vset.pattern.permute.xlu1 %v7727_v62 }
 0x57c   : > { %2949 = vperm.xlu1 %6425, %v2909_v33  }
 0x580   : > { %6427 = vset.pattern.permute.xlu1 %v7729_v20 }
 0x581   : > { %2961 = vperm.xlu1 %6427, %v2909_v33  }
 0x585   : > { %2965 = vperm.xlu1 %6427, %v2911_v40  }
 0x589   : > { %6429 = vset.pattern.permute.xlu1 %v7730_v59 }
 0x58a   : > { %2977 = vperm.xlu1 %6429, %v2911_v40  }
 0x59f   : > { %v6064_v29 = vpop.f32.mrb[52].mxu1 }
 0x5a0   : > { %v6297_v62 = vadd.f32 %v6064_v29, %v4702_v53  ;;  %v5259_v20 = vpop.f32.mrb[53].mxu1 }
 0x5a1   : > { %v6298_v59 = vadd.f32 %v5259_v20, %v4702_v53 }
 0x5a2   : > { %5271 = vst [vmem:[%s304_s17 + $0x8] sm:$0xff] %v6297_v62 }
 0x5a3   : > { %5270 = vst [vmem:[%s304_s17] sm:$0xff] %v6298_v59 }
 0x5a4   : > { %6463 = shalt.err (!%p6460_p3)
}
 0x5a5   : > { %s6464_s14 = scalar_lea.hbm %s7596_s28, 256  ;;  %s6468_s17 = scalar_lea.hbm %s7684_s6, 512 }
 0x5a6   : > { %p6465_p4 = scmp.ne.s32.totalorder %s7596_s28, %s6464_s14  ;;  %p6469_p9 = scmp.lt.u32.totalorder %s7596_s28, %s7684_s6 }
 0x5a7   : > { %p6470_p10 = scmp.lt.u32.totalorder %s6468_s17, %s6464_s14  ;;  %p6472_p12 = scmp.lt.u32.totalorder %s6464_s14, %s7596_s28 }
 0x5a8   : > { %p6466_p7 = pnand %p6465_p4, %p6599_p5 }
 0x5a9   : > { %p6471_p11 = por %p6470_p10, %p6469_p9 }
 0x5aa   : > { %p6467_p8 = pneg %p6466_p7 }
 0x5ab   : > { %p6473_p13 = por %p6472_p12, %p6471_p11 }
 0x5ad   : > { %p6474_p0 = pnand %p6473_p13, %p6467_p8 }
 0x5af   : > { %6477 = shalt.err (!%p6474_p0)
}
 0x5b0   : > { %s6524_s26 = smov 128   ;;  %s6525_s10 = smov 8   ;;  %v7733_v43 = vld [vmem:[#allocation10_spill] sm:$0xff]  ;;  %v7735_v39 = vld [vmem:[#allocation12_spill] sm:$0xff]  ;;  %v7737_v26 = vld [vmem:[#allocation5_spill] sm:$0xff] }
 0x5b1   : > { %6316 = dma.vmem_to_hbm [thread:$0]  (%p6599_p5), %s7591_s18, 256, %s7596_s28, %s7598_s29, %s6524_s26, %s6524_s26, %s6525_s10   ;;  %v7736_v12 = vld [vmem:[#allocation8_spill] sm:$0xff]  ;;  %v7738_v8 = vld [vmem:[#allocation14_spill] sm:$0xff]  ;;  %v7740_v22 = vld [vmem:[#allocation9_spill] sm:$0xff] }
 0x5b2   : > { %v7739_v52 = vld [vmem:[#allocation6_spill] sm:$0xff]  ;;  %v7741_v42 = vld [vmem:[#allocation16_spill] sm:$0xff]  ;;  %v7742_v51 = vld [vmem:[#allocation13_spill] sm:$0xff]  ;;  %s322_s28 = scalar_lea.vmem %s7681_s3, %s6613_s9  ;;  %s325_s12 = scalar_lea.vmem %s7682_s4, %s6613_s9 }
 0x5b3   : > { %v7743_v40 = vld [vmem:[#allocation11_spill] sm:$0xff]  ;;  %v7744_v33 = vld [vmem:[#allocation18_spill] sm:$0xff]  ;;  %s330_s15 = scalar_lea.vmem %s7683_s5, %s5630_s11 }
 0x5b4   : > { %v7745_v59 = vld [vmem:[#allocation15_spill] sm:$0xff] }
 0x5ba   : > { %v1704_v25 = vpop.permute.xlu1 %1703 }
 0x5bb   : > { %v1711_v49 = vmul.f32 %v1704_v25, %v7062_v5  ;;  %v1709_v45 = vpop.permute.xlu0 %1708 }
 0x5bc   : > { %v1712_v56 = vmul.f32 %v1709_v45, %v7066_v9 }
 0x5bf   : > { %v1715_v32 = vpop.permute.xlu1 %1714 }
 0x5c0   : > { %v1721_v0 = vmul.f32 %v1715_v32, %v7078_v16  ;;  %v1763_v9 = vpop.permute.xlu0 %1762  ;;  %v7746_v32 = vld [vmem:[#allocation21_spill] sm:$0xff] }
 0x5c1   : > { %v1769_v41 = vmul.f32 %v1763_v9, %v7735_v39  ;;  %v5518_v9 = vld [vmem:[%s325_s12] ss:$0 sm:$0xff] }
 0x5c2   : > { %v1723_v60 = vadd.f32 %v1721_v0, %v1711_v49 }
 0x5c3   : > { %v1719_v30 = vpop.permute.xlu1 %1718 }
 0x5c4   : > { %v1722_v31 = vmul.f32 %v1719_v30, %v7082_v27  ;;  %v7734_v27 = vld [vmem:[#allocation7_spill] sm:$0xff]  ;;  %v7747_v30 = vld [vmem:[#allocation20_spill] sm:$0xff] }
 0x5c5   : > { %v2920_v37 = vpop.permute.xlu0 %2919 }
 0x5c6   : > { %v1724_v55 = vadd.f32 %v1722_v31, %v1712_v56  ;;  %v2923_v7 = vmul.f32 %v2920_v37, %v7743_v40 }
 0x5c8   : > { %v1727_v11 = vpop.permute.xlu1 %1726 }
 0x5c9   : > { %v1733_v4 = vmul.f32 %v1727_v11, %v7064_v6 }
 0x5ca   : > { %v2938_v23 = vpop.permute.xlu0 %2937 }
 0x5cb   : > { %v1735_v61 = vadd.f32 %v1733_v4, %v1723_v60  ;;  %v2944_v47 = vmul.f32 %v2938_v23, %v7742_v51  ;;  %v7748_v4 = vld [vmem:[#allocation17_spill] sm:$0xff] }
 0x5cc   : > { %v1731_v14 = vpop.permute.xlu1 %1730 }
 0x5cd   : > { %v1734_v57 = vmul.f32 %v1731_v14, %v7068_v10  ;;  %v7749_v14 = vld [vmem:[#allocation22_spill] sm:$0xff] }
 0x5cf   : > { %v1736_v38 = vadd.f32 %v1734_v57, %v1724_v55  ;;  %v2954_v62 = vpop.permute.xlu0 %2953 }
 0x5d0   : > { %v2957_v49 = vmul.f32 %v2954_v62, %v7746_v32 }
 0x5d1   : > { %v1739_v18 = vpop.permute.xlu1 %1738 }
 0x5d2   : > { %v1745_v5 = vmul.f32 %v1739_v18, %v7094_v35 }
 0x5d4   : > { %v1747_v16 = vadd.f32 %v1745_v5, %v1735_v61  ;;  %v2974_v55 = vpop.permute.xlu0 %2973 }
 0x5d5   : > { %v1743_v28 = vpop.permute.xlu1 %1742  ;;  %v2980_v57 = vmul.f32 %v2974_v55, %v7749_v14 }
 0x5d6   : > { %v1746_v54 = vmul.f32 %v1743_v28, %v7733_v43  ;;  %v5517_v43 = vld [vmem:[%s322_s28] ss:$0 sm:$0xff] }
 0x5d8   : > { %v1748_v15 = vadd.f32 %v1746_v54, %v1736_v38 }
 0x5da   : > { %v1751_v19 = vpop.permute.xlu1 %1750 }
 0x5db   : > { %v1757_v1 = vmul.f32 %v1751_v19, %v7734_v27 }
 0x5dd   : > { %v1759_v6 = vadd.f32 %v1757_v1, %v1747_v16  ;;  %v7750_v16 = vld [vmem:[#allocation19_spill] sm:$0xff] }
 0x5de   : > { %v1755_v58 = vpop.permute.xlu1 %1754  ;;  %v7751_v1 = vld [vmem:[#allocation23_spill] sm:$0xff] }
 0x5df   : > { %v1771_v21 = vadd.f32 %v1769_v41, %v1759_v6  ;;  %v1758_v10 = vmul.f32 %v1755_v58, %v7736_v12 }
 0x5e1   : > { %v1773_v46 = vadd.f32 %v1771_v21, %v7737_v26  ;;  %v1760_v36 = vadd.f32 %v1758_v10, %v1748_v15 }
 0x5e3   : > { %v1767_v35 = vpop.permute.xlu1 %1766 }
 0x5e4   : > { %v1770_v13 = vmul.f32 %v1767_v35, %v7738_v8 }
 0x5e6   : > { %v1772_v2 = vadd.f32 %v1770_v13, %v1760_v36 }
 0x5e8   : > { %v1774_v24 = vadd.f32 %v1772_v2, %v7739_v52  ;;  %v2915_v63 = vpop.permute.xlu1 %2914 }
 0x5e9   : > { %v2922_v50 = vmul.f32 %v2915_v63, %v7740_v22 }
 0x5ed   : > { %v2926_v48 = vpop.permute.xlu1 %2925 }
 0x5ee   : > { %v2932_v34 = vmul.f32 %v2926_v48, %v7741_v42 }
 0x5f0   : > { %v2934_v3 = vadd.f32 %v2932_v34, %v2922_v50 }
 0x5f1   : > { %v2930_v44 = vpop.permute.xlu1 %2929 }
 0x5f2   : > { %v2933_v17 = vmul.f32 %v2930_v44, %v7744_v33  ;;  %v2946_v53 = vadd.f32 %v2944_v47, %v2934_v3 }
 0x5f4   : > { %v2935_v29 = vadd.f32 %v2933_v17, %v2923_v7 }
 0x5f6   : > { %v2942_v20 = vpop.permute.xlu1 %2941 }
 0x5f7   : > { %v2945_v25 = vmul.f32 %v2942_v20, %v7745_v59 }
 0x5f9   : > { %v2947_v0 = vadd.f32 %v2945_v25, %v2935_v29 }
 0x5fb   : > { %v2950_v45 = vpop.permute.xlu1 %2949  ;;  %v2959_v60 = vadd.f32 %v2957_v49, %v2947_v0 }
 0x5fc   : > { %v2956_v56 = vmul.f32 %v2950_v45, %v7747_v30 }
 0x5fe   : > { %v2958_v31 = vadd.f32 %v2956_v56, %v2946_v53 }
 0x600   : > { %v2962_v11 = vpop.permute.xlu1 %2961 }
 0x601   : > { %v2968_v61 = vmul.f32 %v2962_v11, %v7748_v4 }
 0x603   : > { %v2970_v38 = vadd.f32 %v2968_v61, %v2958_v31 }
 0x604   : > { %v2966_v18 = vpop.permute.xlu1 %2965 }
 0x605   : > { %v2982_v5 = vadd.f32 %v2980_v57, %v2970_v38  ;;  %v2969_v28 = vmul.f32 %v2966_v18, %v7750_v16 }
 0x607   : > { %v2984_v54 = vadd.f32 %v2982_v5, %v1773_v46  ;;  %v2971_v15 = vadd.f32 %v2969_v28, %v2959_v60 }
 0x609   : > { %v2978_v19 = vpop.permute.xlu1 %2977  ;;  %v2993_v27 = vmul.f32 %v5517_v43, %v2984_v54 }
 0x60a   : > { %v2981_v39 = vmul.f32 %v2978_v19, %v7751_v1 }
 0x60b   : > { %v3002_v41 = vadd.f32 %v5518_v9, %v2993_v27 }
 0x60c   : > { %v2983_v6 = vadd.f32 %v2981_v39, %v2971_v15 }
 0x60d   : > { %3004 = vst [vmem:[%s330_s15] sm:$0xff] %v3002_v41 }
 0x60e   : > { %v2985_v58 = vadd.f32 %v2983_v6, %v1774_v24 }
 0x610   : > { %v2994_v21 = vmul.f32 %v5517_v43, %v2985_v58 }
 0x612   : > { %v3003_v12 = vadd.f32 %v5518_v9, %v2994_v21 }
 0x614   : > { %3005 = vst [vmem:[%s330_s15 + $0x8] sm:$0xff] %v3003_v12 }
 0x615 PF: > { %p6322_p5 = scmp.ge.s32.totalorder %s6512_s24, 2  ;;  %s5317_s16 = sand.u32 1, %s6500_s21  }
 0x616   : > { %s5318_s9 = scalar_lea.sflag [#allocation3], %s5317_s16 }
 0x617   : > { %p6319_p1 = pnand %p6322_p5, %p6603_p6 }
 0x619   : > { %6495 = dma.done.wait (!%p6319_p1), %s5318_s9, 256  }
 0x61a   : > { %6497 = vsyncadd (!%p6319_p1), %s5318_s9, 4294967040  ;;  %p17_p2 = scmp.ge.s32.totalorder %s6586_s27, 4   ;;  %s7752_s21 = smov %s6504_s22 }
 0x61b   : > { %s7753_s22 = smov %s6508_s23  ;;  %s7754_s23 = smov %s6597_s30 }
 0x61c   : > { %s7755_s24 = smov %s6586_s27  ;;  %19 = sbr.rel (!%p17_p2) target bundleno = 3 (0x3), region = 100 }
 0x623   :  { %5323 = vsyncpa [#allocation3], 1 }
 0x624   :  { %5325 = vsyncpa [#allocation3 + $0x1], 1 }

</bundles_post_ra>
